<compile_context>
chip_gen: v7x
topology: tpu7x:2x2x1
jax: 0.10.0
libtpu: 0.0.40
codegen_flags: <defaults>
</compile_context>

<pallas_src>
import functools

import jax
import jax.numpy as jnp
from jax.experimental import pallas as pl
from jax.experimental.pallas import tpu as pltpu

SEQ_LEN = 8
N_FEATURES = 4
EMBEDDING_DIM = 32  # == hidden_dim
NUM_LAYERS = 3

PADDED_H = 128                       # lane-pad hidden dim to one full vreg width
OUT_ROWS = 16                        # T + 2*L = 14, padded to 16 (2 sublane tiles)


def _encoder_lstm_kernel(x_ref, wih_ref, whh_ref, b_ref, out_ref):
    """Fused 3-layer LSTM over the full (batch=1) sequence.

    x_ref:   (T, HP)        layer-0 input, zero-padded to HP features (VMEM)
    wih_ref: (L, HP, 4*HP)  input->gates weights (transposed, gate-lane padded)
    whh_ref: (L, HP, 4*HP)  hidden->gates weights (transposed, gate-lane padded)
    b_ref:   (L, 1, 4*HP)   b_ih + b_hh per layer (gate-lane padded)
    out_ref: (OUT_ROWS, HP) rows [0:T]           = last layer's h per timestep
                            rows [T:T+L]         = final h per layer
                            rows [T+L:T+2L]      = final c per layer
                            rows [T+2L:OUT_ROWS] = zero padding
    """
    T = SEQ_LEN
    HP = PADDED_H
    L = NUM_LAYERS

    seq = x_ref[...]                                         # (T, HP) in regs
    h_finals = []
    c_finals = []

    for layer in range(L):
        wih = wih_ref[layer]                                 # (HP, 4*HP)
        whh = whh_ref[layer]                                 # (HP, 4*HP)
        b = b_ref[layer]                                     # (1, 4*HP)

        # Hoisted input projection: one batched MXU matmul per layer,
        # bias folded in so the serial loop only adds h @ W_hh.
        xw = jnp.dot(seq, wih, preferred_element_type=jnp.float32) + b  # (T, 4HP)
        # Hoist the per-step row extraction off the h->h critical chain.
        xw_rows = [xw[t:t + 1, :] for t in range(T)]

        h = jnp.zeros((1, HP), jnp.float32)
        c = jnp.zeros((1, HP), jnp.float32)
        rows = []

        # Fully unrolled serial recurrence; h/c live in vregs the whole time.
        for t in range(T):
            gates = xw_rows[t] + jnp.dot(
                h, whh, preferred_element_type=jnp.float32)  # (1, 4*HP)

            sig = jax.nn.sigmoid(gates)                      # one EUP pass, full width
            i_g = sig[:, 0 * HP:1 * HP]                      # whole-vreg selections
            f_g = sig[:, 1 * HP:2 * HP]
            o_g = sig[:, 3 * HP:4 * HP]
            g_g = jnp.tanh(gates[:, 2 * HP:3 * HP])

            c = f_g * c + i_g * g_g
            h = o_g * jnp.tanh(c)
            rows.append(h)                                   # stays in vregs

        seq = jnp.concatenate(rows, axis=0)                  # (T, HP): next layer input
        h_finals.append(h)
        c_finals.append(c)

    # Single lane-dense output slab, written exactly once.
    parts = [seq] + h_finals + c_finals
    extra = OUT_ROWS - (T + 2 * L)
    if extra > 0:
        parts.append(jnp.zeros((extra, HP), jnp.float32))
    out_ref[...] = jnp.concatenate(parts, axis=0)            # (OUT_ROWS, HP)


def init_encoder_params(key, n_features, embedding_dim):
    """PyTorch-style U(-1/sqrt(H), 1/sqrt(H)) init, stacked & lane-padded."""
    H = embedding_dim
    HP = PADDED_H
    k = 1.0 / jnp.sqrt(jnp.float32(H))
    wih_l, whh_l, b_l = [], [], []
    for layer in range(NUM_LAYERS):
        in_dim = n_features if layer == 0 else H
        key, k1, k2, k3, k4 = jax.random.split(key, 5)
        w_ih = jax.random.uniform(k1, (4 * H, in_dim), jnp.float32, -k, k)
        w_hh = jax.random.uniform(k2, (4 * H, H), jnp.float32, -k, k)
        b_ih = jax.random.uniform(k3, (4 * H,), jnp.float32, -k, k)
        b_hh = jax.random.uniform(k4, (4 * H,), jnp.float32, -k, k)

        def pad_gates(w_t, rows):
            # w_t: (rows, 4H) with gate order [i, f, g, o] along the 4H axis.
            w_t = w_t.reshape(rows, 4, H)
            w_t = jnp.pad(w_t, ((0, 0), (0, 0), (0, HP - H)))      # gate lanes -> HP
            w_t = w_t.reshape(rows, 4 * HP)
            return jnp.pad(w_t, ((0, HP - rows), (0, 0)))          # input rows -> HP

        wih_l.append(pad_gates(jnp.transpose(w_ih), in_dim))        # (HP, 4*HP)
        whh_l.append(pad_gates(jnp.transpose(w_hh), H))             # (HP, 4*HP)

        b = (b_ih + b_hh).reshape(4, H)
        b = jnp.pad(b, ((0, 0), (0, HP - H))).reshape(1, 4 * HP)    # (1, 4*HP)
        b_l.append(b)

    wih = jnp.stack(wih_l, axis=0)                                  # (L, HP, 4*HP)
    whh = jnp.stack(whh_l, axis=0)                                  # (L, HP, 4*HP)
    b = jnp.stack(b_l, axis=0)                                      # (L, 1, 4*HP)
    return wih, whh, b


@functools.partial(jax.jit, static_argnums=(4, 5, 6))
def encoder_forward(x, wih, whh, b, seq_len, n_features, embedding_dim):
    """Equivalent of Encoder.forward: returns (x_out, hidden, cell)."""
    H = embedding_dim
    T = seq_len
    L = NUM_LAYERS
    HP = PADDED_H

    x = x.reshape((1, T, n_features)).astype(jnp.float32)
    inp = jnp.pad(x[0], ((0, 0), (0, HP - n_features)))             # (T, HP)

    # Advisory cost hint (tiny kernel, purely latency-bound).
    flops = 2 * L * (T * HP * 4 * HP + T * 1 * HP * 4 * HP)
    transcendentals = L * T * 6 * HP
    bytes_accessed = (inp.size + wih.size + whh.size + b.size + OUT_ROWS * HP) * 4

    vmem = pl.BlockSpec(memory_space=pltpu.MemorySpace.VMEM)
    out = pl.pallas_call(
        _encoder_lstm_kernel,
        out_shape=jax.ShapeDtypeStruct((OUT_ROWS, HP), jnp.float32),
        in_specs=[vmem] * 4,
        out_specs=vmem,
        cost_estimate=pl.CostEstimate(
            flops=flops,
            transcendentals=transcendentals,
            bytes_accessed=bytes_accessed,
        ),
    )(inp, wih, whh, b)

    y = out[:T, :H]                                                 # (T, H)
    hidden = out[T:T + L, :H][:, None, :]                           # (L, 1, H)
    cell = out[T + L:T + 2 * L, :H][:, None, :]                     # (L, 1, H)
    x_out = y[None, :, :]                                           # (1, T, H)
    return x_out, hidden, cell


if __name__ == "__main__":
    key = jax.random.PRNGKey(0)
    k_param, k_input = jax.random.split(key)

    wih, whh, b = init_encoder_params(k_param, N_FEATURES, EMBEDDING_DIM)
    x = jax.random.normal(k_input, (SEQ_LEN, N_FEATURES), dtype=jnp.float32)

    x_out, hidden, cell = encoder_forward(
        x, wih, whh, b, SEQ_LEN, N_FEATURES, EMBEDDING_DIM
    )
    jax.block_until_ready((x_out, hidden, cell))

    assert x_out.shape == (1, SEQ_LEN, EMBEDDING_DIM)
    assert hidden.shape == (NUM_LAYERS, 1, EMBEDDING_DIM)
    assert cell.shape == (NUM_LAYERS, 1, EMBEDDING_DIM)
    assert bool(jnp.all(jnp.isfinite(x_out)))
    assert bool(jnp.all(jnp.isfinite(hidden)))
    assert bool(jnp.all(jnp.isfinite(cell)))
    # Last timestep of the top layer must equal the top layer's final hidden.
    assert bool(jnp.allclose(x_out[0, -1], hidden[-1, 0], atol=1e-6))
    print("KERNEL_OK")
</pallas_src>

<mosaic_0001>
module attributes {stable_mosaic.version = 11 : i64} {
  func.func @_encoder_lstm_kernel(%arg0: memref<8x128xf32, #tpu.memory_space<vmem>>, %arg1: memref<3x128x512xf32, #tpu.memory_space<vmem>>, %arg2: memref<3x128x512xf32, #tpu.memory_space<vmem>>, %arg3: memref<3x1x512xf32, #tpu.memory_space<vmem>>, %arg4: memref<16x128xf32, #tpu.memory_space<vmem>>) attributes {dimension_semantics = [], scalar_prefetch = 0 : i64, scratch_operands = 0 : i64, tpu.core_type = #tpu.core_type<tc>} {
    %c0 = arith.constant 0 : index
    %c0_0 = arith.constant 0 : index
    %0 = vector.load %arg0[%c0, %c0_0] : memref<8x128xf32, #tpu.memory_space<vmem>>, vector<8x128xf32>
    %c0_1 = arith.constant 0 : index
    %c0_2 = arith.constant 0 : index
    %c0_3 = arith.constant 0 : index
    %1 = vector.load %arg1[%c0_1, %c0_2, %c0_3] : memref<3x128x512xf32, #tpu.memory_space<vmem>>, vector<1x128x512xf32>
    %2 = vector.shape_cast %1 : vector<1x128x512xf32> to vector<128x512xf32>
    %c0_4 = arith.constant 0 : index
    %c0_5 = arith.constant 0 : index
    %c0_6 = arith.constant 0 : index
    %3 = vector.load %arg2[%c0_4, %c0_5, %c0_6] : memref<3x128x512xf32, #tpu.memory_space<vmem>>, vector<1x128x512xf32>
    %4 = vector.shape_cast %3 : vector<1x128x512xf32> to vector<128x512xf32>
    %c0_7 = arith.constant 0 : index
    %c0_8 = arith.constant 0 : index
    %c0_9 = arith.constant 0 : index
    %5 = vector.load %arg3[%c0_7, %c0_8, %c0_9] : memref<3x1x512xf32, #tpu.memory_space<vmem>>, vector<1x1x512xf32>
    %6 = vector.shape_cast %5 : vector<1x1x512xf32> to vector<1x512xf32>
    %cst = arith.constant dense<0.000000e+00> : vector<8x512xf32>
    %7 = tpu.matmul %0, %2, %cst {dimension_numbers = #tpu.dot_dimension_numbers<[1], [0], [0], [1], [0, 0, 1, 1], [], []>} : vector<8x128xf32>, vector<128x512xf32>, vector<8x512xf32> -> vector<8x512xf32>
    %8 = vector.broadcast %6 : vector<1x512xf32> to vector<8x512xf32>
    %9 = arith.addf %7, %8 : vector<8x512xf32>
    %10 = vector.extract_strided_slice %9 {offsets = [0, 0], sizes = [1, 512], strides = [1, 1]} : vector<8x512xf32> to vector<1x512xf32>
    %11 = vector.extract_strided_slice %9 {offsets = [1, 0], sizes = [1, 512], strides = [1, 1]} : vector<8x512xf32> to vector<1x512xf32>
    %12 = vector.extract_strided_slice %9 {offsets = [2, 0], sizes = [1, 512], strides = [1, 1]} : vector<8x512xf32> to vector<1x512xf32>
    %13 = vector.extract_strided_slice %9 {offsets = [3, 0], sizes = [1, 512], strides = [1, 1]} : vector<8x512xf32> to vector<1x512xf32>
    %14 = vector.extract_strided_slice %9 {offsets = [4, 0], sizes = [1, 512], strides = [1, 1]} : vector<8x512xf32> to vector<1x512xf32>
    %15 = vector.extract_strided_slice %9 {offsets = [5, 0], sizes = [1, 512], strides = [1, 1]} : vector<8x512xf32> to vector<1x512xf32>
    %16 = vector.extract_strided_slice %9 {offsets = [6, 0], sizes = [1, 512], strides = [1, 1]} : vector<8x512xf32> to vector<1x512xf32>
    %17 = vector.extract_strided_slice %9 {offsets = [7, 0], sizes = [1, 512], strides = [1, 1]} : vector<8x512xf32> to vector<1x512xf32>
    %cst_10 = arith.constant 0.000000e+00 : f32
    %18 = vector.broadcast %cst_10 : f32 to vector<1x128xf32>
    %cst_11 = arith.constant 0.000000e+00 : f32
    %19 = vector.broadcast %cst_11 : f32 to vector<1x128xf32>
    %cst_12 = arith.constant dense<0.000000e+00> : vector<1x512xf32>
    %20 = tpu.matmul %18, %4, %cst_12 {dimension_numbers = #tpu.dot_dimension_numbers<[1], [0], [0], [1], [0, 0, 1, 1], [], []>} : vector<1x128xf32>, vector<128x512xf32>, vector<1x512xf32> -> vector<1x512xf32>
    %21 = arith.addf %10, %20 : vector<1x512xf32>
    %22 = arith.negf %21 : vector<1x512xf32>
    %23 = math.exp %22 : vector<1x512xf32>
    %cst_13 = arith.constant 1.000000e+00 : f32
    %24 = vector.broadcast %cst_13 : f32 to vector<1x512xf32>
    %25 = arith.addf %24, %23 : vector<1x512xf32>
    %26 = arith.divf %24, %25 : vector<1x512xf32>
    %27 = vector.extract_strided_slice %26 {offsets = [0, 0], sizes = [1, 128], strides = [1, 1]} : vector<1x512xf32> to vector<1x128xf32>
    %28 = vector.extract_strided_slice %26 {offsets = [0, 128], sizes = [1, 128], strides = [1, 1]} : vector<1x512xf32> to vector<1x128xf32>
    %29 = vector.extract_strided_slice %26 {offsets = [0, 384], sizes = [1, 128], strides = [1, 1]} : vector<1x512xf32> to vector<1x128xf32>
    %30 = vector.extract_strided_slice %21 {offsets = [0, 256], sizes = [1, 128], strides = [1, 1]} : vector<1x512xf32> to vector<1x128xf32>
    %31 = math.tanh %30 : vector<1x128xf32>
    %32 = arith.mulf %28, %19 : vector<1x128xf32>
    %33 = arith.mulf %27, %31 : vector<1x128xf32>
    %34 = arith.addf %32, %33 : vector<1x128xf32>
    %35 = math.tanh %34 : vector<1x128xf32>
    %36 = arith.mulf %29, %35 : vector<1x128xf32>
    %cst_14 = arith.constant dense<0.000000e+00> : vector<1x512xf32>
    %37 = tpu.matmul %36, %4, %cst_14 {dimension_numbers = #tpu.dot_dimension_numbers<[1], [0], [0], [1], [0, 0, 1, 1], [], []>} : vector<1x128xf32>, vector<128x512xf32>, vector<1x512xf32> -> vector<1x512xf32>
    %38 = arith.addf %11, %37 : vector<1x512xf32>
    %39 = arith.negf %38 : vector<1x512xf32>
    %40 = math.exp %39 : vector<1x512xf32>
    %cst_15 = arith.constant 1.000000e+00 : f32
    %41 = vector.broadcast %cst_15 : f32 to vector<1x512xf32>
    %42 = arith.addf %41, %40 : vector<1x512xf32>
    %43 = arith.divf %41, %42 : vector<1x512xf32>
    %44 = vector.extract_strided_slice %43 {offsets = [0, 0], sizes = [1, 128], strides = [1, 1]} : vector<1x512xf32> to vector<1x128xf32>
    %45 = vector.extract_strided_slice %43 {offsets = [0, 128], sizes = [1, 128], strides = [1, 1]} : vector<1x512xf32> to vector<1x128xf32>
    %46 = vector.extract_strided_slice %43 {offsets = [0, 384], sizes = [1, 128], strides = [1, 1]} : vector<1x512xf32> to vector<1x128xf32>
    %47 = vector.extract_strided_slice %38 {offsets = [0, 256], sizes = [1, 128], strides = [1, 1]} : vector<1x512xf32> to vector<1x128xf32>
    %48 = math.tanh %47 : vector<1x128xf32>
    %49 = arith.mulf %45, %34 : vector<1x128xf32>
    %50 = arith.mulf %44, %48 : vector<1x128xf32>
    %51 = arith.addf %49, %50 : vector<1x128xf32>
    %52 = math.tanh %51 : vector<1x128xf32>
    %53 = arith.mulf %46, %52 : vector<1x128xf32>
    %cst_16 = arith.constant dense<0.000000e+00> : vector<1x512xf32>
    %54 = tpu.matmul %53, %4, %cst_16 {dimension_numbers = #tpu.dot_dimension_numbers<[1], [0], [0], [1], [0, 0, 1, 1], [], []>} : vector<1x128xf32>, vector<128x512xf32>, vector<1x512xf32> -> vector<1x512xf32>
    %55 = arith.addf %12, %54 : vector<1x512xf32>
    %56 = arith.negf %55 : vector<1x512xf32>
    %57 = math.exp %56 : vector<1x512xf32>
    %cst_17 = arith.constant 1.000000e+00 : f32
    %58 = vector.broadcast %cst_17 : f32 to vector<1x512xf32>
    %59 = arith.addf %58, %57 : vector<1x512xf32>
    %60 = arith.divf %58, %59 : vector<1x512xf32>
    %61 = vector.extract_strided_slice %60 {offsets = [0, 0], sizes = [1, 128], strides = [1, 1]} : vector<1x512xf32> to vector<1x128xf32>
    %62 = vector.extract_strided_slice %60 {offsets = [0, 128], sizes = [1, 128], strides = [1, 1]} : vector<1x512xf32> to vector<1x128xf32>
    %63 = vector.extract_strided_slice %60 {offsets = [0, 384], sizes = [1, 128], strides = [1, 1]} : vector<1x512xf32> to vector<1x128xf32>
    %64 = vector.extract_strided_slice %55 {offsets = [0, 256], sizes = [1, 128], strides = [1, 1]} : vector<1x512xf32> to vector<1x128xf32>
    %65 = math.tanh %64 : vector<1x128xf32>
    %66 = arith.mulf %62, %51 : vector<1x128xf32>
    %67 = arith.mulf %61, %65 : vector<1x128xf32>
    %68 = arith.addf %66, %67 : vector<1x128xf32>
    %69 = math.tanh %68 : vector<1x128xf32>
    %70 = arith.mulf %63, %69 : vector<1x128xf32>
    %cst_18 = arith.constant dense<0.000000e+00> : vector<1x512xf32>
    %71 = tpu.matmul %70, %4, %cst_18 {dimension_numbers = #tpu.dot_dimension_numbers<[1], [0], [0], [1], [0, 0, 1, 1], [], []>} : vector<1x128xf32>, vector<128x512xf32>, vector<1x512xf32> -> vector<1x512xf32>
    %72 = arith.addf %13, %71 : vector<1x512xf32>
    %73 = arith.negf %72 : vector<1x512xf32>
    %74 = math.exp %73 : vector<1x512xf32>
    %cst_19 = arith.constant 1.000000e+00 : f32
    %75 = vector.broadcast %cst_19 : f32 to vector<1x512xf32>
    %76 = arith.addf %75, %74 : vector<1x512xf32>
    %77 = arith.divf %75, %76 : vector<1x512xf32>
    %78 = vector.extract_strided_slice %77 {offsets = [0, 0], sizes = [1, 128], strides = [1, 1]} : vector<1x512xf32> to vector<1x128xf32>
    %79 = vector.extract_strided_slice %77 {offsets = [0, 128], sizes = [1, 128], strides = [1, 1]} : vector<1x512xf32> to vector<1x128xf32>
    %80 = vector.extract_strided_slice %77 {offsets = [0, 384], sizes = [1, 128], strides = [1, 1]} : vector<1x512xf32> to vector<1x128xf32>
    %81 = vector.extract_strided_slice %72 {offsets = [0, 256], sizes = [1, 128], strides = [1, 1]} : vector<1x512xf32> to vector<1x128xf32>
    %82 = math.tanh %81 : vector<1x128xf32>
    %83 = arith.mulf %79, %68 : vector<1x128xf32>
    %84 = arith.mulf %78, %82 : vector<1x128xf32>
    %85 = arith.addf %83, %84 : vector<1x128xf32>
    %86 = math.tanh %85 : vector<1x128xf32>
    %87 = arith.mulf %80, %86 : vector<1x128xf32>
    %cst_20 = arith.constant dense<0.000000e+00> : vector<1x512xf32>
    %88 = tpu.matmul %87, %4, %cst_20 {dimension_numbers = #tpu.dot_dimension_numbers<[1], [0], [0], [1], [0, 0, 1, 1], [], []>} : vector<1x128xf32>, vector<128x512xf32>, vector<1x512xf32> -> vector<1x512xf32>
    %89 = arith.addf %14, %88 : vector<1x512xf32>
    %90 = arith.negf %89 : vector<1x512xf32>
    %91 = math.exp %90 : vector<1x512xf32>
    %cst_21 = arith.constant 1.000000e+00 : f32
    %92 = vector.broadcast %cst_21 : f32 to vector<1x512xf32>
    %93 = arith.addf %92, %91 : vector<1x512xf32>
    %94 = arith.divf %92, %93 : vector<1x512xf32>
    %95 = vector.extract_strided_slice %94 {offsets = [0, 0], sizes = [1, 128], strides = [1, 1]} : vector<1x512xf32> to vector<1x128xf32>
    %96 = vector.extract_strided_slice %94 {offsets = [0, 128], sizes = [1, 128], strides = [1, 1]} : vector<1x512xf32> to vector<1x128xf32>
    %97 = vector.extract_strided_slice %94 {offsets = [0, 384], sizes = [1, 128], strides = [1, 1]} : vector<1x512xf32> to vector<1x128xf32>
    %98 = vector.extract_strided_slice %89 {offsets = [0, 256], sizes = [1, 128], strides = [1, 1]} : vector<1x512xf32> to vector<1x128xf32>
    %99 = math.tanh %98 : vector<1x128xf32>
    %100 = arith.mulf %96, %85 : vector<1x128xf32>
    %101 = arith.mulf %95, %99 : vector<1x128xf32>
    %102 = arith.addf %100, %101 : vector<1x128xf32>
    %103 = math.tanh %102 : vector<1x128xf32>
    %104 = arith.mulf %97, %103 : vector<1x128xf32>
    %cst_22 = arith.constant dense<0.000000e+00> : vector<1x512xf32>
    %105 = tpu.matmul %104, %4, %cst_22 {dimension_numbers = #tpu.dot_dimension_numbers<[1], [0], [0], [1], [0, 0, 1, 1], [], []>} : vector<1x128xf32>, vector<128x512xf32>, vector<1x512xf32> -> vector<1x512xf32>
    %106 = arith.addf %15, %105 : vector<1x512xf32>
    %107 = arith.negf %106 : vector<1x512xf32>
    %108 = math.exp %107 : vector<1x512xf32>
    %cst_23 = arith.constant 1.000000e+00 : f32
    %109 = vector.broadcast %cst_23 : f32 to vector<1x512xf32>
    %110 = arith.addf %109, %108 : vector<1x512xf32>
    %111 = arith.divf %109, %110 : vector<1x512xf32>
    %112 = vector.extract_strided_slice %111 {offsets = [0, 0], sizes = [1, 128], strides = [1, 1]} : vector<1x512xf32> to vector<1x128xf32>
    %113 = vector.extract_strided_slice %111 {offsets = [0, 128], sizes = [1, 128], strides = [1, 1]} : vector<1x512xf32> to vector<1x128xf32>
    %114 = vector.extract_strided_slice %111 {offsets = [0, 384], sizes = [1, 128], strides = [1, 1]} : vector<1x512xf32> to vector<1x128xf32>
    %115 = vector.extract_strided_slice %106 {offsets = [0, 256], sizes = [1, 128], strides = [1, 1]} : vector<1x512xf32> to vector<1x128xf32>
    %116 = math.tanh %115 : vector<1x128xf32>
    %117 = arith.mulf %113, %102 : vector<1x128xf32>
    %118 = arith.mulf %112, %116 : vector<1x128xf32>
    %119 = arith.addf %117, %118 : vector<1x128xf32>
    %120 = math.tanh %119 : vector<1x128xf32>
    %121 = arith.mulf %114, %120 : vector<1x128xf32>
    %cst_24 = arith.constant dense<0.000000e+00> : vector<1x512xf32>
    %122 = tpu.matmul %121, %4, %cst_24 {dimension_numbers = #tpu.dot_dimension_numbers<[1], [0], [0], [1], [0, 0, 1, 1], [], []>} : vector<1x128xf32>, vector<128x512xf32>, vector<1x512xf32> -> vector<1x512xf32>
    %123 = arith.addf %16, %122 : vector<1x512xf32>
    %124 = arith.negf %123 : vector<1x512xf32>
    %125 = math.exp %124 : vector<1x512xf32>
    %cst_25 = arith.constant 1.000000e+00 : f32
    %126 = vector.broadcast %cst_25 : f32 to vector<1x512xf32>
    %127 = arith.addf %126, %125 : vector<1x512xf32>
    %128 = arith.divf %126, %127 : vector<1x512xf32>
    %129 = vector.extract_strided_slice %128 {offsets = [0, 0], sizes = [1, 128], strides = [1, 1]} : vector<1x512xf32> to vector<1x128xf32>
    %130 = vector.extract_strided_slice %128 {offsets = [0, 128], sizes = [1, 128], strides = [1, 1]} : vector<1x512xf32> to vector<1x128xf32>
    %131 = vector.extract_strided_slice %128 {offsets = [0, 384], sizes = [1, 128], strides = [1, 1]} : vector<1x512xf32> to vector<1x128xf32>
    %132 = vector.extract_strided_slice %123 {offsets = [0, 256], sizes = [1, 128], strides = [1, 1]} : vector<1x512xf32> to vector<1x128xf32>
    %133 = math.tanh %132 : vector<1x128xf32>
    %134 = arith.mulf %130, %119 : vector<1x128xf32>
    %135 = arith.mulf %129, %133 : vector<1x128xf32>
    %136 = arith.addf %134, %135 : vector<1x128xf32>
    %137 = math.tanh %136 : vector<1x128xf32>
    %138 = arith.mulf %131, %137 : vector<1x128xf32>
    %cst_26 = arith.constant dense<0.000000e+00> : vector<1x512xf32>
    %139 = tpu.matmul %138, %4, %cst_26 {dimension_numbers = #tpu.dot_dimension_numbers<[1], [0], [0], [1], [0, 0, 1, 1], [], []>} : vector<1x128xf32>, vector<128x512xf32>, vector<1x512xf32> -> vector<1x512xf32>
    %140 = arith.addf %17, %139 : vector<1x512xf32>
    %141 = arith.negf %140 : vector<1x512xf32>
    %142 = math.exp %141 : vector<1x512xf32>
    %cst_27 = arith.constant 1.000000e+00 : f32
    %143 = vector.broadcast %cst_27 : f32 to vector<1x512xf32>
    %144 = arith.addf %143, %142 : vector<1x512xf32>
    %145 = arith.divf %143, %144 : vector<1x512xf32>
    %146 = vector.extract_strided_slice %145 {offsets = [0, 0], sizes = [1, 128], strides = [1, 1]} : vector<1x512xf32> to vector<1x128xf32>
    %147 = vector.extract_strided_slice %145 {offsets = [0, 128], sizes = [1, 128], strides = [1, 1]} : vector<1x512xf32> to vector<1x128xf32>
    %148 = vector.extract_strided_slice %145 {offsets = [0, 384], sizes = [1, 128], strides = [1, 1]} : vector<1x512xf32> to vector<1x128xf32>
    %149 = vector.extract_strided_slice %140 {offsets = [0, 256], sizes = [1, 128], strides = [1, 1]} : vector<1x512xf32> to vector<1x128xf32>
    %150 = math.tanh %149 : vector<1x128xf32>
    %151 = arith.mulf %147, %136 : vector<1x128xf32>
    %152 = arith.mulf %146, %150 : vector<1x128xf32>
    %153 = arith.addf %151, %152 : vector<1x128xf32>
    %154 = math.tanh %153 : vector<1x128xf32>
    %155 = arith.mulf %148, %154 : vector<1x128xf32>
    %156 = tpu.concatenate %36, %53, %70, %87, %104, %121, %138, %155 in 0 : vector<1x128xf32>, vector<1x128xf32>, vector<1x128xf32>, vector<1x128xf32>, vector<1x128xf32>, vector<1x128xf32>, vector<1x128xf32>, vector<1x128xf32> -> vector<8x128xf32>
    %c1 = arith.constant 1 : index
    %c0_28 = arith.constant 0 : index
    %c0_29 = arith.constant 0 : index
    %157 = vector.load %arg1[%c1, %c0_28, %c0_29] : memref<3x128x512xf32, #tpu.memory_space<vmem>>, vector<1x128x512xf32>
    %158 = vector.shape_cast %157 : vector<1x128x512xf32> to vector<128x512xf32>
    %c1_30 = arith.constant 1 : index
    %c0_31 = arith.constant 0 : index
    %c0_32 = arith.constant 0 : index
    %159 = vector.load %arg2[%c1_30, %c0_31, %c0_32] : memref<3x128x512xf32, #tpu.memory_space<vmem>>, vector<1x128x512xf32>
    %160 = vector.shape_cast %159 : vector<1x128x512xf32> to vector<128x512xf32>
    %c1_33 = arith.constant 1 : index
    %c0_34 = arith.constant 0 : index
    %c0_35 = arith.constant 0 : index
    %161 = vector.load %arg3[%c1_33, %c0_34, %c0_35] : memref<3x1x512xf32, #tpu.memory_space<vmem>>, vector<1x1x512xf32>
    %162 = vector.shape_cast %161 : vector<1x1x512xf32> to vector<1x512xf32>
    %cst_36 = arith.constant dense<0.000000e+00> : vector<8x512xf32>
    %163 = tpu.matmul %156, %158, %cst_36 {dimension_numbers = #tpu.dot_dimension_numbers<[1], [0], [0], [1], [0, 0, 1, 1], [], []>} : vector<8x128xf32>, vector<128x512xf32>, vector<8x512xf32> -> vector<8x512xf32>
    %164 = vector.broadcast %162 : vector<1x512xf32> to vector<8x512xf32>
    %165 = arith.addf %163, %164 : vector<8x512xf32>
    %166 = vector.extract_strided_slice %165 {offsets = [0, 0], sizes = [1, 512], strides = [1, 1]} : vector<8x512xf32> to vector<1x512xf32>
    %167 = vector.extract_strided_slice %165 {offsets = [1, 0], sizes = [1, 512], strides = [1, 1]} : vector<8x512xf32> to vector<1x512xf32>
    %168 = vector.extract_strided_slice %165 {offsets = [2, 0], sizes = [1, 512], strides = [1, 1]} : vector<8x512xf32> to vector<1x512xf32>
    %169 = vector.extract_strided_slice %165 {offsets = [3, 0], sizes = [1, 512], strides = [1, 1]} : vector<8x512xf32> to vector<1x512xf32>
    %170 = vector.extract_strided_slice %165 {offsets = [4, 0], sizes = [1, 512], strides = [1, 1]} : vector<8x512xf32> to vector<1x512xf32>
    %171 = vector.extract_strided_slice %165 {offsets = [5, 0], sizes = [1, 512], strides = [1, 1]} : vector<8x512xf32> to vector<1x512xf32>
    %172 = vector.extract_strided_slice %165 {offsets = [6, 0], sizes = [1, 512], strides = [1, 1]} : vector<8x512xf32> to vector<1x512xf32>
    %173 = vector.extract_strided_slice %165 {offsets = [7, 0], sizes = [1, 512], strides = [1, 1]} : vector<8x512xf32> to vector<1x512xf32>
    %cst_37 = arith.constant 0.000000e+00 : f32
    %174 = vector.broadcast %cst_37 : f32 to vector<1x128xf32>
    %cst_38 = arith.constant 0.000000e+00 : f32
    %175 = vector.broadcast %cst_38 : f32 to vector<1x128xf32>
    %cst_39 = arith.constant dense<0.000000e+00> : vector<1x512xf32>
    %176 = tpu.matmul %174, %160, %cst_39 {dimension_numbers = #tpu.dot_dimension_numbers<[1], [0], [0], [1], [0, 0, 1, 1], [], []>} : vector<1x128xf32>, vector<128x512xf32>, vector<1x512xf32> -> vector<1x512xf32>
    %177 = arith.addf %166, %176 : vector<1x512xf32>
    %178 = arith.negf %177 : vector<1x512xf32>
    %179 = math.exp %178 : vector<1x512xf32>
    %cst_40 = arith.constant 1.000000e+00 : f32
    %180 = vector.broadcast %cst_40 : f32 to vector<1x512xf32>
    %181 = arith.addf %180, %179 : vector<1x512xf32>
    %182 = arith.divf %180, %181 : vector<1x512xf32>
    %183 = vector.extract_strided_slice %182 {offsets = [0, 0], sizes = [1, 128], strides = [1, 1]} : vector<1x512xf32> to vector<1x128xf32>
    %184 = vector.extract_strided_slice %182 {offsets = [0, 128], sizes = [1, 128], strides = [1, 1]} : vector<1x512xf32> to vector<1x128xf32>
    %185 = vector.extract_strided_slice %182 {offsets = [0, 384], sizes = [1, 128], strides = [1, 1]} : vector<1x512xf32> to vector<1x128xf32>
    %186 = vector.extract_strided_slice %177 {offsets = [0, 256], sizes = [1, 128], strides = [1, 1]} : vector<1x512xf32> to vector<1x128xf32>
    %187 = math.tanh %186 : vector<1x128xf32>
    %188 = arith.mulf %184, %175 : vector<1x128xf32>
    %189 = arith.mulf %183, %187 : vector<1x128xf32>
    %190 = arith.addf %188, %189 : vector<1x128xf32>
    %191 = math.tanh %190 : vector<1x128xf32>
    %192 = arith.mulf %185, %191 : vector<1x128xf32>
    %cst_41 = arith.constant dense<0.000000e+00> : vector<1x512xf32>
    %193 = tpu.matmul %192, %160, %cst_41 {dimension_numbers = #tpu.dot_dimension_numbers<[1], [0], [0], [1], [0, 0, 1, 1], [], []>} : vector<1x128xf32>, vector<128x512xf32>, vector<1x512xf32> -> vector<1x512xf32>
    %194 = arith.addf %167, %193 : vector<1x512xf32>
    %195 = arith.negf %194 : vector<1x512xf32>
    %196 = math.exp %195 : vector<1x512xf32>
    %cst_42 = arith.constant 1.000000e+00 : f32
    %197 = vector.broadcast %cst_42 : f32 to vector<1x512xf32>
    %198 = arith.addf %197, %196 : vector<1x512xf32>
    %199 = arith.divf %197, %198 : vector<1x512xf32>
    %200 = vector.extract_strided_slice %199 {offsets = [0, 0], sizes = [1, 128], strides = [1, 1]} : vector<1x512xf32> to vector<1x128xf32>
    %201 = vector.extract_strided_slice %199 {offsets = [0, 128], sizes = [1, 128], strides = [1, 1]} : vector<1x512xf32> to vector<1x128xf32>
    %202 = vector.extract_strided_slice %199 {offsets = [0, 384], sizes = [1, 128], strides = [1, 1]} : vector<1x512xf32> to vector<1x128xf32>
    %203 = vector.extract_strided_slice %194 {offsets = [0, 256], sizes = [1, 128], strides = [1, 1]} : vector<1x512xf32> to vector<1x128xf32>
    %204 = math.tanh %203 : vector<1x128xf32>
    %205 = arith.mulf %201, %190 : vector<1x128xf32>
    %206 = arith.mulf %200, %204 : vector<1x128xf32>
    %207 = arith.addf %205, %206 : vector<1x128xf32>
    %208 = math.tanh %207 : vector<1x128xf32>
    %209 = arith.mulf %202, %208 : vector<1x128xf32>
    %cst_43 = arith.constant dense<0.000000e+00> : vector<1x512xf32>
    %210 = tpu.matmul %209, %160, %cst_43 {dimension_numbers = #tpu.dot_dimension_numbers<[1], [0], [0], [1], [0, 0, 1, 1], [], []>} : vector<1x128xf32>, vector<128x512xf32>, vector<1x512xf32> -> vector<1x512xf32>
    %211 = arith.addf %168, %210 : vector<1x512xf32>
    %212 = arith.negf %211 : vector<1x512xf32>
    %213 = math.exp %212 : vector<1x512xf32>
    %cst_44 = arith.constant 1.000000e+00 : f32
    %214 = vector.broadcast %cst_44 : f32 to vector<1x512xf32>
    %215 = arith.addf %214, %213 : vector<1x512xf32>
    %216 = arith.divf %214, %215 : vector<1x512xf32>
    %217 = vector.extract_strided_slice %216 {offsets = [0, 0], sizes = [1, 128], strides = [1, 1]} : vector<1x512xf32> to vector<1x128xf32>
    %218 = vector.extract_strided_slice %216 {offsets = [0, 128], sizes = [1, 128], strides = [1, 1]} : vector<1x512xf32> to vector<1x128xf32>
    %219 = vector.extract_strided_slice %216 {offsets = [0, 384], sizes = [1, 128], strides = [1, 1]} : vector<1x512xf32> to vector<1x128xf32>
    %220 = vector.extract_strided_slice %211 {offsets = [0, 256], sizes = [1, 128], strides = [1, 1]} : vector<1x512xf32> to vector<1x128xf32>
    %221 = math.tanh %220 : vector<1x128xf32>
    %222 = arith.mulf %218, %207 : vector<1x128xf32>
    %223 = arith.mulf %217, %221 : vector<1x128xf32>
    %224 = arith.addf %222, %223 : vector<1x128xf32>
    %225 = math.tanh %224 : vector<1x128xf32>
    %226 = arith.mulf %219, %225 : vector<1x128xf32>
    %cst_45 = arith.constant dense<0.000000e+00> : vector<1x512xf32>
    %227 = tpu.matmul %226, %160, %cst_45 {dimension_numbers = #tpu.dot_dimension_numbers<[1], [0], [0], [1], [0, 0, 1, 1], [], []>} : vector<1x128xf32>, vector<128x512xf32>, vector<1x512xf32> -> vector<1x512xf32>
    %228 = arith.addf %169, %227 : vector<1x512xf32>
    %229 = arith.negf %228 : vector<1x512xf32>
    %230 = math.exp %229 : vector<1x512xf32>
    %cst_46 = arith.constant 1.000000e+00 : f32
    %231 = vector.broadcast %cst_46 : f32 to vector<1x512xf32>
    %232 = arith.addf %231, %230 : vector<1x512xf32>
    %233 = arith.divf %231, %232 : vector<1x512xf32>
    %234 = vector.extract_strided_slice %233 {offsets = [0, 0], sizes = [1, 128], strides = [1, 1]} : vector<1x512xf32> to vector<1x128xf32>
    %235 = vector.extract_strided_slice %233 {offsets = [0, 128], sizes = [1, 128], strides = [1, 1]} : vector<1x512xf32> to vector<1x128xf32>
    %236 = vector.extract_strided_slice %233 {offsets = [0, 384], sizes = [1, 128], strides = [1, 1]} : vector<1x512xf32> to vector<1x128xf32>
    %237 = vector.extract_strided_slice %228 {offsets = [0, 256], sizes = [1, 128], strides = [1, 1]} : vector<1x512xf32> to vector<1x128xf32>
    %238 = math.tanh %237 : vector<1x128xf32>
    %239 = arith.mulf %235, %224 : vector<1x128xf32>
    %240 = arith.mulf %234, %238 : vector<1x128xf32>
    %241 = arith.addf %239, %240 : vector<1x128xf32>
    %242 = math.tanh %241 : vector<1x128xf32>
    %243 = arith.mulf %236, %242 : vector<1x128xf32>
    %cst_47 = arith.constant dense<0.000000e+00> : vector<1x512xf32>
    %244 = tpu.matmul %243, %160, %cst_47 {dimension_numbers = #tpu.dot_dimension_numbers<[1], [0], [0], [1], [0, 0, 1, 1], [], []>} : vector<1x128xf32>, vector<128x512xf32>, vector<1x512xf32> -> vector<1x512xf32>
    %245 = arith.addf %170, %244 : vector<1x512xf32>
    %246 = arith.negf %245 : vector<1x512xf32>
    %247 = math.exp %246 : vector<1x512xf32>
    %cst_48 = arith.constant 1.000000e+00 : f32
    %248 = vector.broadcast %cst_48 : f32 to vector<1x512xf32>
    %249 = arith.addf %248, %247 : vector<1x512xf32>
    %250 = arith.divf %248, %249 : vector<1x512xf32>
    %251 = vector.extract_strided_slice %250 {offsets = [0, 0], sizes = [1, 128], strides = [1, 1]} : vector<1x512xf32> to vector<1x128xf32>
    %252 = vector.extract_strided_slice %250 {offsets = [0, 128], sizes = [1, 128], strides = [1, 1]} : vector<1x512xf32> to vector<1x128xf32>
    %253 = vector.extract_strided_slice %250 {offsets = [0, 384], sizes = [1, 128], strides = [1, 1]} : vector<1x512xf32> to vector<1x128xf32>
    %254 = vector.extract_strided_slice %245 {offsets = [0, 256], sizes = [1, 128], strides = [1, 1]} : vector<1x512xf32> to vector<1x128xf32>
    %255 = math.tanh %254 : vector<1x128xf32>
    %256 = arith.mulf %252, %241 : vector<1x128xf32>
    %257 = arith.mulf %251, %255 : vector<1x128xf32>
    %258 = arith.addf %256, %257 : vector<1x128xf32>
    %259 = math.tanh %258 : vector<1x128xf32>
    %260 = arith.mulf %253, %259 : vector<1x128xf32>
    %cst_49 = arith.constant dense<0.000000e+00> : vector<1x512xf32>
    %261 = tpu.matmul %260, %160, %cst_49 {dimension_numbers = #tpu.dot_dimension_numbers<[1], [0], [0], [1], [0, 0, 1, 1], [], []>} : vector<1x128xf32>, vector<128x512xf32>, vector<1x512xf32> -> vector<1x512xf32>
    %262 = arith.addf %171, %261 : vector<1x512xf32>
    %263 = arith.negf %262 : vector<1x512xf32>
    %264 = math.exp %263 : vector<1x512xf32>
    %cst_50 = arith.constant 1.000000e+00 : f32
    %265 = vector.broadcast %cst_50 : f32 to vector<1x512xf32>
    %266 = arith.addf %265, %264 : vector<1x512xf32>
    %267 = arith.divf %265, %266 : vector<1x512xf32>
    %268 = vector.extract_strided_slice %267 {offsets = [0, 0], sizes = [1, 128], strides = [1, 1]} : vector<1x512xf32> to vector<1x128xf32>
    %269 = vector.extract_strided_slice %267 {offsets = [0, 128], sizes = [1, 128], strides = [1, 1]} : vector<1x512xf32> to vector<1x128xf32>
    %270 = vector.extract_strided_slice %267 {offsets = [0, 384], sizes = [1, 128], strides = [1, 1]} : vector<1x512xf32> to vector<1x128xf32>
    %271 = vector.extract_strided_slice %262 {offsets = [0, 256], sizes = [1, 128], strides = [1, 1]} : vector<1x512xf32> to vector<1x128xf32>
    %272 = math.tanh %271 : vector<1x128xf32>
    %273 = arith.mulf %269, %258 : vector<1x128xf32>
    %274 = arith.mulf %268, %272 : vector<1x128xf32>
    %275 = arith.addf %273, %274 : vector<1x128xf32>
    %276 = math.tanh %275 : vector<1x128xf32>
    %277 = arith.mulf %270, %276 : vector<1x128xf32>
    %cst_51 = arith.constant dense<0.000000e+00> : vector<1x512xf32>
    %278 = tpu.matmul %277, %160, %cst_51 {dimension_numbers = #tpu.dot_dimension_numbers<[1], [0], [0], [1], [0, 0, 1, 1], [], []>} : vector<1x128xf32>, vector<128x512xf32>, vector<1x512xf32> -> vector<1x512xf32>
    %279 = arith.addf %172, %278 : vector<1x512xf32>
    %280 = arith.negf %279 : vector<1x512xf32>
    %281 = math.exp %280 : vector<1x512xf32>
    %cst_52 = arith.constant 1.000000e+00 : f32
    %282 = vector.broadcast %cst_52 : f32 to vector<1x512xf32>
    %283 = arith.addf %282, %281 : vector<1x512xf32>
    %284 = arith.divf %282, %283 : vector<1x512xf32>
    %285 = vector.extract_strided_slice %284 {offsets = [0, 0], sizes = [1, 128], strides = [1, 1]} : vector<1x512xf32> to vector<1x128xf32>
    %286 = vector.extract_strided_slice %284 {offsets = [0, 128], sizes = [1, 128], strides = [1, 1]} : vector<1x512xf32> to vector<1x128xf32>
    %287 = vector.extract_strided_slice %284 {offsets = [0, 384], sizes = [1, 128], strides = [1, 1]} : vector<1x512xf32> to vector<1x128xf32>
    %288 = vector.extract_strided_slice %279 {offsets = [0, 256], sizes = [1, 128], strides = [1, 1]} : vector<1x512xf32> to vector<1x128xf32>
    %289 = math.tanh %288 : vector<1x128xf32>
    %290 = arith.mulf %286, %275 : vector<1x128xf32>
    %291 = arith.mulf %285, %289 : vector<1x128xf32>
    %292 = arith.addf %290, %291 : vector<1x128xf32>
    %293 = math.tanh %292 : vector<1x128xf32>
    %294 = arith.mulf %287, %293 : vector<1x128xf32>
    %cst_53 = arith.constant dense<0.000000e+00> : vector<1x512xf32>
    %295 = tpu.matmul %294, %160, %cst_53 {dimension_numbers = #tpu.dot_dimension_numbers<[1], [0], [0], [1], [0, 0, 1, 1], [], []>} : vector<1x128xf32>, vector<128x512xf32>, vector<1x512xf32> -> vector<1x512xf32>
    %296 = arith.addf %173, %295 : vector<1x512xf32>
    %297 = arith.negf %296 : vector<1x512xf32>
    %298 = math.exp %297 : vector<1x512xf32>
    %cst_54 = arith.constant 1.000000e+00 : f32
    %299 = vector.broadcast %cst_54 : f32 to vector<1x512xf32>
    %300 = arith.addf %299, %298 : vector<1x512xf32>
    %301 = arith.divf %299, %300 : vector<1x512xf32>
    %302 = vector.extract_strided_slice %301 {offsets = [0, 0], sizes = [1, 128], strides = [1, 1]} : vector<1x512xf32> to vector<1x128xf32>
    %303 = vector.extract_strided_slice %301 {offsets = [0, 128], sizes = [1, 128], strides = [1, 1]} : vector<1x512xf32> to vector<1x128xf32>
    %304 = vector.extract_strided_slice %301 {offsets = [0, 384], sizes = [1, 128], strides = [1, 1]} : vector<1x512xf32> to vector<1x128xf32>
    %305 = vector.extract_strided_slice %296 {offsets = [0, 256], sizes = [1, 128], strides = [1, 1]} : vector<1x512xf32> to vector<1x128xf32>
    %306 = math.tanh %305 : vector<1x128xf32>
    %307 = arith.mulf %303, %292 : vector<1x128xf32>
    %308 = arith.mulf %302, %306 : vector<1x128xf32>
    %309 = arith.addf %307, %308 : vector<1x128xf32>
    %310 = math.tanh %309 : vector<1x128xf32>
    %311 = arith.mulf %304, %310 : vector<1x128xf32>
    %312 = tpu.concatenate %192, %209, %226, %243, %260, %277, %294, %311 in 0 : vector<1x128xf32>, vector<1x128xf32>, vector<1x128xf32>, vector<1x128xf32>, vector<1x128xf32>, vector<1x128xf32>, vector<1x128xf32>, vector<1x128xf32> -> vector<8x128xf32>
    %c2 = arith.constant 2 : index
    %c0_55 = arith.constant 0 : index
    %c0_56 = arith.constant 0 : index
    %313 = vector.load %arg1[%c2, %c0_55, %c0_56] : memref<3x128x512xf32, #tpu.memory_space<vmem>>, vector<1x128x512xf32>
    %314 = vector.shape_cast %313 : vector<1x128x512xf32> to vector<128x512xf32>
    %c2_57 = arith.constant 2 : index
    %c0_58 = arith.constant 0 : index
    %c0_59 = arith.constant 0 : index
    %315 = vector.load %arg2[%c2_57, %c0_58, %c0_59] : memref<3x128x512xf32, #tpu.memory_space<vmem>>, vector<1x128x512xf32>
    %316 = vector.shape_cast %315 : vector<1x128x512xf32> to vector<128x512xf32>
    %c2_60 = arith.constant 2 : index
    %c0_61 = arith.constant 0 : index
    %c0_62 = arith.constant 0 : index
    %317 = vector.load %arg3[%c2_60, %c0_61, %c0_62] : memref<3x1x512xf32, #tpu.memory_space<vmem>>, vector<1x1x512xf32>
    %318 = vector.shape_cast %317 : vector<1x1x512xf32> to vector<1x512xf32>
    %cst_63 = arith.constant dense<0.000000e+00> : vector<8x512xf32>
    %319 = tpu.matmul %312, %314, %cst_63 {dimension_numbers = #tpu.dot_dimension_numbers<[1], [0], [0], [1], [0, 0, 1, 1], [], []>} : vector<8x128xf32>, vector<128x512xf32>, vector<8x512xf32> -> vector<8x512xf32>
    %320 = vector.broadcast %318 : vector<1x512xf32> to vector<8x512xf32>
    %321 = arith.addf %319, %320 : vector<8x512xf32>
    %322 = vector.extract_strided_slice %321 {offsets = [0, 0], sizes = [1, 512], strides = [1, 1]} : vector<8x512xf32> to vector<1x512xf32>
    %323 = vector.extract_strided_slice %321 {offsets = [1, 0], sizes = [1, 512], strides = [1, 1]} : vector<8x512xf32> to vector<1x512xf32>
    %324 = vector.extract_strided_slice %321 {offsets = [2, 0], sizes = [1, 512], strides = [1, 1]} : vector<8x512xf32> to vector<1x512xf32>
    %325 = vector.extract_strided_slice %321 {offsets = [3, 0], sizes = [1, 512], strides = [1, 1]} : vector<8x512xf32> to vector<1x512xf32>
    %326 = vector.extract_strided_slice %321 {offsets = [4, 0], sizes = [1, 512], strides = [1, 1]} : vector<8x512xf32> to vector<1x512xf32>
    %327 = vector.extract_strided_slice %321 {offsets = [5, 0], sizes = [1, 512], strides = [1, 1]} : vector<8x512xf32> to vector<1x512xf32>
    %328 = vector.extract_strided_slice %321 {offsets = [6, 0], sizes = [1, 512], strides = [1, 1]} : vector<8x512xf32> to vector<1x512xf32>
    %329 = vector.extract_strided_slice %321 {offsets = [7, 0], sizes = [1, 512], strides = [1, 1]} : vector<8x512xf32> to vector<1x512xf32>
    %cst_64 = arith.constant 0.000000e+00 : f32
    %330 = vector.broadcast %cst_64 : f32 to vector<1x128xf32>
    %cst_65 = arith.constant 0.000000e+00 : f32
    %331 = vector.broadcast %cst_65 : f32 to vector<1x128xf32>
    %cst_66 = arith.constant dense<0.000000e+00> : vector<1x512xf32>
    %332 = tpu.matmul %330, %316, %cst_66 {dimension_numbers = #tpu.dot_dimension_numbers<[1], [0], [0], [1], [0, 0, 1, 1], [], []>} : vector<1x128xf32>, vector<128x512xf32>, vector<1x512xf32> -> vector<1x512xf32>
    %333 = arith.addf %322, %332 : vector<1x512xf32>
    %334 = arith.negf %333 : vector<1x512xf32>
    %335 = math.exp %334 : vector<1x512xf32>
    %cst_67 = arith.constant 1.000000e+00 : f32
    %336 = vector.broadcast %cst_67 : f32 to vector<1x512xf32>
    %337 = arith.addf %336, %335 : vector<1x512xf32>
    %338 = arith.divf %336, %337 : vector<1x512xf32>
    %339 = vector.extract_strided_slice %338 {offsets = [0, 0], sizes = [1, 128], strides = [1, 1]} : vector<1x512xf32> to vector<1x128xf32>
    %340 = vector.extract_strided_slice %338 {offsets = [0, 128], sizes = [1, 128], strides = [1, 1]} : vector<1x512xf32> to vector<1x128xf32>
    %341 = vector.extract_strided_slice %338 {offsets = [0, 384], sizes = [1, 128], strides = [1, 1]} : vector<1x512xf32> to vector<1x128xf32>
    %342 = vector.extract_strided_slice %333 {offsets = [0, 256], sizes = [1, 128], strides = [1, 1]} : vector<1x512xf32> to vector<1x128xf32>
    %343 = math.tanh %342 : vector<1x128xf32>
    %344 = arith.mulf %340, %331 : vector<1x128xf32>
    %345 = arith.mulf %339, %343 : vector<1x128xf32>
    %346 = arith.addf %344, %345 : vector<1x128xf32>
    %347 = math.tanh %346 : vector<1x128xf32>
    %348 = arith.mulf %341, %347 : vector<1x128xf32>
    %cst_68 = arith.constant dense<0.000000e+00> : vector<1x512xf32>
    %349 = tpu.matmul %348, %316, %cst_68 {dimension_numbers = #tpu.dot_dimension_numbers<[1], [0], [0], [1], [0, 0, 1, 1], [], []>} : vector<1x128xf32>, vector<128x512xf32>, vector<1x512xf32> -> vector<1x512xf32>
    %350 = arith.addf %323, %349 : vector<1x512xf32>
    %351 = arith.negf %350 : vector<1x512xf32>
    %352 = math.exp %351 : vector<1x512xf32>
    %cst_69 = arith.constant 1.000000e+00 : f32
    %353 = vector.broadcast %cst_69 : f32 to vector<1x512xf32>
    %354 = arith.addf %353, %352 : vector<1x512xf32>
    %355 = arith.divf %353, %354 : vector<1x512xf32>
    %356 = vector.extract_strided_slice %355 {offsets = [0, 0], sizes = [1, 128], strides = [1, 1]} : vector<1x512xf32> to vector<1x128xf32>
    %357 = vector.extract_strided_slice %355 {offsets = [0, 128], sizes = [1, 128], strides = [1, 1]} : vector<1x512xf32> to vector<1x128xf32>
    %358 = vector.extract_strided_slice %355 {offsets = [0, 384], sizes = [1, 128], strides = [1, 1]} : vector<1x512xf32> to vector<1x128xf32>
    %359 = vector.extract_strided_slice %350 {offsets = [0, 256], sizes = [1, 128], strides = [1, 1]} : vector<1x512xf32> to vector<1x128xf32>
    %360 = math.tanh %359 : vector<1x128xf32>
    %361 = arith.mulf %357, %346 : vector<1x128xf32>
    %362 = arith.mulf %356, %360 : vector<1x128xf32>
    %363 = arith.addf %361, %362 : vector<1x128xf32>
    %364 = math.tanh %363 : vector<1x128xf32>
    %365 = arith.mulf %358, %364 : vector<1x128xf32>
    %cst_70 = arith.constant dense<0.000000e+00> : vector<1x512xf32>
    %366 = tpu.matmul %365, %316, %cst_70 {dimension_numbers = #tpu.dot_dimension_numbers<[1], [0], [0], [1], [0, 0, 1, 1], [], []>} : vector<1x128xf32>, vector<128x512xf32>, vector<1x512xf32> -> vector<1x512xf32>
    %367 = arith.addf %324, %366 : vector<1x512xf32>
    %368 = arith.negf %367 : vector<1x512xf32>
    %369 = math.exp %368 : vector<1x512xf32>
    %cst_71 = arith.constant 1.000000e+00 : f32
    %370 = vector.broadcast %cst_71 : f32 to vector<1x512xf32>
    %371 = arith.addf %370, %369 : vector<1x512xf32>
    %372 = arith.divf %370, %371 : vector<1x512xf32>
    %373 = vector.extract_strided_slice %372 {offsets = [0, 0], sizes = [1, 128], strides = [1, 1]} : vector<1x512xf32> to vector<1x128xf32>
    %374 = vector.extract_strided_slice %372 {offsets = [0, 128], sizes = [1, 128], strides = [1, 1]} : vector<1x512xf32> to vector<1x128xf32>
    %375 = vector.extract_strided_slice %372 {offsets = [0, 384], sizes = [1, 128], strides = [1, 1]} : vector<1x512xf32> to vector<1x128xf32>
    %376 = vector.extract_strided_slice %367 {offsets = [0, 256], sizes = [1, 128], strides = [1, 1]} : vector<1x512xf32> to vector<1x128xf32>
    %377 = math.tanh %376 : vector<1x128xf32>
    %378 = arith.mulf %374, %363 : vector<1x128xf32>
    %379 = arith.mulf %373, %377 : vector<1x128xf32>
    %380 = arith.addf %378, %379 : vector<1x128xf32>
    %381 = math.tanh %380 : vector<1x128xf32>
    %382 = arith.mulf %375, %381 : vector<1x128xf32>
    %cst_72 = arith.constant dense<0.000000e+00> : vector<1x512xf32>
    %383 = tpu.matmul %382, %316, %cst_72 {dimension_numbers = #tpu.dot_dimension_numbers<[1], [0], [0], [1], [0, 0, 1, 1], [], []>} : vector<1x128xf32>, vector<128x512xf32>, vector<1x512xf32> -> vector<1x512xf32>
    %384 = arith.addf %325, %383 : vector<1x512xf32>
    %385 = arith.negf %384 : vector<1x512xf32>
    %386 = math.exp %385 : vector<1x512xf32>
    %cst_73 = arith.constant 1.000000e+00 : f32
    %387 = vector.broadcast %cst_73 : f32 to vector<1x512xf32>
    %388 = arith.addf %387, %386 : vector<1x512xf32>
    %389 = arith.divf %387, %388 : vector<1x512xf32>
    %390 = vector.extract_strided_slice %389 {offsets = [0, 0], sizes = [1, 128], strides = [1, 1]} : vector<1x512xf32> to vector<1x128xf32>
    %391 = vector.extract_strided_slice %389 {offsets = [0, 128], sizes = [1, 128], strides = [1, 1]} : vector<1x512xf32> to vector<1x128xf32>
    %392 = vector.extract_strided_slice %389 {offsets = [0, 384], sizes = [1, 128], strides = [1, 1]} : vector<1x512xf32> to vector<1x128xf32>
    %393 = vector.extract_strided_slice %384 {offsets = [0, 256], sizes = [1, 128], strides = [1, 1]} : vector<1x512xf32> to vector<1x128xf32>
    %394 = math.tanh %393 : vector<1x128xf32>
    %395 = arith.mulf %391, %380 : vector<1x128xf32>
    %396 = arith.mulf %390, %394 : vector<1x128xf32>
    %397 = arith.addf %395, %396 : vector<1x128xf32>
    %398 = math.tanh %397 : vector<1x128xf32>
    %399 = arith.mulf %392, %398 : vector<1x128xf32>
    %cst_74 = arith.constant dense<0.000000e+00> : vector<1x512xf32>
    %400 = tpu.matmul %399, %316, %cst_74 {dimension_numbers = #tpu.dot_dimension_numbers<[1], [0], [0], [1], [0, 0, 1, 1], [], []>} : vector<1x128xf32>, vector<128x512xf32>, vector<1x512xf32> -> vector<1x512xf32>
    %401 = arith.addf %326, %400 : vector<1x512xf32>
    %402 = arith.negf %401 : vector<1x512xf32>
    %403 = math.exp %402 : vector<1x512xf32>
    %cst_75 = arith.constant 1.000000e+00 : f32
    %404 = vector.broadcast %cst_75 : f32 to vector<1x512xf32>
    %405 = arith.addf %404, %403 : vector<1x512xf32>
    %406 = arith.divf %404, %405 : vector<1x512xf32>
    %407 = vector.extract_strided_slice %406 {offsets = [0, 0], sizes = [1, 128], strides = [1, 1]} : vector<1x512xf32> to vector<1x128xf32>
    %408 = vector.extract_strided_slice %406 {offsets = [0, 128], sizes = [1, 128], strides = [1, 1]} : vector<1x512xf32> to vector<1x128xf32>
    %409 = vector.extract_strided_slice %406 {offsets = [0, 384], sizes = [1, 128], strides = [1, 1]} : vector<1x512xf32> to vector<1x128xf32>
    %410 = vector.extract_strided_slice %401 {offsets = [0, 256], sizes = [1, 128], strides = [1, 1]} : vector<1x512xf32> to vector<1x128xf32>
    %411 = math.tanh %410 : vector<1x128xf32>
    %412 = arith.mulf %408, %397 : vector<1x128xf32>
    %413 = arith.mulf %407, %411 : vector<1x128xf32>
    %414 = arith.addf %412, %413 : vector<1x128xf32>
    %415 = math.tanh %414 : vector<1x128xf32>
    %416 = arith.mulf %409, %415 : vector<1x128xf32>
    %cst_76 = arith.constant dense<0.000000e+00> : vector<1x512xf32>
    %417 = tpu.matmul %416, %316, %cst_76 {dimension_numbers = #tpu.dot_dimension_numbers<[1], [0], [0], [1], [0, 0, 1, 1], [], []>} : vector<1x128xf32>, vector<128x512xf32>, vector<1x512xf32> -> vector<1x512xf32>
    %418 = arith.addf %327, %417 : vector<1x512xf32>
    %419 = arith.negf %418 : vector<1x512xf32>
    %420 = math.exp %419 : vector<1x512xf32>
    %cst_77 = arith.constant 1.000000e+00 : f32
    %421 = vector.broadcast %cst_77 : f32 to vector<1x512xf32>
    %422 = arith.addf %421, %420 : vector<1x512xf32>
    %423 = arith.divf %421, %422 : vector<1x512xf32>
    %424 = vector.extract_strided_slice %423 {offsets = [0, 0], sizes = [1, 128], strides = [1, 1]} : vector<1x512xf32> to vector<1x128xf32>
    %425 = vector.extract_strided_slice %423 {offsets = [0, 128], sizes = [1, 128], strides = [1, 1]} : vector<1x512xf32> to vector<1x128xf32>
    %426 = vector.extract_strided_slice %423 {offsets = [0, 384], sizes = [1, 128], strides = [1, 1]} : vector<1x512xf32> to vector<1x128xf32>
    %427 = vector.extract_strided_slice %418 {offsets = [0, 256], sizes = [1, 128], strides = [1, 1]} : vector<1x512xf32> to vector<1x128xf32>
    %428 = math.tanh %427 : vector<1x128xf32>
    %429 = arith.mulf %425, %414 : vector<1x128xf32>
    %430 = arith.mulf %424, %428 : vector<1x128xf32>
    %431 = arith.addf %429, %430 : vector<1x128xf32>
    %432 = math.tanh %431 : vector<1x128xf32>
    %433 = arith.mulf %426, %432 : vector<1x128xf32>
    %cst_78 = arith.constant dense<0.000000e+00> : vector<1x512xf32>
    %434 = tpu.matmul %433, %316, %cst_78 {dimension_numbers = #tpu.dot_dimension_numbers<[1], [0], [0], [1], [0, 0, 1, 1], [], []>} : vector<1x128xf32>, vector<128x512xf32>, vector<1x512xf32> -> vector<1x512xf32>
    %435 = arith.addf %328, %434 : vector<1x512xf32>
    %436 = arith.negf %435 : vector<1x512xf32>
    %437 = math.exp %436 : vector<1x512xf32>
    %cst_79 = arith.constant 1.000000e+00 : f32
    %438 = vector.broadcast %cst_79 : f32 to vector<1x512xf32>
    %439 = arith.addf %438, %437 : vector<1x512xf32>
    %440 = arith.divf %438, %439 : vector<1x512xf32>
    %441 = vector.extract_strided_slice %440 {offsets = [0, 0], sizes = [1, 128], strides = [1, 1]} : vector<1x512xf32> to vector<1x128xf32>
    %442 = vector.extract_strided_slice %440 {offsets = [0, 128], sizes = [1, 128], strides = [1, 1]} : vector<1x512xf32> to vector<1x128xf32>
    %443 = vector.extract_strided_slice %440 {offsets = [0, 384], sizes = [1, 128], strides = [1, 1]} : vector<1x512xf32> to vector<1x128xf32>
    %444 = vector.extract_strided_slice %435 {offsets = [0, 256], sizes = [1, 128], strides = [1, 1]} : vector<1x512xf32> to vector<1x128xf32>
    %445 = math.tanh %444 : vector<1x128xf32>
    %446 = arith.mulf %442, %431 : vector<1x128xf32>
    %447 = arith.mulf %441, %445 : vector<1x128xf32>
    %448 = arith.addf %446, %447 : vector<1x128xf32>
    %449 = math.tanh %448 : vector<1x128xf32>
    %450 = arith.mulf %443, %449 : vector<1x128xf32>
    %cst_80 = arith.constant dense<0.000000e+00> : vector<1x512xf32>
    %451 = tpu.matmul %450, %316, %cst_80 {dimension_numbers = #tpu.dot_dimension_numbers<[1], [0], [0], [1], [0, 0, 1, 1], [], []>} : vector<1x128xf32>, vector<128x512xf32>, vector<1x512xf32> -> vector<1x512xf32>
    %452 = arith.addf %329, %451 : vector<1x512xf32>
    %453 = arith.negf %452 : vector<1x512xf32>
    %454 = math.exp %453 : vector<1x512xf32>
    %cst_81 = arith.constant 1.000000e+00 : f32
    %455 = vector.broadcast %cst_81 : f32 to vector<1x512xf32>
    %456 = arith.addf %455, %454 : vector<1x512xf32>
    %457 = arith.divf %455, %456 : vector<1x512xf32>
    %458 = vector.extract_strided_slice %457 {offsets = [0, 0], sizes = [1, 128], strides = [1, 1]} : vector<1x512xf32> to vector<1x128xf32>
    %459 = vector.extract_strided_slice %457 {offsets = [0, 128], sizes = [1, 128], strides = [1, 1]} : vector<1x512xf32> to vector<1x128xf32>
    %460 = vector.extract_strided_slice %457 {offsets = [0, 384], sizes = [1, 128], strides = [1, 1]} : vector<1x512xf32> to vector<1x128xf32>
    %461 = vector.extract_strided_slice %452 {offsets = [0, 256], sizes = [1, 128], strides = [1, 1]} : vector<1x512xf32> to vector<1x128xf32>
    %462 = math.tanh %461 : vector<1x128xf32>
    %463 = arith.mulf %459, %448 : vector<1x128xf32>
    %464 = arith.mulf %458, %462 : vector<1x128xf32>
    %465 = arith.addf %463, %464 : vector<1x128xf32>
    %466 = math.tanh %465 : vector<1x128xf32>
    %467 = arith.mulf %460, %466 : vector<1x128xf32>
    %468 = tpu.concatenate %348, %365, %382, %399, %416, %433, %450, %467 in 0 : vector<1x128xf32>, vector<1x128xf32>, vector<1x128xf32>, vector<1x128xf32>, vector<1x128xf32>, vector<1x128xf32>, vector<1x128xf32>, vector<1x128xf32> -> vector<8x128xf32>
    %cst_82 = arith.constant 0.000000e+00 : f32
    %469 = vector.broadcast %cst_82 : f32 to vector<2x128xf32>
    %470 = tpu.concatenate %468, %155, %311, %467, %153, %309, %465, %469 in 0 : vector<8x128xf32>, vector<1x128xf32>, vector<1x128xf32>, vector<1x128xf32>, vector<1x128xf32>, vector<1x128xf32>, vector<1x128xf32>, vector<2x128xf32> -> vector<16x128xf32>
    %c0_83 = arith.constant 0 : index
    %c0_84 = arith.constant 0 : index
    %471 = vector.load %arg4[%c0_83, %c0_84] : memref<16x128xf32, #tpu.memory_space<vmem>>, vector<16x128xf32>
    tpu.vector_store %arg4[%c0_83, %c0_84], %470 {strides = array<i32>} : memref<16x128xf32, #tpu.memory_space<vmem>>, vector<16x128xf32>,
    return
  }
}

</mosaic_0001>

<bundles_post_ra>
// kernel: encoder_forward.1
= control target key start
LH: loop header
LB: loop body
LE: loop exit
PB: predicated region body
PF: predicated region fallthrough
CT: control target
= control target key end

     0   :  { %9 = vsyncpa [#allocation3], 0  ;;  %s9099_s0 = inlined_call_operand.vmem [shape: f32[8,128], index: 0, kind: input, shape index: {}]   ;;  %s9100_s1 = inlined_call_operand.hbm [shape: f32[3,128,512], index: 1, kind: input, shape index: {}]   ;;  %s9101_s2 = inlined_call_operand.hbm [shape: f32[3,128,512], index: 2, kind: input, shape index: {}]   ;;  %s9102_s3 = inlined_call_operand.vmem [shape: f32[3,1,512], index: 3, kind: input, shape index: {}]   ;;  %s9103_s4 = inlined_call_operand.vmem [shape: f32[16,128], index: 4, kind: output, shape index: {}]  }
   0x1   :  { %10 = vsyncpa [#allocation5], 0  ;;  %s7676_s15 = smov [#allocation2]   ;;  %s7628_s19 = scalar_lea.hbm %s9100_s1, 24576 }
   0x2   :  { %s18_s16 = sshll.u32 %s7676_s15, 4  ;;  %p7629_p0 = scmp.ne.s32.totalorder %s9100_s1, %s7628_s19  ;;  %s19_s16 = int_to_ptr.vmem [resolvable:$true] %s18_s16 }
   0x3   :  { %p7632_p1 = scmp.lt.u32.totalorder %s7628_s19, %s9100_s1 }
   0x5   :  { %p7634_p2 = pnand %p7632_p1, %p7629_p0 }
   0x7   :  { %7637 = shalt.err (!%p7634_p2)
}
   0x8   :  { %s7638_s24 = scalar_lea.vmem %s19_s16, 24576  ;;  %p7643_p4 = scmp.lt.s32.totalorder %s19_s16, %s19_s16 }
   0x9   :  { %p7639_p3 = scmp.ne.s32.totalorder %s19_s16, %s7638_s24  ;;  %p7644_p5 = scmp.lt.s32.totalorder %s7638_s24, %s7638_s24 }
   0xb   :  { %p7645_p6 = por %p7644_p5, %p7643_p4 }
   0xd   :  { %p7646_p7 = pnand %p7645_p6, %p7639_p3 }
   0xf   :  { %7649 = shalt.err (!%p7646_p7)
}
  0x10   :  { %s7677_s25 = smov 512   ;;  %s7678_s26 = smov 32  }
  0x11   :  { %24 = dma.hbm_to_vmem [thread:$0]  %s9100_s1, 24576, %s19_s16, [#allocation3], %s7677_s25, %s7677_s25, %s7678_s26  }
  0x12   :  { %s7679_s29 = smov [#allocation4]   ;;  %s7650_s7 = scalar_lea.hbm %s9101_s2, 24576 }
  0x13   :  { %s30_s30 = sshll.u32 %s7679_s29, 4  ;;  %p7651_p8 = scmp.ne.s32.totalorder %s9101_s2, %s7650_s7  ;;  %s31_s30 = int_to_ptr.vmem [resolvable:$true] %s30_s30 }
  0x14   :  { %p7654_p9 = scmp.lt.u32.totalorder %s7650_s7, %s9101_s2 }
  0x16   :  { %p7656_p10 = pnand %p7654_p9, %p7651_p8 }
  0x18   :  { %7659 = shalt.err (!%p7656_p10)
}
  0x19   :  { %s7660_s12 = scalar_lea.vmem %s31_s30, 24576  ;;  %p7665_p12 = scmp.lt.s32.totalorder %s31_s30, %s31_s30 }
  0x1a   :  { %p7661_p11 = scmp.ne.s32.totalorder %s31_s30, %s7660_s12  ;;  %p7666_p13 = scmp.lt.s32.totalorder %s7660_s12, %s7660_s12 }
  0x1c   :  { %p7667_p0 = por %p7666_p13, %p7665_p12 }
  0x1e   :  { %p7668_p1 = pnand %p7667_p0, %p7661_p11 }
  0x20   :  { %7671 = shalt.err (!%p7668_p1)
}
  0x21   :  { %36 = dma.hbm_to_vmem [thread:$0]  %s9101_s2, 24576, %s31_s30, [#allocation5], %s7677_s25, %s7677_s25, %s7678_s26  }
  0x22   :  { %7672 = dma.done.wait [#allocation3], 24576  }
  0x23   :  { %7673 = vsyncadd [#allocation3], 4294942720 }
  0x24   :  { %7674 = dma.done.wait [#allocation5], 24576  }
  0x25   :  { %7675 = vsyncadd [#allocation5], 4294942720  ;;  %v7680_v0 = vmov 0.0   ;;  %v47_v1 = vld [vmem:[#allocation2 + $0x8] sm:$0xff]  ;;  %v49_v3 = vld [vmem:[#allocation2 + $0x18] sm:$0xff]  ;;  %vm1821_vm0 = vcmask 1040384  }
  0x26   :  { %260 = vmatprep.mubr.f32.mxu0 %v7680_v0  ;;  %331 = vmatprep.mubr.f32.mxu1 %v7680_v0  ;;  %v51_v2 = vld [vmem:[#allocation2 + $0x28] sm:$0xff]  ;;  %v53_v5 = vld [vmem:[#allocation2 + $0x38] sm:$0xff]  ;;  %v46_v6 = vld [vmem:[#allocation2] sm:$0xff]  ;;  %vm1823_vm1 = vcmask 1041408   ;;  %vm1825_vm2 = vcmask 1042432   ;;  %vm1827_vm3 = vcmask 1043456  }
  0x27   :  { %v5511_v4 = vpack.c.bf16 %v51_v2, %v47_v1  ;;  %v50_v7 = vld [vmem:[#allocation2 + $0x20] sm:$0xff]  ;;  %v5543_v8 = vpack.c.bf16 %v53_v5, %v49_v3  ;;  %v48_v10 = vld [vmem:[#allocation2 + $0x10] sm:$0xff]  ;;  %v55_v12 = vld [vmem:[#allocation2 + $0x48] sm:$0xff]  ;;  %vm1829_vm4 = vcmask 1044480   ;;  %vm1831_vm5 = vcmask 1045504  }
  0x28   :  { %v5513_v9 = vpack.c.bf16 %v50_v7, %v46_v6  ;;  %v52_v11 = vld [vmem:[#allocation2 + $0x30] sm:$0xff]  ;;  %v59_v14 = vld [vmem:[#allocation2 + $0x68] sm:$0xff]  ;;  %v57_v15 = vld [vmem:[#allocation2 + $0x58] sm:$0xff]  ;;  %vm1833_vm6 = vcmask 1046528  }
  0x29   :  { %5512 = vmatprep.subr.bf16.mxu0 %v5511_v4  ;;  %v5545_v13 = vpack.c.bf16 %v52_v11, %v48_v10  ;;  %v61_v16 = vld [vmem:[#allocation2 + $0x78] sm:$0xff]  ;;  %5544 = vmatprep.subr.bf16.mxu1 %v5543_v8  ;;  %v5515_v17 = vpack.c.bf16 %v59_v14, %v55_v12  ;;  %v54_v19 = vld [vmem:[#allocation2 + $0x40] sm:$0xff]  ;;  %v56_v21 = vld [vmem:[#allocation2 + $0x50] sm:$0xff] }
  0x2a   :  { %5514 = vmatpush1.bf16.msra.mxu0 %v5513_v9  ;;  %v5547_v18 = vpack.c.bf16 %v61_v16, %v57_v15  ;;  %v58_v20 = vld [vmem:[#allocation2 + $0x60] sm:$0xff]  ;;  %v60_v23 = vld [vmem:[#allocation2 + $0x70] sm:$0xff]  ;;  %v63_v24 = vld [vmem:[#allocation2 + $0x88] sm:$0xff] }
  0x2b   :  { %5546 = vmatpush1.bf16.msra.mxu1 %v5545_v13  ;;  %v5517_v22 = vpack.c.bf16 %v58_v20, %v54_v19  ;;  %v67_v25 = vld [vmem:[#allocation2 + $0xa8] sm:$0xff]  ;;  %5516 = vmatprep.subr.bf16.mxu0 %v5515_v17  ;;  %v5549_v26 = vpack.c.bf16 %v60_v23, %v56_v21  ;;  %v65_v28 = vld [vmem:[#allocation2 + $0x98] sm:$0xff]  ;;  %v62_v30 = vld [vmem:[#allocation2 + $0x80] sm:$0xff] }
  0x2c   :  { %5548 = vmatprep.subr.bf16.mxu1 %v5547_v18  ;;  %v5519_v27 = vpack.c.bf16 %v67_v25, %v63_v24  ;;  %v69_v29 = vld [vmem:[#allocation2 + $0xb8] sm:$0xff]  ;;  %v66_v32 = vld [vmem:[#allocation2 + $0xa0] sm:$0xff]  ;;  %v64_v33 = vld [vmem:[#allocation2 + $0x90] sm:$0xff] }
  0x2d   :  { %v5551_v31 = vpack.c.bf16 %v69_v29, %v65_v28  ;;  %v68_v34 = vld [vmem:[#allocation2 + $0xb0] sm:$0xff]  ;;  %v5521_v35 = vpack.c.bf16 %v66_v32, %v62_v30  ;;  %v71_v36 = vld [vmem:[#allocation2 + $0xc8] sm:$0xff]  ;;  %v73_v38 = vld [vmem:[#allocation2 + $0xd8] sm:$0xff] }
  0x2e   :  { %5518 = vmatpush1.bf16.msra.mxu0 %v5517_v22  ;;  %v75_v37 = vld [vmem:[#allocation2 + $0xe8] sm:$0xff]  ;;  %v5553_v39 = vpack.c.bf16 %v68_v34, %v64_v33  ;;  %v77_v41 = vld [vmem:[#allocation2 + $0xf8] sm:$0xff]  ;;  %v70_v42 = vld [vmem:[#allocation2 + $0xc0] sm:$0xff] }
  0x2f   :  { %5550 = vmatpush1.bf16.msra.mxu1 %v5549_v26  ;;  %5520 = vmatprep.subr.bf16.mxu0 %v5519_v27  ;;  %v5523_v40 = vpack.c.bf16 %v75_v37, %v71_v36  ;;  %v74_v43 = vld [vmem:[#allocation2 + $0xe0] sm:$0xff]  ;;  %v5555_v44 = vpack.c.bf16 %v77_v41, %v73_v38  ;;  %v72_v45 = vld [vmem:[#allocation2 + $0xd0] sm:$0xff]  ;;  %v79_v47 = vld [vmem:[#allocation2 + $0x108] sm:$0xff] }
  0x30   :  { %5552 = vmatprep.subr.bf16.mxu1 %v5551_v31  ;;  %v76_v46 = vld [vmem:[#allocation2 + $0xf0] sm:$0xff]  ;;  %v83_v48 = vld [vmem:[#allocation2 + $0x128] sm:$0xff]  ;;  %v81_v49 = vld [vmem:[#allocation2 + $0x118] sm:$0xff]  ;;  %v5525_v51 = vpack.c.bf16 %v74_v43, %v70_v42 }
  0x31   :  { %v85_v50 = vld [vmem:[#allocation2 + $0x138] sm:$0xff]  ;;  %v5557_v52 = vpack.c.bf16 %v76_v46, %v72_v45  ;;  %v5527_v53 = vpack.c.bf16 %v83_v48, %v79_v47  ;;  %v78_v54 = vld [vmem:[#allocation2 + $0x100] sm:$0xff]  ;;  %v80_v56 = vld [vmem:[#allocation2 + $0x110] sm:$0xff] }
  0x32   :  { %5522 = vmatpush1.bf16.msra.mxu0 %v5521_v35  ;;  %v82_v55 = vld [vmem:[#allocation2 + $0x120] sm:$0xff]  ;;  %v5559_v57 = vpack.c.bf16 %v85_v50, %v81_v49  ;;  %v84_v58 = vld [vmem:[#allocation2 + $0x130] sm:$0xff]  ;;  %v87_v59 = vld [vmem:[#allocation2 + $0x148] sm:$0xff] }
  0x33   :  { %5554 = vmatpush1.bf16.msra.mxu1 %v5553_v39  ;;  %5524 = vmatprep.subr.bf16.mxu0 %v5523_v40  ;;  %v91_v60 = vld [vmem:[#allocation2 + $0x168] sm:$0xff]  ;;  %v89_v61 = vld [vmem:[#allocation2 + $0x158] sm:$0xff]  ;;  %v5529_v63 = vpack.c.bf16 %v82_v55, %v78_v54  ;;  %v5561_v1 = vpack.c.bf16 %v84_v58, %v80_v56  ;;  %v86_v3 = vld [vmem:[#allocation2 + $0x140] sm:$0xff] }
  0x34   :  { %5556 = vmatprep.subr.bf16.mxu1 %v5555_v44  ;;  %v93_v62 = vld [vmem:[#allocation2 + $0x178] sm:$0xff]  ;;  %v5531_v2 = vpack.c.bf16 %v91_v60, %v87_v59  ;;  %v90_v4 = vld [vmem:[#allocation2 + $0x160] sm:$0xff]  ;;  %v88_v5 = vld [vmem:[#allocation2 + $0x150] sm:$0xff] }
  0x35   :  { %v5563_v6 = vpack.c.bf16 %v93_v62, %v89_v61  ;;  %v92_v7 = vld [vmem:[#allocation2 + $0x170] sm:$0xff]  ;;  %v95_v8 = vld [vmem:[#allocation2 + $0x188] sm:$0xff]  ;;  %v97_v10 = vld [vmem:[#allocation2 + $0x198] sm:$0xff]  ;;  %v5533_v12 = vpack.c.bf16 %v90_v4, %v86_v3 }
  0x36   :  { %5526 = vmatpush1.bf16.msra.mxu0 %v5525_v51  ;;  %v99_v9 = vld [vmem:[#allocation2 + $0x1a8] sm:$0xff]  ;;  %v101_v11 = vld [vmem:[#allocation2 + $0x1b8] sm:$0xff]  ;;  %v5565_v13 = vpack.c.bf16 %v92_v7, %v88_v5  ;;  %v94_v15 = vld [vmem:[#allocation2 + $0x180] sm:$0xff] }
  0x37   :  { %5558 = vmatpush1.bf16.msra.mxu1 %v5557_v52  ;;  %5528 = vmatprep.subr.bf16.mxu0 %v5527_v53  ;;  %v5535_v14 = vpack.c.bf16 %v99_v9, %v95_v8  ;;  %v98_v16 = vld [vmem:[#allocation2 + $0x1a0] sm:$0xff]  ;;  %v96_v17 = vld [vmem:[#allocation2 + $0x190] sm:$0xff]  ;;  %v5567_v18 = vpack.c.bf16 %v101_v11, %v97_v10  ;;  %v103_v20 = vld [vmem:[#allocation2 + $0x1c8] sm:$0xff] }
  0x38   :  { %5560 = vmatprep.subr.bf16.mxu1 %v5559_v57  ;;  %v100_v19 = vld [vmem:[#allocation2 + $0x1b0] sm:$0xff]  ;;  %v107_v21 = vld [vmem:[#allocation2 + $0x1e8] sm:$0xff]  ;;  %v105_v22 = vld [vmem:[#allocation2 + $0x1d8] sm:$0xff]  ;;  %v5537_v24 = vpack.c.bf16 %v98_v16, %v94_v15 }
  0x39   :  { %v109_v23 = vld [vmem:[#allocation2 + $0x1f8] sm:$0xff]  ;;  %v5569_v25 = vpack.c.bf16 %v100_v19, %v96_v17  ;;  %v5539_v26 = vpack.c.bf16 %v107_v21, %v103_v20  ;;  %v102_v27 = vld [vmem:[#allocation2 + $0x1c0] sm:$0xff]  ;;  %v104_v29 = vld [vmem:[#allocation2 + $0x1d0] sm:$0xff] }
  0x3a   :  { %5530 = vmatpush1.bf16.msra.mxu0 %v5529_v63  ;;  %v106_v28 = vld [vmem:[#allocation2 + $0x1e0] sm:$0xff]  ;;  %v5571_v30 = vpack.c.bf16 %v109_v23, %v105_v22  ;;  %v108_v31 = vld [vmem:[#allocation2 + $0x1f0] sm:$0xff]  ;;  %v111_v32 = vld [vmem:[#allocation4 + $0x8] sm:$0xff] }
  0x3b   :  { %5562 = vmatpush1.bf16.msra.mxu1 %v5561_v1  ;;  %5532 = vmatprep.subr.bf16.mxu0 %v5531_v2  ;;  %v115_v33 = vld [vmem:[#allocation4 + $0x28] sm:$0xff]  ;;  %v113_v34 = vld [vmem:[#allocation4 + $0x18] sm:$0xff]  ;;  %v5541_v36 = vpack.c.bf16 %v106_v28, %v102_v27  ;;  %v5573_v37 = vpack.c.bf16 %v108_v31, %v104_v29  ;;  %v110_v39 = vld [vmem:[#allocation4] sm:$0xff] }
  0x3c   :  { %5564 = vmatprep.subr.bf16.mxu1 %v5563_v6  ;;  %v117_v35 = vld [vmem:[#allocation4 + $0x38] sm:$0xff]  ;;  %v7732_v38 = vpack.c.bf16 %v115_v33, %v111_v32  ;;  %v114_v40 = vld [vmem:[#allocation4 + $0x20] sm:$0xff]  ;;  %v112_v41 = vld [vmem:[#allocation4 + $0x10] sm:$0xff] }
  0x3d   :  { %v7734_v42 = vpack.c.bf16 %v117_v35, %v113_v34  ;;  %v116_v43 = vld [vmem:[#allocation4 + $0x30] sm:$0xff]  ;;  %v119_v44 = vld [vmem:[#allocation4 + $0x48] sm:$0xff]  ;;  %v121_v46 = vld [vmem:[#allocation4 + $0x58] sm:$0xff]  ;;  %v7739_v49 = vpack.c.bf16 %v114_v40, %v110_v39 }
  0x3e   :  { %5534 = vmatpush1.bf16.msra.mxu0 %v5533_v12  ;;  %v123_v45 = vld [vmem:[#allocation4 + $0x68] sm:$0xff]  ;;  %v125_v47 = vld [vmem:[#allocation4 + $0x78] sm:$0xff]  ;;  %v45_v48 = vld [vmem:[%s9099_s0] sm:$0xff]  ;;  %v7742_v50 = vpack.c.bf16 %v116_v43, %v112_v41 }
  0x3f   :  { %5566 = vmatpush1.bf16.msra.mxu1 %v5565_v13  ;;  %5536 = vmatprep.subr.bf16.mxu0 %v5535_v14  ;;  %v7744_v51 = vpack.c.bf16 %v123_v45, %v119_v44  ;;  %v118_v52 = vld [vmem:[#allocation4 + $0x40] sm:$0xff]  ;;  %v120_v54 = vld [vmem:[#allocation4 + $0x50] sm:$0xff]  ;;  %v7747_v55 = vpack.c.bf16 %v125_v47, %v121_v46  ;;  %v127_v57 = vld [vmem:[#allocation4 + $0x88] sm:$0xff] }
  0x40   :  { %5568 = vmatprep.subr.bf16.mxu1 %v5567_v18  ;;  %v122_v53 = vld [vmem:[#allocation4 + $0x60] sm:$0xff]  ;;  %v124_v56 = vld [vmem:[#allocation4 + $0x70] sm:$0xff]  ;;  %v131_v58 = vld [vmem:[#allocation4 + $0xa8] sm:$0xff] }
  0x41   :  { %v129_v59 = vld [vmem:[#allocation4 + $0x98] sm:$0xff]  ;;  %v7750_v61 = vpack.c.bf16 %v122_v53, %v118_v52  ;;  %v7754_v62 = vpack.c.bf16 %v124_v56, %v120_v54  ;;  %v7756_v63 = vpack.c.bf16 %v131_v58, %v127_v57  ;;  %v126_v1 = vld [vmem:[#allocation4 + $0x80] sm:$0xff]  ;;  %v128_v3 = vld [vmem:[#allocation4 + $0x90] sm:$0xff] }
  0x42   :  { %5538 = vmatpush1.bf16.msra.mxu0 %v5537_v24  ;;  %v133_v60 = vld [vmem:[#allocation4 + $0xb8] sm:$0xff]  ;;  %v130_v2 = vld [vmem:[#allocation4 + $0xa0] sm:$0xff]  ;;  %v132_v5 = vld [vmem:[#allocation4 + $0xb0] sm:$0xff] }
  0x43   :  { %5570 = vmatpush1.bf16.msra.mxu1 %v5569_v25  ;;  %5540 = vmatprep.subr.bf16.mxu0 %v5539_v26  ;;  %v7759_v4 = vpack.c.bf16 %v133_v60, %v129_v59  ;;  %v135_v6 = vld [vmem:[#allocation4 + $0xc8] sm:$0xff]  ;;  %v137_v8 = vld [vmem:[#allocation4 + $0xd8] sm:$0xff]  ;;  %v7764_v10 = vpack.c.bf16 %v130_v2, %v126_v1  ;;  %v7768_v11 = vpack.c.bf16 %v132_v5, %v128_v3  ;;  %v134_v13 = vld [vmem:[#allocation4 + $0xc0] sm:$0xff] }
  0x44   :  { %5572 = vmatprep.subr.bf16.mxu1 %v5571_v30  ;;  %v139_v7 = vld [vmem:[#allocation4 + $0xe8] sm:$0xff]  ;;  %v141_v9 = vld [vmem:[#allocation4 + $0xf8] sm:$0xff]  ;;  %v138_v14 = vld [vmem:[#allocation4 + $0xe0] sm:$0xff] }
  0x45   :  { %v7770_v12 = vpack.c.bf16 %v139_v7, %v135_v6  ;;  %v136_v15 = vld [vmem:[#allocation4 + $0xd0] sm:$0xff]  ;;  %v7773_v16 = vpack.c.bf16 %v141_v9, %v137_v8  ;;  %v143_v18 = vld [vmem:[#allocation4 + $0x108] sm:$0xff]  ;;  %v145_v20 = vld [vmem:[#allocation4 + $0x118] sm:$0xff]  ;;  %v7776_v22 = vpack.c.bf16 %v138_v14, %v134_v13 }
  0x46   :  { %5542 = vmatpush1.bf16.msra.mxu0 %v5541_v36  ;;  %v140_v17 = vld [vmem:[#allocation4 + $0xf0] sm:$0xff]  ;;  %v147_v19 = vld [vmem:[#allocation4 + $0x128] sm:$0xff]  ;;  %v149_v21 = vld [vmem:[#allocation4 + $0x138] sm:$0xff] }
  0x47   :  { %5574 = vmatpush1.bf16.msra.mxu1 %v5573_v37  ;;  %5576 = vmatprep.subr.bf16.mxu0 %v7732_v38  ;;  %v7780_v23 = vpack.c.bf16 %v140_v17, %v136_v15  ;;  %v7782_v24 = vpack.c.bf16 %v147_v19, %v143_v18  ;;  %v142_v25 = vld [vmem:[#allocation4 + $0x100] sm:$0xff]  ;;  %v144_v27 = vld [vmem:[#allocation4 + $0x110] sm:$0xff]  ;;  %v7785_v28 = vpack.c.bf16 %v149_v21, %v145_v20  ;;  %v151_v30 = vld [vmem:[#allocation4 + $0x148] sm:$0xff] }
  0x48   :  { %5608 = vmatprep.subr.bf16.mxu1 %v7734_v42  ;;  %v146_v26 = vld [vmem:[#allocation4 + $0x120] sm:$0xff]  ;;  %v148_v29 = vld [vmem:[#allocation4 + $0x130] sm:$0xff]  ;;  %v155_v31 = vld [vmem:[#allocation4 + $0x168] sm:$0xff] }
  0x49   :  { %261 = vmatmul.mubr.f32.vlgmr.msra.gmra.mrb[0].mxu0 %v45_v48  ;;  %v153_v32 = vld [vmem:[#allocation4 + $0x158] sm:$0xff]  ;;  %v7788_v34 = vpack.c.bf16 %v146_v26, %v142_v25  ;;  %v7792_v35 = vpack.c.bf16 %v148_v29, %v144_v27  ;;  %v7794_v36 = vpack.c.bf16 %v155_v31, %v151_v30  ;;  %v150_v37 = vld [vmem:[#allocation4 + $0x140] sm:$0xff]  ;;  %v152_v40 = vld [vmem:[#allocation4 + $0x150] sm:$0xff]  ;;  %v176_v26 = vlaneseq }
  0x4a   :  { %332 = vmatmul.mubr.f32.vlgmr.msra.gmra.mrb[0].mxu1 %v45_v48  ;;  %5578 = vmatpush1.bf16.msra.mxu0 %v7739_v49  ;;  %v157_v33 = vld [vmem:[#allocation4 + $0x178] sm:$0xff]  ;;  %v154_v39 = vld [vmem:[#allocation4 + $0x160] sm:$0xff]  ;;  %v156_v43 = vld [vmem:[#allocation4 + $0x170] sm:$0xff] }
  0x4b   :  { %5610 = vmatpush1.bf16.msra.mxu1 %v7742_v50  ;;  %5580 = vmatprep.subr.bf16.mxu0 %v7744_v51  ;;  %v7797_v41 = vpack.c.bf16 %v157_v33, %v153_v32  ;;  %v159_v44 = vld [vmem:[#allocation4 + $0x188] sm:$0xff]  ;;  %v161_v46 = vld [vmem:[#allocation4 + $0x198] sm:$0xff]  ;;  %v7800_v48 = vpack.c.bf16 %v154_v39, %v150_v37  ;;  %v7804_v52 = vpack.c.bf16 %v156_v43, %v152_v40  ;;  %v158_v54 = vld [vmem:[#allocation4 + $0x180] sm:$0xff]  ;;  %v177_v27 = vshrl.u32 %v176_v26, 7 }
  0x4c   :  { %5612 = vmatprep.subr.bf16.mxu1 %v7747_v55  ;;  %402 = vmatprep.mubr.f32.mxu0 %v7680_v0  ;;  %v163_v45 = vld [vmem:[#allocation4 + $0x1a8] sm:$0xff]  ;;  %v165_v47 = vld [vmem:[#allocation4 + $0x1b8] sm:$0xff]  ;;  %v162_v56 = vld [vmem:[#allocation4 + $0x1a0] sm:$0xff] }
  0x4d   :  { %473 = vmatprep.mubr.f32.mxu1 %v7680_v0  ;;  %v7806_v53 = vpack.c.bf16 %v163_v45, %v159_v44  ;;  %v160_v57 = vld [vmem:[#allocation4 + $0x190] sm:$0xff]  ;;  %v7809_v58 = vpack.c.bf16 %v165_v47, %v161_v46  ;;  %v167_v60 = vld [vmem:[#allocation4 + $0x1c8] sm:$0xff]  ;;  %v169_v2 = vld [vmem:[#allocation4 + $0x1d8] sm:$0xff]  ;;  %v7812_v5 = vpack.c.bf16 %v162_v56, %v158_v54  ;;  %v7871_v29 = vsub.s32 0, %v177_v27 }
  0x4e   :  { %5582 = vmatpush1.bf16.msra.mxu0 %v7750_v61  ;;  %v164_v59 = vld [vmem:[#allocation4 + $0x1b0] sm:$0xff]  ;;  %v171_v1 = vld [vmem:[#allocation4 + $0x1e8] sm:$0xff]  ;;  %v173_v3 = vld [vmem:[#allocation4 + $0x1f8] sm:$0xff]  ;;  %v7876_v31 = vsub.s32 1, %v177_v27  ;;  %v7880_v37 = vsub.s32 3, %v177_v27 }
  0x4f   :  { %5614 = vmatpush1.bf16.msra.mxu1 %v7754_v62  ;;  %5584 = vmatprep.subr.bf16.mxu0 %v7756_v63  ;;  %v7816_v6 = vpack.c.bf16 %v164_v59, %v160_v57  ;;  %v7818_v7 = vpack.c.bf16 %v171_v1, %v167_v60  ;;  %v166_v8 = vld [vmem:[#allocation4 + $0x1c0] sm:$0xff]  ;;  %v7821_v13 = vpack.c.bf16 %v173_v3, %v169_v2  ;;  %v168_v14 = vld [vmem:[#allocation4 + $0x1d0] sm:$0xff]  ;;  %v7889_v57 = vsub.s32 2, %v177_v27 }
  0x50   :  { %5616 = vmatprep.subr.bf16.mxu1 %v7759_v4  ;;  %v170_v9 = vld [vmem:[#allocation4 + $0x1e0] sm:$0xff]  ;;  %v172_v15 = vld [vmem:[#allocation4 + $0x1f0] sm:$0xff] }
  0x51   :  { %v7824_v17 = vpack.c.bf16 %v170_v9, %v166_v8  ;;  %v7828_v18 = vpack.c.bf16 %v172_v15, %v168_v14  ;;  %v174_v30 = vld [vmem:[%s9102_s3] sm:$0xf] }
  0x52   :  { %5586 = vmatpush1.bf16.msra.mxu0 %v7764_v10  ;;  %v179_v32 = vrot.slane %v174_v30, %v7871_v29  ;;  %v183_v33 = vrot.slane %v174_v30, %v7876_v31  ;;  %v191_v47 = vrot.slane %v174_v30, %v7880_v37  ;;  %v187_v2 = vrot.slane %v174_v30, %v7889_v57 }
  0x53   :  { %5618 = vmatpush1.bf16.msra.mxu1 %v7768_v11  ;;  %5588 = vmatprep.subr.bf16.mxu0 %v7770_v12 }
  0x54   :  { %5620 = vmatprep.subr.bf16.mxu1 %v7773_v16 }
  0x56   :  { %5590 = vmatpush1.bf16.msra.mxu0 %v7776_v22 }
  0x57   :  { %5622 = vmatpush1.bf16.msra.mxu1 %v7780_v23  ;;  %5592 = vmatprep.subr.bf16.mxu0 %v7782_v24 }
  0x58   :  { %5624 = vmatprep.subr.bf16.mxu1 %v7785_v28 }
  0x5a   :  { %5594 = vmatpush1.bf16.msra.mxu0 %v7788_v34 }
  0x5b   :  { %5626 = vmatpush1.bf16.msra.mxu1 %v7792_v35  ;;  %5596 = vmatprep.subr.bf16.mxu0 %v7794_v36 }
  0x5c   :  { %5628 = vmatprep.subr.bf16.mxu1 %v7797_v41 }
  0x5e   :  { %5598 = vmatpush1.bf16.msra.mxu0 %v7800_v48 }
  0x5f   :  { %5630 = vmatpush1.bf16.msra.mxu1 %v7804_v52  ;;  %5600 = vmatprep.subr.bf16.mxu0 %v7806_v53 }
  0x60   :  { %5632 = vmatprep.subr.bf16.mxu1 %v7809_v58 }
  0x62   :  { %5602 = vmatpush1.bf16.msra.mxu0 %v7812_v5 }
  0x63   :  { %5634 = vmatpush1.bf16.msra.mxu1 %v7816_v6  ;;  %5604 = vmatprep.subr.bf16.mxu0 %v7818_v7 }
  0x64   :  { %5636 = vmatprep.subr.bf16.mxu1 %v7821_v13 }
  0x66   :  { %5606 = vmatpush1.bf16.msra.mxu0 %v7824_v17 }
  0x67   :  { %5638 = vmatpush1.bf16.msra.mxu1 %v7828_v18  ;;  %5640 = vmatprep.subr.bf16.mxu0 %v7732_v38 }
  0x68   :  { %5672 = vmatprep.subr.bf16.mxu1 %v7734_v42 }
  0x69   :  { %403 = vmatmul.mubr.f32.vlgmr.msra.gmra.mrb[2].mxu0 %v7680_v0 }
  0x6a   :  { %474 = vmatmul.mubr.f32.vlgmr.msra.gmra.mrb[2].mxu1 %v7680_v0  ;;  %5642 = vmatpush1.bf16.msra.mxu0 %v7739_v49 }
  0x6b   :  { %5674 = vmatpush1.bf16.msra.mxu1 %v7742_v50  ;;  %5644 = vmatprep.subr.bf16.mxu0 %v7744_v51 }
  0x6c   :  { %5676 = vmatprep.subr.bf16.mxu1 %v7747_v55  ;;  %572 = vmatprep.mubr.f32.mxu0 %v7680_v0 }
  0x6d   :  { %643 = vmatprep.mubr.f32.mxu1 %v7680_v0 }
  0x6e   :  { %5646 = vmatpush1.bf16.msra.mxu0 %v7750_v61 }
  0x6f   :  { %5678 = vmatpush1.bf16.msra.mxu1 %v7754_v62  ;;  %5648 = vmatprep.subr.bf16.mxu0 %v7756_v63 }
  0x70   :  { %5680 = vmatprep.subr.bf16.mxu1 %v7759_v4 }
  0x72   :  { %5650 = vmatpush1.bf16.msra.mxu0 %v7764_v10 }
  0x73   :  { %5682 = vmatpush1.bf16.msra.mxu1 %v7768_v11  ;;  %5652 = vmatprep.subr.bf16.mxu0 %v7770_v12 }
  0x74   :  { %5684 = vmatprep.subr.bf16.mxu1 %v7773_v16 }
  0x76   :  { %5654 = vmatpush1.bf16.msra.mxu0 %v7776_v22 }
  0x77   :  { %5686 = vmatpush1.bf16.msra.mxu1 %v7780_v23  ;;  %5656 = vmatprep.subr.bf16.mxu0 %v7782_v24 }
  0x78   :  { %5688 = vmatprep.subr.bf16.mxu1 %v7785_v28 }
  0x7a   :  { %5658 = vmatpush1.bf16.msra.mxu0 %v7788_v34 }
  0x7b   :  { %5690 = vmatpush1.bf16.msra.mxu1 %v7792_v35  ;;  %5660 = vmatprep.subr.bf16.mxu0 %v7794_v36 }
  0x7c   :  { %5692 = vmatprep.subr.bf16.mxu1 %v7797_v41 }
  0x7e   :  { %5662 = vmatpush1.bf16.msra.mxu0 %v7800_v48 }
  0x7f   :  { %5694 = vmatpush1.bf16.msra.mxu1 %v7804_v52  ;;  %5664 = vmatprep.subr.bf16.mxu0 %v7806_v53 }
  0x80   :  { %5696 = vmatprep.subr.bf16.mxu1 %v7809_v58 }
  0x82   :  { %5666 = vmatpush1.bf16.msra.mxu0 %v7812_v5 }
  0x83   :  { %5698 = vmatpush1.bf16.msra.mxu1 %v7816_v6  ;;  %5668 = vmatprep.subr.bf16.mxu0 %v7818_v7 }
  0x84   :  { %5700 = vmatprep.subr.bf16.mxu1 %v7821_v13 }
  0x86   :  { %5670 = vmatpush1.bf16.msra.mxu0 %v7824_v17 }
  0x87   :  { %5702 = vmatpush1.bf16.msra.mxu1 %v7828_v18  ;;  %5704 = vmatprep.subr.bf16.mxu0 %v7732_v38 }
  0x88   :  { %5736 = vmatprep.subr.bf16.mxu1 %v7734_v42 }
 0x11c   :  { %v262_v19 = vpop.f32.mrb[0].mxu0 }
 0x11d   :  { %v264_v20 = vpop.f32.mrb[1].mxu0  ;;  %v333_v21 = vpop.f32.mrb[0].mxu1  ;;  %v7882_v39 = vadd.f32 %v262_v19, %v179_v32 }
 0x11e   :  { %v335_v25 = vpop.f32.mrb[1].mxu1  ;;  %v7884_v40 = vadd.f32 %v264_v20, %v183_v33  ;;  %v7895_v8 = vadd.f32 %v333_v21, %v187_v2 }
 0x11f   :  { %v7891_v1 = vadd.f32 %v335_v25, %v191_v47 }
 0x13c   :  { %v404_v43 = vpop.f32.mrb[2].mxu0 }
 0x13d   :  { %v480_v44 = vadd.f32 %v404_v43, %v7882_v39  ;;  %v475_v45 = vpop.f32.mrb[2].mxu1  ;;  %v406_v46 = vpop.f32.mrb[3].mxu0 }
 0x13e   :  { %v481_v54 = vadd.f32 %v406_v46, %v7884_v40  ;;  %v477_v56 = vpop.f32.mrb[3].mxu1  ;;  %v482_v14 = vadd.f32 %v475_v45, %v7895_v8 }
 0x13f   :  { %v5437_v59 = vmul.f32 -1.442695, %v480_v44  ;;  %v483_v3 = vadd.f32 %v477_v56, %v7891_v1 }
 0x140   :  { %v5438_v60 = vmul.f32 -1.442695, %v481_v54 }
 0x141   :  { %7244 = vpow2.f32 %v5437_v59  ;;  %v5439_v9 = vmul.f32 -1.442695, %v483_v3 }
 0x142   :  { %7246 = vpow2.f32 %v5438_v60 }
 0x143   :  { %7248 = vpow2.f32 %v5439_v9 }
 0x144   :  { %7250 = vtanh.f32 %v482_v14 }
 0x14b   :  { %v7245_v15 = vpop.eup %7244 }
 0x14c   :  { %v7247_v19 = vpop.eup %7246  ;;  %v493_v20 = vadd.f32 1.0, %v7245_v15 }
 0x14d   :  { %v494_v26 = vadd.f32 1.0, %v7247_v19  ;;  %v7249_v25 = vpop.eup %7248 }
 0x14e   :  { %7252 = vrcp.f32 %v493_v20  ;;  %v7251_v27 = vpop.eup %7250  ;;  %v495_v43 = vadd.f32 1.0, %v7249_v25 }
 0x14f   :  { %7254 = vrcp.f32 %v494_v26 }
 0x150   :  { %7256 = vrcp.f32 %v495_v43 }
 0x158   :  { %v7253_v32 = vpop.eup %7252 }
 0x159   :  { %v7255_v33 = vpop.eup %7254  ;;  %v504_v30 = vmul.f32 %v7253_v32, %v7251_v27 }
 0x15a   :  { %v503_v44 = vmul.f32 0.0, %v7255_v33  ;;  %v7257_v45 = vpop.eup %7256 }
 0x15c   :  { %v7898_v21 = vadd.f32 %v504_v30, %v503_v44 }
 0x15e   :  { %7258 = vtanh.f32 %v7898_v21 }
 0x168   :  { %v7259_v46 = vpop.eup %7258 }
 0x169   :  { %v7901_v47 = vmul.f32 %v7259_v46, %v7257_v45 }
 0x16b   :  { %573 = vmatmul.mubr.f32.vlgmr.msra.gmra.mrb[4].mxu0 %v7901_v47  ;;  %644 = vmatmul.mubr.f32.vlgmr.msra.gmra.mrb[4].mxu1 %v7901_v47 }
 0x16c   :  { %5706 = vmatpush1.bf16.msra.mxu0 %v7739_v49  ;;  %5738 = vmatpush1.bf16.msra.mxu1 %v7742_v50 }
 0x16d   :  { %5708 = vmatprep.subr.bf16.mxu0 %v7744_v51  ;;  %5740 = vmatprep.subr.bf16.mxu1 %v7747_v55 }
 0x16e   :  { %760 = vmatprep.mubr.f32.mxu0 %v7680_v0  ;;  %831 = vmatprep.mubr.f32.mxu1 %v7680_v0 }
 0x170   :  { %5710 = vmatpush1.bf16.msra.mxu0 %v7750_v61  ;;  %5742 = vmatpush1.bf16.msra.mxu1 %v7754_v62 }
 0x171   :  { %5712 = vmatprep.subr.bf16.mxu0 %v7756_v63  ;;  %5744 = vmatprep.subr.bf16.mxu1 %v7759_v4 }
 0x174   :  { %5714 = vmatpush1.bf16.msra.mxu0 %v7764_v10  ;;  %5746 = vmatpush1.bf16.msra.mxu1 %v7768_v11 }
 0x175   :  { %5716 = vmatprep.subr.bf16.mxu0 %v7770_v12  ;;  %5748 = vmatprep.subr.bf16.mxu1 %v7773_v16 }
 0x178   :  { %5718 = vmatpush1.bf16.msra.mxu0 %v7776_v22  ;;  %5750 = vmatpush1.bf16.msra.mxu1 %v7780_v23 }
 0x179   :  { %5720 = vmatprep.subr.bf16.mxu0 %v7782_v24  ;;  %5752 = vmatprep.subr.bf16.mxu1 %v7785_v28 }
 0x17c   :  { %5722 = vmatpush1.bf16.msra.mxu0 %v7788_v34  ;;  %5754 = vmatpush1.bf16.msra.mxu1 %v7792_v35 }
 0x17d   :  { %5724 = vmatprep.subr.bf16.mxu0 %v7794_v36  ;;  %5756 = vmatprep.subr.bf16.mxu1 %v7797_v41 }
 0x180   :  { %5726 = vmatpush1.bf16.msra.mxu0 %v7800_v48  ;;  %5758 = vmatpush1.bf16.msra.mxu1 %v7804_v52 }
 0x181   :  { %5728 = vmatprep.subr.bf16.mxu0 %v7806_v53  ;;  %5760 = vmatprep.subr.bf16.mxu1 %v7809_v58 }
 0x184   :  { %5730 = vmatpush1.bf16.msra.mxu0 %v7812_v5  ;;  %5762 = vmatpush1.bf16.msra.mxu1 %v7816_v6 }
 0x185   :  { %5732 = vmatprep.subr.bf16.mxu0 %v7818_v7  ;;  %5764 = vmatprep.subr.bf16.mxu1 %v7821_v13 }
 0x188   :  { %5734 = vmatpush1.bf16.msra.mxu0 %v7824_v17  ;;  %5766 = vmatpush1.bf16.msra.mxu1 %v7828_v18 }
 0x189   :  { %5768 = vmatprep.subr.bf16.mxu0 %v7732_v38  ;;  %5800 = vmatprep.subr.bf16.mxu1 %v7734_v42 }
 0x23e   :  { %v574_v54 = vpop.f32.mrb[4].mxu0  ;;  %v645_v56 = vpop.f32.mrb[4].mxu1 }
 0x23f   :  { %v654_v59 = vrot.slane %v574_v54, 7  ;;  %v576_v60 = vpop.f32.mrb[5].mxu0  ;;  %v647_v2 = vpop.f32.mrb[5].mxu1  ;;  %v656_v25 = vrot.slane %v645_v56, 7 }
 0x240   :  { %v655_v3 = vrot.slane %v576_v60, 7  ;;  %v657_v20 = vrot.slane %v647_v2, 7 }
 0x241   :  { %v662_v9 = vadd.f32 %v654_v59, %v7882_v39  ;;  %v664_v32 = vadd.f32 %v656_v25, %v7895_v8  ;;  %v686_v59 = vrot.slane %v7898_v21, 7 }
 0x242   :  { %v663_v14 = vadd.f32 %v655_v3, %v7884_v40  ;;  %v665_v26 = vadd.f32 %v657_v20, %v7891_v1 }
 0x243   :  { %v5440_v15 = vmul.f32 -1.442695, %v662_v9 }
 0x244   :  { %v5441_v19 = vmul.f32 -1.442695, %v663_v14  ;;  %v5442_v27 = vmul.f32 -1.442695, %v665_v26 }
 0x245   :  { %7260 = vpow2.f32 %v5440_v15 }
 0x246   :  { %7262 = vpow2.f32 %v5441_v19 }
 0x247   :  { %7264 = vpow2.f32 %v5442_v27 }
 0x248   :  { %7266 = vtanh.f32 %v664_v32 }
 0x24f   :  { %v7261_v33 = vpop.eup %7260 }
 0x250   :  { %v7263_v30 = vpop.eup %7262  ;;  %v675_v43 = vadd.f32 1.0, %v7261_v33 }
 0x251   :  { %v676_v44 = vadd.f32 1.0, %v7263_v30  ;;  %v7265_v45 = vpop.eup %7264 }
 0x252   :  { %7268 = vrcp.f32 %v675_v43  ;;  %v7267_v46 = vpop.eup %7266  ;;  %v677_v3 = vadd.f32 1.0, %v7265_v45 }
 0x253   :  { %7270 = vrcp.f32 %v676_v44 }
 0x254   :  { %7272 = vrcp.f32 %v677_v3 }
 0x25c   :  { %v7269_v54 = vpop.eup %7268 }
 0x25d   :  { %v7271_v60 = vpop.eup %7270  ;;  %v689_v2 = vmul.f32 %v7269_v54, %v7267_v46 }
 0x25e   :  { %v688_v56 = vmul.f32 %v7271_v60, %v686_v59  ;;  %v7273_v14 = vpop.eup %7272 }
 0x260   :  { %v7944_v9 = vadd.f32 %v689_v2, %v688_v56 }
 0x262   :  { %7274 = vtanh.f32 %v7944_v9 }
 0x26c   :  { %v7275_v15 = vpop.eup %7274 }
 0x26d   :  { %v7947_v19 = vmul.f32 %v7275_v15, %v7273_v14 }
 0x26f   :  { %v694_v20 = vrot.slane %v7947_v19, 1 }
 0x271   :  { %761 = vmatmul.mubr.f32.vlgmr.msra.gmra.mrb[6].mxu0 %v694_v20  ;;  %832 = vmatmul.mubr.f32.vlgmr.msra.gmra.mrb[6].mxu1 %v694_v20 }
 0x272   :  { %5770 = vmatpush1.bf16.msra.mxu0 %v7739_v49  ;;  %5802 = vmatpush1.bf16.msra.mxu1 %v7742_v50 }
 0x273   :  { %5772 = vmatprep.subr.bf16.mxu0 %v7744_v51  ;;  %5804 = vmatprep.subr.bf16.mxu1 %v7747_v55 }
 0x274   :  { %948 = vmatprep.mubr.f32.mxu0 %v7680_v0  ;;  %1019 = vmatprep.mubr.f32.mxu1 %v7680_v0 }
 0x276   :  { %5774 = vmatpush1.bf16.msra.mxu0 %v7750_v61  ;;  %5806 = vmatpush1.bf16.msra.mxu1 %v7754_v62 }
 0x277   :  { %5776 = vmatprep.subr.bf16.mxu0 %v7756_v63  ;;  %5808 = vmatprep.subr.bf16.mxu1 %v7759_v4 }
 0x27a   :  { %5778 = vmatpush1.bf16.msra.mxu0 %v7764_v10  ;;  %5810 = vmatpush1.bf16.msra.mxu1 %v7768_v11 }
 0x27b   :  { %5780 = vmatprep.subr.bf16.mxu0 %v7770_v12  ;;  %5812 = vmatprep.subr.bf16.mxu1 %v7773_v16 }
 0x27e   :  { %5782 = vmatpush1.bf16.msra.mxu0 %v7776_v22  ;;  %5814 = vmatpush1.bf16.msra.mxu1 %v7780_v23 }
 0x27f   :  { %5784 = vmatprep.subr.bf16.mxu0 %v7782_v24  ;;  %5816 = vmatprep.subr.bf16.mxu1 %v7785_v28 }
 0x282   :  { %5786 = vmatpush1.bf16.msra.mxu0 %v7788_v34  ;;  %5818 = vmatpush1.bf16.msra.mxu1 %v7792_v35 }
 0x283   :  { %5788 = vmatprep.subr.bf16.mxu0 %v7794_v36  ;;  %5820 = vmatprep.subr.bf16.mxu1 %v7797_v41 }
 0x286   :  { %5790 = vmatpush1.bf16.msra.mxu0 %v7800_v48  ;;  %5822 = vmatpush1.bf16.msra.mxu1 %v7804_v52 }
 0x287   :  { %5792 = vmatprep.subr.bf16.mxu0 %v7806_v53  ;;  %5824 = vmatprep.subr.bf16.mxu1 %v7809_v58 }
 0x28a   :  { %5794 = vmatpush1.bf16.msra.mxu0 %v7812_v5  ;;  %5826 = vmatpush1.bf16.msra.mxu1 %v7816_v6 }
 0x28b   :  { %5796 = vmatprep.subr.bf16.mxu0 %v7818_v7  ;;  %5828 = vmatprep.subr.bf16.mxu1 %v7821_v13 }
 0x28e   :  { %5798 = vmatpush1.bf16.msra.mxu0 %v7824_v17  ;;  %5830 = vmatpush1.bf16.msra.mxu1 %v7828_v18 }
 0x28f   :  { %5832 = vmatprep.subr.bf16.mxu0 %v7732_v38  ;;  %5864 = vmatprep.subr.bf16.mxu1 %v7734_v42 }
 0x344   :  { %v762_v21 = vpop.f32.mrb[6].mxu0  ;;  %v833_v26 = vpop.f32.mrb[6].mxu1 }
 0x345   :  { %v842_v25 = vrot.slane %v762_v21, 6  ;;  %v764_v27 = vpop.f32.mrb[7].mxu0  ;;  %v835_v32 = vpop.f32.mrb[7].mxu1  ;;  %v844_v59 = vrot.slane %v833_v26, 6 }
 0x346   :  { %v843_v33 = vrot.slane %v764_v27, 6  ;;  %v845_v46 = vrot.slane %v835_v32, 6  ;;  %v874_v27 = vrot.slane %v7944_v9, 7 }
 0x347   :  { %v850_v30 = vadd.f32 %v842_v25, %v7882_v39  ;;  %v852_v2 = vadd.f32 %v844_v59, %v7895_v8 }
 0x348   :  { %v851_v43 = vadd.f32 %v843_v33, %v7884_v40  ;;  %v853_v54 = vadd.f32 %v845_v46, %v7891_v1 }
 0x349   :  { %v5443_v44 = vmul.f32 -1.442695, %v850_v30 }
 0x34a   :  { %v5444_v45 = vmul.f32 -1.442695, %v851_v43  ;;  %v5445_v60 = vmul.f32 -1.442695, %v853_v54  ;;  %v1822_v54 = vsel %vm1821_vm0, %v7901_v47, %v7947_v19 }
 0x34b   :  { %7276 = vpow2.f32 %v5443_v44 }
 0x34c   :  { %7278 = vpow2.f32 %v5444_v45 }
 0x34d   :  { %7280 = vpow2.f32 %v5445_v60 }
 0x34e   :  { %7282 = vtanh.f32 %v852_v2 }
 0x355   :  { %v7277_v3 = vpop.eup %7276 }
 0x356   :  { %v7279_v56 = vpop.eup %7278  ;;  %v863_v14 = vadd.f32 1.0, %v7277_v3 }
 0x357   :  { %v864_v15 = vadd.f32 1.0, %v7279_v56  ;;  %v7281_v20 = vpop.eup %7280 }
 0x358   :  { %7284 = vrcp.f32 %v863_v14  ;;  %v7283_v21 = vpop.eup %7282  ;;  %v865_v30 = vadd.f32 1.0, %v7281_v20 }
 0x359   :  { %7286 = vrcp.f32 %v864_v15 }
 0x35a   :  { %7288 = vrcp.f32 %v865_v30 }
 0x362   :  { %v7285_v25 = vpop.eup %7284 }
 0x363   :  { %v7287_v32 = vpop.eup %7286  ;;  %v877_v33 = vmul.f32 %v7285_v25, %v7283_v21 }
 0x364   :  { %v876_v26 = vmul.f32 %v7287_v32, %v874_v27  ;;  %v7289_v44 = vpop.eup %7288 }
 0x366   :  { %v7989_v43 = vadd.f32 %v877_v33, %v876_v26 }
 0x368   :  { %7290 = vtanh.f32 %v7989_v43 }
 0x372   :  { %v7291_v45 = vpop.eup %7290 }
 0x373   :  { %v880_v46 = vmul.f32 %v7291_v45, %v7289_v44 }
 0x375   :  { %v882_v59 = vrot.slane %v880_v46, 2  ;;  %v7996_v9 = vsel %vm1823_vm1, %v1822_v54, %v880_v46 }
 0x377   :  { %949 = vmatmul.mubr.f32.vlgmr.msra.gmra.mrb[8].mxu0 %v882_v59  ;;  %1020 = vmatmul.mubr.f32.vlgmr.msra.gmra.mrb[8].mxu1 %v882_v59 }
 0x378   :  { %5834 = vmatpush1.bf16.msra.mxu0 %v7739_v49  ;;  %5866 = vmatpush1.bf16.msra.mxu1 %v7742_v50 }
 0x379   :  { %5836 = vmatprep.subr.bf16.mxu0 %v7744_v51  ;;  %5868 = vmatprep.subr.bf16.mxu1 %v7747_v55 }
 0x37a   :  { %1136 = vmatprep.mubr.f32.mxu0 %v7680_v0  ;;  %1207 = vmatprep.mubr.f32.mxu1 %v7680_v0 }
 0x37c   :  { %5838 = vmatpush1.bf16.msra.mxu0 %v7750_v61  ;;  %5870 = vmatpush1.bf16.msra.mxu1 %v7754_v62 }
 0x37d   :  { %5840 = vmatprep.subr.bf16.mxu0 %v7756_v63  ;;  %5872 = vmatprep.subr.bf16.mxu1 %v7759_v4 }
 0x380   :  { %5842 = vmatpush1.bf16.msra.mxu0 %v7764_v10  ;;  %5874 = vmatpush1.bf16.msra.mxu1 %v7768_v11 }
 0x381   :  { %5844 = vmatprep.subr.bf16.mxu0 %v7770_v12  ;;  %5876 = vmatprep.subr.bf16.mxu1 %v7773_v16 }
 0x384   :  { %5846 = vmatpush1.bf16.msra.mxu0 %v7776_v22  ;;  %5878 = vmatpush1.bf16.msra.mxu1 %v7780_v23 }
 0x385   :  { %5848 = vmatprep.subr.bf16.mxu0 %v7782_v24  ;;  %5880 = vmatprep.subr.bf16.mxu1 %v7785_v28 }
 0x388   :  { %5850 = vmatpush1.bf16.msra.mxu0 %v7788_v34  ;;  %5882 = vmatpush1.bf16.msra.mxu1 %v7792_v35 }
 0x389   :  { %5852 = vmatprep.subr.bf16.mxu0 %v7794_v36  ;;  %5884 = vmatprep.subr.bf16.mxu1 %v7797_v41 }
 0x38c   :  { %5854 = vmatpush1.bf16.msra.mxu0 %v7800_v48  ;;  %5886 = vmatpush1.bf16.msra.mxu1 %v7804_v52 }
 0x38d   :  { %5856 = vmatprep.subr.bf16.mxu0 %v7806_v53  ;;  %5888 = vmatprep.subr.bf16.mxu1 %v7809_v58 }
 0x390   :  { %5858 = vmatpush1.bf16.msra.mxu0 %v7812_v5  ;;  %5890 = vmatpush1.bf16.msra.mxu1 %v7816_v6 }
 0x391   :  { %5860 = vmatprep.subr.bf16.mxu0 %v7818_v7  ;;  %5892 = vmatprep.subr.bf16.mxu1 %v7821_v13 }
 0x394   :  { %5862 = vmatpush1.bf16.msra.mxu0 %v7824_v17  ;;  %5894 = vmatpush1.bf16.msra.mxu1 %v7828_v18 }
 0x395   :  { %5896 = vmatprep.subr.bf16.mxu0 %v7732_v38  ;;  %5928 = vmatprep.subr.bf16.mxu1 %v7734_v42 }
 0x44a   :  { %v950_v47 = vpop.f32.mrb[8].mxu0  ;;  %v1021_v19 = vpop.f32.mrb[8].mxu1 }
 0x44b   :  { %v1030_v60 = vrot.slane %v950_v47, 5  ;;  %v952_v2 = vpop.f32.mrb[9].mxu0  ;;  %v1023_v3 = vpop.f32.mrb[9].mxu1  ;;  %v1032_v32 = vrot.slane %v1021_v19, 5 }
 0x44c   :  { %v1031_v56 = vrot.slane %v952_v2, 5  ;;  %v1033_v25 = vrot.slane %v1023_v3, 5 }
 0x44d   :  { %v1038_v14 = vadd.f32 %v1030_v60, %v7882_v39  ;;  %v1040_v30 = vadd.f32 %v1032_v32, %v7895_v8  ;;  %v1062_v60 = vrot.slane %v7989_v43, 7 }
 0x44e   :  { %v1039_v15 = vadd.f32 %v1031_v56, %v7884_v40  ;;  %v1041_v27 = vadd.f32 %v1033_v25, %v7891_v1 }
 0x44f   :  { %v5446_v20 = vmul.f32 -1.442695, %v1038_v14 }
 0x450   :  { %v5447_v21 = vmul.f32 -1.442695, %v1039_v15  ;;  %v5448_v33 = vmul.f32 -1.442695, %v1041_v27 }
 0x451   :  { %7292 = vpow2.f32 %v5446_v20 }
 0x452   :  { %7294 = vpow2.f32 %v5447_v21 }
 0x453   :  { %7296 = vpow2.f32 %v5448_v33 }
 0x454   :  { %7298 = vtanh.f32 %v1040_v30 }
 0x45b   :  { %v7293_v26 = vpop.eup %7292 }
 0x45c   :  { %v7295_v44 = vpop.eup %7294  ;;  %v1051_v45 = vadd.f32 1.0, %v7293_v26 }
 0x45d   :  { %v1052_v46 = vadd.f32 1.0, %v7295_v44  ;;  %v7297_v54 = vpop.eup %7296 }
 0x45e   :  { %7300 = vrcp.f32 %v1051_v45  ;;  %v7299_v59 = vpop.eup %7298  ;;  %v1053_v56 = vadd.f32 1.0, %v7297_v54 }
 0x45f   :  { %7302 = vrcp.f32 %v1052_v46 }
 0x460   :  { %7304 = vrcp.f32 %v1053_v56 }
 0x468   :  { %v7301_v47 = vpop.eup %7300 }
 0x469   :  { %v7303_v2 = vpop.eup %7302  ;;  %v1065_v3 = vmul.f32 %v7301_v47, %v7299_v59 }
 0x46a   :  { %v1064_v19 = vmul.f32 %v7303_v2, %v1062_v60  ;;  %v7305_v15 = vpop.eup %7304 }
 0x46c   :  { %v8037_v14 = vadd.f32 %v1065_v3, %v1064_v19 }
 0x46e   :  { %7306 = vtanh.f32 %v8037_v14 }
 0x478   :  { %v7307_v20 = vpop.eup %7306 }
 0x479   :  { %v1068_v21 = vmul.f32 %v7307_v20, %v7305_v15 }
 0x47b   :  { %v1070_v25 = vrot.slane %v1068_v21, 3  ;;  %v8042_v27 = vsel %vm1825_vm2, %v7996_v9, %v1068_v21 }
 0x47d   :  { %1137 = vmatmul.mubr.f32.vlgmr.msra.gmra.mrb[10].mxu0 %v1070_v25  ;;  %1208 = vmatmul.mubr.f32.vlgmr.msra.gmra.mrb[10].mxu1 %v1070_v25 }
 0x47e   :  { %5898 = vmatpush1.bf16.msra.mxu0 %v7739_v49  ;;  %5930 = vmatpush1.bf16.msra.mxu1 %v7742_v50 }
 0x47f   :  { %5900 = vmatprep.subr.bf16.mxu0 %v7744_v51  ;;  %5932 = vmatprep.subr.bf16.mxu1 %v7747_v55 }
 0x480   :  { %1324 = vmatprep.mubr.f32.mxu0 %v7680_v0  ;;  %1395 = vmatprep.mubr.f32.mxu1 %v7680_v0 }
 0x482   :  { %5902 = vmatpush1.bf16.msra.mxu0 %v7750_v61  ;;  %5934 = vmatpush1.bf16.msra.mxu1 %v7754_v62 }
 0x483   :  { %5904 = vmatprep.subr.bf16.mxu0 %v7756_v63  ;;  %5936 = vmatprep.subr.bf16.mxu1 %v7759_v4 }
 0x486   :  { %5906 = vmatpush1.bf16.msra.mxu0 %v7764_v10  ;;  %5938 = vmatpush1.bf16.msra.mxu1 %v7768_v11 }
 0x487   :  { %5908 = vmatprep.subr.bf16.mxu0 %v7770_v12  ;;  %5940 = vmatprep.subr.bf16.mxu1 %v7773_v16 }
 0x48a   :  { %5910 = vmatpush1.bf16.msra.mxu0 %v7776_v22  ;;  %5942 = vmatpush1.bf16.msra.mxu1 %v7780_v23 }
 0x48b   :  { %5912 = vmatprep.subr.bf16.mxu0 %v7782_v24  ;;  %5944 = vmatprep.subr.bf16.mxu1 %v7785_v28 }
 0x48e   :  { %5914 = vmatpush1.bf16.msra.mxu0 %v7788_v34  ;;  %5946 = vmatpush1.bf16.msra.mxu1 %v7792_v35 }
 0x48f   :  { %5916 = vmatprep.subr.bf16.mxu0 %v7794_v36  ;;  %5948 = vmatprep.subr.bf16.mxu1 %v7797_v41 }
 0x492   :  { %5918 = vmatpush1.bf16.msra.mxu0 %v7800_v48  ;;  %5950 = vmatpush1.bf16.msra.mxu1 %v7804_v52 }
 0x493   :  { %5920 = vmatprep.subr.bf16.mxu0 %v7806_v53  ;;  %5952 = vmatprep.subr.bf16.mxu1 %v7809_v58 }
 0x496   :  { %5922 = vmatpush1.bf16.msra.mxu0 %v7812_v5  ;;  %5954 = vmatpush1.bf16.msra.mxu1 %v7816_v6 }
 0x497   :  { %5924 = vmatprep.subr.bf16.mxu0 %v7818_v7  ;;  %5956 = vmatprep.subr.bf16.mxu1 %v7821_v13 }
 0x49a   :  { %5926 = vmatpush1.bf16.msra.mxu0 %v7824_v17  ;;  %5958 = vmatpush1.bf16.msra.mxu1 %v7828_v18 }
 0x49b   :  { %5960 = vmatprep.subr.bf16.mxu0 %v7732_v38  ;;  %5992 = vmatprep.subr.bf16.mxu1 %v7734_v42 }
 0x550   :  { %v1138_v43 = vpop.f32.mrb[10].mxu0  ;;  %v1209_v9 = vpop.f32.mrb[10].mxu1 }
 0x551   :  { %v1218_v32 = vrot.slane %v1138_v43, 4  ;;  %v1140_v33 = vpop.f32.mrb[11].mxu0  ;;  %v1211_v30 = vpop.f32.mrb[11].mxu1  ;;  %v1220_v60 = vrot.slane %v1209_v9, 4 }
 0x552   :  { %v1219_v26 = vrot.slane %v1140_v33, 4  ;;  %v1221_v59 = vrot.slane %v1211_v30, 4 }
 0x553   :  { %v1226_v44 = vadd.f32 %v1218_v32, %v7882_v39  ;;  %v1228_v3 = vadd.f32 %v1220_v60, %v7895_v8  ;;  %v1250_v32 = vrot.slane %v8037_v14, 7 }
 0x554   :  { %v1227_v45 = vadd.f32 %v1219_v26, %v7884_v40  ;;  %v1229_v47 = vadd.f32 %v1221_v59, %v7891_v1 }
 0x555   :  { %v5449_v46 = vmul.f32 -1.442695, %v1226_v44 }
 0x556   :  { %v5450_v54 = vmul.f32 -1.442695, %v1227_v45  ;;  %v5451_v2 = vmul.f32 -1.442695, %v1229_v47 }
 0x557   :  { %7308 = vpow2.f32 %v5449_v46 }
 0x558   :  { %7310 = vpow2.f32 %v5450_v54 }
 0x559   :  { %7312 = vpow2.f32 %v5451_v2 }
 0x55a   :  { %7314 = vtanh.f32 %v1228_v3 }
 0x561   :  { %v7309_v56 = vpop.eup %7308 }
 0x562   :  { %v7311_v19 = vpop.eup %7310  ;;  %v1239_v15 = vadd.f32 1.0, %v7309_v56 }
 0x563   :  { %v1240_v20 = vadd.f32 1.0, %v7311_v19  ;;  %v7313_v21 = vpop.eup %7312 }
 0x564   :  { %7316 = vrcp.f32 %v1239_v15  ;;  %v7315_v25 = vpop.eup %7314  ;;  %v1241_v26 = vadd.f32 1.0, %v7313_v21 }
 0x565   :  { %7318 = vrcp.f32 %v1240_v20 }
 0x566   :  { %7320 = vrcp.f32 %v1241_v26 }
 0x56e   :  { %v7317_v43 = vpop.eup %7316 }
 0x56f   :  { %v7319_v33 = vpop.eup %7318  ;;  %v1253_v30 = vmul.f32 %v7317_v43, %v7315_v25 }
 0x570   :  { %v1252_v9 = vmul.f32 %v7319_v33, %v1250_v32  ;;  %v7321_v45 = vpop.eup %7320 }
 0x572   :  { %v8083_v44 = vadd.f32 %v1253_v30, %v1252_v9 }
 0x574   :  { %7322 = vtanh.f32 %v8083_v44 }
 0x57e   :  { %v7323_v46 = vpop.eup %7322 }
 0x57f   :  { %v1256_v54 = vmul.f32 %v7323_v46, %v7321_v45 }
 0x581   :  { %v1258_v59 = vrot.slane %v1256_v54, 4  ;;  %v8088_v47 = vsel %vm1827_vm3, %v8042_v27, %v1256_v54 }
 0x583   :  { %1325 = vmatmul.mubr.f32.vlgmr.msra.gmra.mrb[12].mxu0 %v1258_v59  ;;  %1396 = vmatmul.mubr.f32.vlgmr.msra.gmra.mrb[12].mxu1 %v1258_v59  ;;  %v1438_v59 = vrot.slane %v8083_v44, 7 }
 0x584   :  { %5962 = vmatpush1.bf16.msra.mxu0 %v7739_v49  ;;  %5994 = vmatpush1.bf16.msra.mxu1 %v7742_v50 }
 0x585   :  { %5964 = vmatprep.subr.bf16.mxu0 %v7744_v51  ;;  %5996 = vmatprep.subr.bf16.mxu1 %v7747_v55 }
 0x586   :  { %1512 = vmatprep.mubr.f32.mxu0 %v7680_v0  ;;  %1583 = vmatprep.mubr.f32.mxu1 %v7680_v0 }
 0x588   :  { %5966 = vmatpush1.bf16.msra.mxu0 %v7750_v61  ;;  %5998 = vmatpush1.bf16.msra.mxu1 %v7754_v62 }
 0x589   :  { %5968 = vmatprep.subr.bf16.mxu0 %v7756_v63  ;;  %6000 = vmatprep.subr.bf16.mxu1 %v7759_v4 }
 0x58c   :  { %5970 = vmatpush1.bf16.msra.mxu0 %v7764_v10  ;;  %6002 = vmatpush1.bf16.msra.mxu1 %v7768_v11 }
 0x58d   :  { %5972 = vmatprep.subr.bf16.mxu0 %v7770_v12  ;;  %6004 = vmatprep.subr.bf16.mxu1 %v7773_v16 }
 0x590   :  { %5974 = vmatpush1.bf16.msra.mxu0 %v7776_v22  ;;  %6006 = vmatpush1.bf16.msra.mxu1 %v7780_v23 }
 0x591   :  { %5976 = vmatprep.subr.bf16.mxu0 %v7782_v24  ;;  %6008 = vmatprep.subr.bf16.mxu1 %v7785_v28 }
 0x594   :  { %5978 = vmatpush1.bf16.msra.mxu0 %v7788_v34  ;;  %6010 = vmatpush1.bf16.msra.mxu1 %v7792_v35 }
 0x595   :  { %5980 = vmatprep.subr.bf16.mxu0 %v7794_v36  ;;  %6012 = vmatprep.subr.bf16.mxu1 %v7797_v41 }
 0x598   :  { %5982 = vmatpush1.bf16.msra.mxu0 %v7800_v48  ;;  %6014 = vmatpush1.bf16.msra.mxu1 %v7804_v52 }
 0x599   :  { %5984 = vmatprep.subr.bf16.mxu0 %v7806_v53  ;;  %6016 = vmatprep.subr.bf16.mxu1 %v7809_v58 }
 0x59c   :  { %5986 = vmatpush1.bf16.msra.mxu0 %v7812_v5  ;;  %6018 = vmatpush1.bf16.msra.mxu1 %v7816_v6 }
 0x59d   :  { %5988 = vmatprep.subr.bf16.mxu0 %v7818_v7  ;;  %6020 = vmatprep.subr.bf16.mxu1 %v7821_v13 }
 0x5a0   :  { %5990 = vmatpush1.bf16.msra.mxu0 %v7824_v17  ;;  %6022 = vmatpush1.bf16.msra.mxu1 %v7828_v18 }
 0x5a1   :  { %6024 = vmatprep.subr.bf16.mxu0 %v7732_v38  ;;  %6056 = vmatprep.subr.bf16.mxu1 %v7734_v42 }
 0x656   :  { %v1326_v14 = vpop.f32.mrb[12].mxu0  ;;  %v1397_v27 = vpop.f32.mrb[12].mxu1 }
 0x657   :  { %v1406_v60 = vrot.slane %v1326_v14, 3  ;;  %v1328_v2 = vpop.f32.mrb[13].mxu0  ;;  %v1399_v3 = vpop.f32.mrb[13].mxu1  ;;  %v1408_v38 = vrot.slane %v1397_v27, 3 }
 0x658   :  { %v1407_v56 = vrot.slane %v1328_v2, 3  ;;  %v1409_v25 = vrot.slane %v1399_v3, 3 }
 0x659   :  { %v1414_v19 = vadd.f32 %v1406_v60, %v7882_v39  ;;  %v1416_v42 = vadd.f32 %v1408_v38, %v7895_v8  ;;  %v1841_v38 = vld [vmem:[#allocation2 + $0x228] sm:$0xff] }
 0x65a   :  { %v1415_v15 = vadd.f32 %v1407_v56, %v7884_v40  ;;  %v1417_v43 = vadd.f32 %v1409_v25, %v7891_v1 }
 0x65b   :  { %v5452_v20 = vmul.f32 -1.442695, %v1414_v19 }
 0x65c   :  { %v5453_v21 = vmul.f32 -1.442695, %v1415_v15  ;;  %v5454_v32 = vmul.f32 -1.442695, %v1417_v43  ;;  %v1837_v43 = vld [vmem:[#allocation2 + $0x208] sm:$0xff] }
 0x65d   :  { %7324 = vpow2.f32 %v5452_v20 }
 0x65e   :  { %7326 = vpow2.f32 %v5453_v21 }
 0x65f   :  { %7328 = vpow2.f32 %v5454_v32  ;;  %v1839_v32 = vld [vmem:[#allocation2 + $0x218] sm:$0xff] }
 0x660   :  { %7330 = vtanh.f32 %v1416_v42  ;;  %v6087_v42 = vpack.c.bf16 %v1841_v38, %v1837_v43  ;;  %v1868_v43 = vld [vmem:[#allocation2 + $0x300] sm:$0xff] }
 0x661   :  { %v1872_v38 = vld [vmem:[#allocation2 + $0x320] sm:$0xff] }
 0x667   :  { %v7325_v33 = vpop.eup %7324 }
 0x668   :  { %v7327_v30 = vpop.eup %7326  ;;  %v1427_v26 = vadd.f32 1.0, %v7325_v33  ;;  %v1843_v33 = vld [vmem:[#allocation2 + $0x238] sm:$0xff] }
 0x669   :  { %v1428_v9 = vadd.f32 1.0, %v7327_v30  ;;  %v7329_v45 = vpop.eup %7328  ;;  %v1836_v30 = vld [vmem:[#allocation2 + $0x200] sm:$0xff] }
 0x66a   :  { %7332 = vrcp.f32 %v1427_v26  ;;  %v7331_v46 = vpop.eup %7330  ;;  %v1429_v2 = vadd.f32 1.0, %v7329_v45  ;;  %v1840_v26 = vld [vmem:[#allocation2 + $0x220] sm:$0xff] }
 0x66b   :  { %7334 = vrcp.f32 %v1428_v9  ;;  %v6119_v9 = vpack.c.bf16 %v1843_v33, %v1839_v32  ;;  %v6089_v45 = vpack.c.bf16 %v1840_v26, %v1836_v30  ;;  %v1870_v33 = vld [vmem:[#allocation2 + $0x310] sm:$0xff] }
 0x66c   :  { %7336 = vrcp.f32 %v1429_v2  ;;  %v1847_v2 = vld [vmem:[#allocation2 + $0x258] sm:$0xff]  ;;  %v1874_v30 = vld [vmem:[#allocation2 + $0x330] sm:$0xff] }
 0x66d   :  { %v6137_v26 = vpack.c.bf16 %v1874_v30, %v1870_v33 }
 0x674   :  { %v7333_v54 = vpop.eup %7332 }
 0x675   :  { %v7335_v14 = vpop.eup %7334  ;;  %v1441_v60 = vmul.f32 %v7333_v54, %v7331_v46  ;;  %v1838_v46 = vld [vmem:[#allocation2 + $0x210] sm:$0xff] }
 0x676   :  { %v1440_v27 = vmul.f32 %v7335_v14, %v1438_v59  ;;  %v7337_v56 = vpop.eup %7336  ;;  %v1842_v54 = vld [vmem:[#allocation2 + $0x230] sm:$0xff]  ;;  %v1845_v14 = vld [vmem:[#allocation2 + $0x248] sm:$0xff] }
 0x677   :  { %v6121_v59 = vpack.c.bf16 %v1842_v54, %v1838_v46  ;;  %v1879_v46 = vld [vmem:[#allocation2 + $0x358] sm:$0xff] }
 0x678   :  { %v8129_v3 = vadd.f32 %v1441_v60, %v1440_v27  ;;  %v1849_v60 = vld [vmem:[#allocation2 + $0x268] sm:$0xff] }
 0x679   :  { %v6091_v27 = vpack.c.bf16 %v1849_v60, %v1845_v14  ;;  %v1876_v14 = vld [vmem:[#allocation2 + $0x340] sm:$0xff] }
 0x67a   :  { %7338 = vtanh.f32 %v8129_v3  ;;  %v1880_v60 = vld [vmem:[#allocation2 + $0x360] sm:$0xff] }
 0x684   :  { %v7339_v19 = vpop.eup %7338 }
 0x685   :  { %v1444_v15 = vmul.f32 %v7339_v19, %v7337_v56  ;;  %v1844_v56 = vld [vmem:[#allocation2 + $0x240] sm:$0xff] }
 0x686   :  { %v1848_v19 = vld [vmem:[#allocation2 + $0x260] sm:$0xff] }
 0x687   :  { %v1446_v20 = vrot.slane %v1444_v15, 5  ;;  %v8134_v21 = vsel %vm1829_vm4, %v8088_v47, %v1444_v15 }
 0x689   :  { %1513 = vmatmul.mubr.f32.vlgmr.msra.gmra.mrb[14].mxu0 %v1446_v20  ;;  %1584 = vmatmul.mubr.f32.vlgmr.msra.gmra.mrb[14].mxu1 %v1446_v20  ;;  %v6093_v20 = vpack.c.bf16 %v1848_v19, %v1844_v56  ;;  %v1882_v56 = vld [vmem:[#allocation2 + $0x370] sm:$0xff]  ;;  %v1885_v19 = vld [vmem:[#allocation2 + $0x388] sm:$0xff] }
 0x68a   :  { %6026 = vmatpush1.bf16.msra.mxu0 %v7739_v49  ;;  %6058 = vmatpush1.bf16.msra.mxu1 %v7742_v50 }
 0x68b   :  { %6028 = vmatprep.subr.bf16.mxu0 %v7744_v51  ;;  %6060 = vmatprep.subr.bf16.mxu1 %v7747_v55 }
 0x68c   :  { %1700 = vmatprep.mubr.f32.mxu0 %v7680_v0  ;;  %1771 = vmatprep.mubr.f32.mxu1 %v7680_v0 }
 0x68e   :  { %6030 = vmatpush1.bf16.msra.mxu0 %v7750_v61  ;;  %6062 = vmatpush1.bf16.msra.mxu1 %v7754_v62 }
 0x68f   :  { %6032 = vmatprep.subr.bf16.mxu0 %v7756_v63  ;;  %6064 = vmatprep.subr.bf16.mxu1 %v7759_v4 }
 0x692   :  { %6034 = vmatpush1.bf16.msra.mxu0 %v7764_v10  ;;  %6066 = vmatpush1.bf16.msra.mxu1 %v7768_v11 }
 0x693   :  { %6036 = vmatprep.subr.bf16.mxu0 %v7770_v12  ;;  %6068 = vmatprep.subr.bf16.mxu1 %v7773_v16 }
 0x696   :  { %6038 = vmatpush1.bf16.msra.mxu0 %v7776_v22  ;;  %6070 = vmatpush1.bf16.msra.mxu1 %v7780_v23 }
 0x697   :  { %6040 = vmatprep.subr.bf16.mxu0 %v7782_v24  ;;  %6072 = vmatprep.subr.bf16.mxu1 %v7785_v28 }
 0x69a   :  { %6042 = vmatpush1.bf16.msra.mxu0 %v7788_v34  ;;  %6074 = vmatpush1.bf16.msra.mxu1 %v7792_v35 }
 0x69b   :  { %6044 = vmatprep.subr.bf16.mxu0 %v7794_v36  ;;  %6076 = vmatprep.subr.bf16.mxu1 %v7797_v41 }
 0x69e   :  { %6046 = vmatpush1.bf16.msra.mxu0 %v7800_v48  ;;  %6078 = vmatpush1.bf16.msra.mxu1 %v7804_v52 }
 0x69f   :  { %6048 = vmatprep.subr.bf16.mxu0 %v7806_v53  ;;  %6080 = vmatprep.subr.bf16.mxu1 %v7809_v58  ;;  %v1626_v53 = vrot.slane %v8129_v3, 7  ;;  %v1851_v3 = vld [vmem:[#allocation2 + $0x278] sm:$0xff] }
 0x6a0   :  { %v6123_v15 = vpack.c.bf16 %v1851_v3, %v1847_v2  ;;  %v1878_v3 = vld [vmem:[#allocation2 + $0x350] sm:$0xff] }
 0x6a2   :  { %6050 = vmatpush1.bf16.msra.mxu0 %v7812_v5  ;;  %6082 = vmatpush1.bf16.msra.mxu1 %v7816_v6 }
 0x6a3   :  { %6052 = vmatprep.subr.bf16.mxu0 %v7818_v7  ;;  %6084 = vmatprep.subr.bf16.mxu1 %v7821_v13 }
 0x6a6   :  { %6054 = vmatpush1.bf16.msra.mxu0 %v7824_v17  ;;  %6086 = vmatpush1.bf16.msra.mxu1 %v7828_v18 }
 0x6a7   :  { %6088 = vmatprep.subr.bf16.mxu0 %v6087_v42  ;;  %6120 = vmatprep.subr.bf16.mxu1 %v6119_v9  ;;  %v6105_v42 = vpack.c.bf16 %v1872_v38, %v1868_v43  ;;  %v1877_v9 = vld [vmem:[#allocation2 + $0x348] sm:$0xff] }
 0x75c   :  { %v1514_v49 = vpop.f32.mrb[14].mxu0  ;;  %v1585_v50 = vpop.f32.mrb[14].mxu1 }
 0x75d   :  { %v1594_v51 = vrot.slane %v1514_v49, 2  ;;  %v1516_v55 = vpop.f32.mrb[15].mxu0  ;;  %v1587_v61 = vpop.f32.mrb[15].mxu1  ;;  %v1596_v22 = vrot.slane %v1585_v50, 2  ;;  %v1850_v49 = vld [vmem:[#allocation2 + $0x270] sm:$0xff] }
 0x75e   :  { %v1595_v62 = vrot.slane %v1516_v55, 2  ;;  %v1597_v12 = vrot.slane %v1587_v61, 2  ;;  %v1857_v55 = vld [vmem:[#allocation2 + $0x2a8] sm:$0xff]  ;;  %v1855_v61 = vld [vmem:[#allocation2 + $0x298] sm:$0xff] }
 0x75f   :  { %v1602_v63 = vadd.f32 %v1594_v51, %v7882_v39  ;;  %v1604_v24 = vadd.f32 %v1596_v22, %v7895_v8  ;;  %v1853_v51 = vld [vmem:[#allocation2 + $0x288] sm:$0xff]  ;;  %v1858_v22 = vld [vmem:[#allocation2 + $0x2b0] sm:$0xff] }
 0x760   :  { %v1603_v4 = vadd.f32 %v1595_v62, %v7884_v40  ;;  %v1605_v16 = vadd.f32 %v1597_v12, %v7891_v1  ;;  %v6095_v62 = vpack.c.bf16 %v1857_v55, %v1853_v51  ;;  %v1884_v55 = vld [vmem:[#allocation2 + $0x380] sm:$0xff] }
 0x761   :  { %v5455_v10 = vmul.f32 -1.442695, %v1602_v63  ;;  %v1859_v63 = vld [vmem:[#allocation2 + $0x2b8] sm:$0xff] }
 0x762   :  { %v5456_v11 = vmul.f32 -1.442695, %v1603_v4  ;;  %v5457_v23 = vmul.f32 -1.442695, %v1605_v16  ;;  %v1852_v4 = vld [vmem:[#allocation2 + $0x280] sm:$0xff]  ;;  %v1854_v16 = vld [vmem:[#allocation2 + $0x290] sm:$0xff] }
 0x763   :  { %7340 = vpow2.f32 %v5455_v10  ;;  %v1856_v10 = vld [vmem:[#allocation2 + $0x2a0] sm:$0xff] }
 0x764   :  { %7342 = vpow2.f32 %v5456_v11  ;;  %v6127_v11 = vpack.c.bf16 %v1859_v63, %v1855_v61  ;;  %v6097_v12 = vpack.c.bf16 %v1856_v10, %v1852_v4  ;;  %v1888_v61 = vld [vmem:[#allocation2 + $0x3a0] sm:$0xff]  ;;  %v1890_v4 = vld [vmem:[#allocation2 + $0x3b0] sm:$0xff]  ;;  %v1893_v10 = vld [vmem:[#allocation2 + $0x3c8] sm:$0xff] }
 0x765   :  { %7344 = vpow2.f32 %v5457_v23  ;;  %v6129_v23 = vpack.c.bf16 %v1858_v22, %v1854_v16  ;;  %v6113_v63 = vpack.c.bf16 %v1888_v61, %v1884_v55  ;;  %v1895_v22 = vld [vmem:[#allocation2 + $0x3d8] sm:$0xff]  ;;  %v1914_v61 = vld [vmem:[#allocation4 + $0x268] sm:$0xff] }
 0x766   :  { %7346 = vtanh.f32 %v1604_v24  ;;  %v1861_v24 = vld [vmem:[#allocation2 + $0x2c8] sm:$0xff] }
 0x76d   :  { %v7341_v28 = vpop.eup %7340 }
 0x76e   :  { %v7343_v34 = vpop.eup %7342  ;;  %v1615_v35 = vadd.f32 1.0, %v7341_v28  ;;  %v1865_v28 = vld [vmem:[#allocation2 + $0x2e8] sm:$0xff] }
 0x76f   :  { %v1616_v36 = vadd.f32 1.0, %v7343_v34  ;;  %v7345_v41 = vpop.eup %7344  ;;  %v1863_v34 = vld [vmem:[#allocation2 + $0x2d8] sm:$0xff] }
 0x770   :  { %7348 = vrcp.f32 %v1615_v35  ;;  %v7347_v48 = vpop.eup %7346  ;;  %v1617_v6 = vadd.f32 1.0, %v7345_v41  ;;  %v6099_v35 = vpack.c.bf16 %v1865_v28, %v1861_v24  ;;  %v1860_v41 = vld [vmem:[#allocation2 + $0x2c0] sm:$0xff] }
 0x771   :  { %7350 = vrcp.f32 %v1616_v36  ;;  %v1867_v36 = vld [vmem:[#allocation2 + $0x2f8] sm:$0xff]  ;;  %v1892_v24 = vld [vmem:[#allocation2 + $0x3c0] sm:$0xff] }
 0x772   :  { %7352 = vrcp.f32 %v1617_v6 }
 0x77a   :  { %v7349_v52 = vpop.eup %7348 }
 0x77b   :  { %v7351_v58 = vpop.eup %7350  ;;  %v1629_v5 = vmul.f32 %v7349_v52, %v7347_v48  ;;  %v1864_v48 = vld [vmem:[#allocation2 + $0x2e0] sm:$0xff]  ;;  %v6131_v52 = vpack.c.bf16 %v1867_v36, %v1863_v34  ;;  %v1898_v36 = vld [vmem:[#allocation2 + $0x3f0] sm:$0xff] }
 0x77c   :  { %v1628_v7 = vmul.f32 %v7351_v58, %v1626_v53  ;;  %v7353_v17 = vpop.eup %7352  ;;  %v6101_v53 = vpack.c.bf16 %v1864_v48, %v1860_v41  ;;  %v1862_v58 = vld [vmem:[#allocation2 + $0x2d0] sm:$0xff]  ;;  %v1896_v34 = vld [vmem:[#allocation2 + $0x3e0] sm:$0xff]  ;;  %v1902_v48 = vld [vmem:[#allocation4 + $0x208] sm:$0xff] }
 0x77d   :  { %v6117_v41 = vpack.c.bf16 %v1896_v34, %v1892_v24  ;;  %v1911_v24 = vld [vmem:[#allocation4 + $0x250] sm:$0xff]  ;;  %v1918_v34 = vld [vmem:[#allocation4 + $0x288] sm:$0xff] }
 0x77e   :  { %v8173_v13 = vadd.f32 %v1629_v5, %v1628_v7  ;;  %v1866_v5 = vld [vmem:[#allocation2 + $0x2f0] sm:$0xff]  ;;  %v1869_v7 = vld [vmem:[#allocation2 + $0x308] sm:$0xff] }
 0x77f   :  { %v6133_v6 = vpack.c.bf16 %v1866_v5, %v1862_v58 }
 0x780   :  { %7354 = vtanh.f32 %v8173_v13 }
 0x78a   :  { %v7355_v18 = vpop.eup %7354 }
 0x78b   :  { %v1632_v44 = vmul.f32 %v7355_v18, %v7353_v17  ;;  %v1873_v17 = vld [vmem:[#allocation2 + $0x328] sm:$0xff]  ;;  %v1871_v18 = vld [vmem:[#allocation2 + $0x318] sm:$0xff] }
 0x78d   :  { %v1634_v47 = vrot.slane %v1632_v44, 6  ;;  %v8178_v25 = vsel %vm1831_vm5, %v8134_v21, %v1632_v44  ;;  %v1846_v21 = vld [vmem:[#allocation2 + $0x250] sm:$0xff]  ;;  %v6103_v44 = vpack.c.bf16 %v1873_v17, %v1869_v7 }
 0x78e   :  { %v6125_v50 = vpack.c.bf16 %v1850_v49, %v1846_v21  ;;  %v1887_v21 = vld [vmem:[#allocation2 + $0x398] sm:$0xff] }
 0x78f   :  { %1701 = vmatmul.mubr.f32.vlgmr.msra.gmra.mrb[16].mxu0 %v1634_v47  ;;  %1772 = vmatmul.mubr.f32.vlgmr.msra.gmra.mrb[16].mxu1 %v1634_v47  ;;  %v1875_v47 = vld [vmem:[#allocation2 + $0x338] sm:$0xff] }
 0x790   :  { %2052 = vmatprep.mubr.f32.mxu0 %v7680_v0  ;;  %2123 = vmatprep.mubr.f32.mxu1 %v7680_v0  ;;  %v6135_v32 = vpack.c.bf16 %v1875_v47, %v1871_v18  ;;  %v1891_v49 = vld [vmem:[#allocation2 + $0x3b8] sm:$0xff] }
 0x791   :  { %6090 = vmatpush1.bf16.msra.mxu0 %v6089_v45  ;;  %6122 = vmatpush1.bf16.msra.mxu1 %v6121_v59  ;;  %v1881_v45 = vld [vmem:[#allocation2 + $0x368] sm:$0xff]  ;;  %v1883_v59 = vld [vmem:[#allocation2 + $0x378] sm:$0xff]  ;;  %v6143_v51 = vpack.c.bf16 %v1891_v49, %v1887_v21  ;;  %v1905_v21 = vld [vmem:[#allocation4 + $0x220] sm:$0xff] }
 0x792   :  { %6092 = vmatprep.subr.bf16.mxu0 %v6091_v27  ;;  %6124 = vmatprep.subr.bf16.mxu1 %v6123_v15  ;;  %v6107_v54 = vpack.c.bf16 %v1881_v45, %v1877_v9  ;;  %v6139_v2 = vpack.c.bf16 %v1883_v59, %v1879_v46  ;;  %v6109_v27 = vpack.c.bf16 %v1880_v60, %v1876_v14  ;;  %v1903_v49 = vld [vmem:[#allocation4 + $0x210] sm:$0xff] }
 0x793   :  { %v6141_v15 = vpack.c.bf16 %v1882_v56, %v1878_v3  ;;  %v1814_v3 = vrot.slane %v8173_v13, 7 }
 0x795   :  { %6094 = vmatpush1.bf16.msra.mxu0 %v6093_v20  ;;  %6126 = vmatpush1.bf16.msra.mxu1 %v6125_v50  ;;  %v1889_v20 = vld [vmem:[#allocation2 + $0x3a8] sm:$0xff] }
 0x796   :  { %6096 = vmatprep.subr.bf16.mxu0 %v6095_v62  ;;  %6128 = vmatprep.subr.bf16.mxu1 %v6127_v11  ;;  %v6111_v50 = vpack.c.bf16 %v1889_v20, %v1885_v19  ;;  %v1886_v62 = vld [vmem:[#allocation2 + $0x390] sm:$0xff]  ;;  %v1897_v11 = vld [vmem:[#allocation2 + $0x3e8] sm:$0xff] }
 0x797   :  { %v6115_v16 = vpack.c.bf16 %v1897_v11, %v1893_v10 }
 0x799   :  { %6098 = vmatpush1.bf16.msra.mxu0 %v6097_v12  ;;  %6130 = vmatpush1.bf16.msra.mxu1 %v6129_v23  ;;  %v6145_v12 = vpack.c.bf16 %v1890_v4, %v1886_v62  ;;  %v1899_v23 = vld [vmem:[#allocation2 + $0x3f8] sm:$0xff] }
 0x79a   :  { %6100 = vmatprep.subr.bf16.mxu0 %v6099_v35  ;;  %6132 = vmatprep.subr.bf16.mxu1 %v6131_v52  ;;  %v6147_v28 = vpack.c.bf16 %v1899_v23, %v1895_v22  ;;  %v1894_v35 = vld [vmem:[#allocation2 + $0x3d0] sm:$0xff]  ;;  %v1906_v52 = vld [vmem:[#allocation4 + $0x228] sm:$0xff]  ;;  %v1912_v62 = vld [vmem:[#allocation4 + $0x258] sm:$0xff] }
 0x79b   :  { %v6149_v58 = vpack.c.bf16 %v1898_v36, %v1894_v35  ;;  %v8182_v5 = vpack.c.bf16 %v1906_v52, %v1902_v48  ;;  %v1922_v36 = vld [vmem:[#allocation4 + $0x2a8] sm:$0xff]  ;;  %v1924_v48 = vld [vmem:[#allocation4 + $0x2b8] sm:$0xff] }
 0x79d   :  { %6102 = vmatpush1.bf16.msra.mxu0 %v6101_v53  ;;  %6134 = vmatpush1.bf16.msra.mxu1 %v6133_v6  ;;  %v1904_v53 = vld [vmem:[#allocation4 + $0x218] sm:$0xff] }
 0x79e   :  { %6104 = vmatprep.subr.bf16.mxu0 %v6103_v44  ;;  %6136 = vmatprep.subr.bf16.mxu1 %v6135_v32  ;;  %v1908_v6 = vld [vmem:[#allocation4 + $0x238] sm:$0xff] }
 0x79f   :  { %v8184_v7 = vpack.c.bf16 %v1908_v6, %v1904_v53  ;;  %v1921_v6 = vld [vmem:[#allocation4 + $0x2a0] sm:$0xff] }
 0x7a1   :  { %6106 = vmatpush1.bf16.msra.mxu0 %v6105_v42  ;;  %6138 = vmatpush1.bf16.msra.mxu1 %v6137_v26 }
 0x7a2   :  { %6108 = vmatprep.subr.bf16.mxu0 %v6107_v54  ;;  %6140 = vmatprep.subr.bf16.mxu1 %v6139_v2 }
 0x7a5   :  { %6110 = vmatpush1.bf16.msra.mxu0 %v6109_v27  ;;  %6142 = vmatpush1.bf16.msra.mxu1 %v6141_v15 }
 0x7a6   :  { %6112 = vmatprep.subr.bf16.mxu0 %v6111_v50  ;;  %6144 = vmatprep.subr.bf16.mxu1 %v6143_v51  ;;  %v1907_v50 = vld [vmem:[#allocation4 + $0x230] sm:$0xff]  ;;  %v1910_v51 = vld [vmem:[#allocation4 + $0x248] sm:$0xff] }
 0x7a7   :  { %v8200_v11 = vpack.c.bf16 %v1907_v50, %v1903_v49  ;;  %v8202_v22 = vpack.c.bf16 %v1914_v61, %v1910_v51  ;;  %v1944_v49 = vld [vmem:[#allocation4 + $0x358] sm:$0xff]  ;;  %v1941_v61 = vld [vmem:[#allocation4 + $0x340] sm:$0xff] }
 0x7a8   :  { %v1948_v50 = vld [vmem:[#allocation4 + $0x378] sm:$0xff] }
 0x7a9   :  { %6114 = vmatpush1.bf16.msra.mxu0 %v6113_v63  ;;  %6146 = vmatpush1.bf16.msra.mxu1 %v6145_v12  ;;  %v1916_v63 = vld [vmem:[#allocation4 + $0x278] sm:$0xff]  ;;  %v1909_v12 = vld [vmem:[#allocation4 + $0x240] sm:$0xff] }
 0x7aa   :  { %6116 = vmatprep.subr.bf16.mxu0 %v6115_v16  ;;  %6148 = vmatprep.subr.bf16.mxu1 %v6147_v28  ;;  %v1913_v16 = vld [vmem:[#allocation4 + $0x260] sm:$0xff]  ;;  %v8204_v23 = vpack.c.bf16 %v1916_v63, %v1912_v62  ;;  %v1915_v28 = vld [vmem:[#allocation4 + $0x270] sm:$0xff] }
 0x7ab   :  { %v8211_v52 = vpack.c.bf16 %v1913_v16, %v1909_v12  ;;  %v8213_v53 = vpack.c.bf16 %v1915_v28, %v1911_v24  ;;  %v1945_v62 = vld [vmem:[#allocation4 + $0x360] sm:$0xff]  ;;  %v1943_v12 = vld [vmem:[#allocation4 + $0x350] sm:$0xff]  ;;  %v1950_v24 = vld [vmem:[#allocation4 + $0x388] sm:$0xff] }
 0x7ac   :  { %v1947_v16 = vld [vmem:[#allocation4 + $0x370] sm:$0xff]  ;;  %v1954_v28 = vld [vmem:[#allocation4 + $0x3a8] sm:$0xff] }
 0x7ad   :  { %6118 = vmatpush1.bf16.msra.mxu0 %v6117_v41  ;;  %6150 = vmatpush1.bf16.msra.mxu1 %v6149_v58  ;;  %v1920_v41 = vld [vmem:[#allocation4 + $0x298] sm:$0xff]  ;;  %v1917_v58 = vld [vmem:[#allocation4 + $0x280] sm:$0xff] }
 0x7ae   :  { %6152 = vmatprep.subr.bf16.mxu0 %v8182_v5  ;;  %6184 = vmatprep.subr.bf16.mxu1 %v8184_v7 }
 0x862   :  { %v1702_v17 = vpop.f32.mrb[16].mxu0  ;;  %v1773_v18 = vpop.f32.mrb[16].mxu1 }
 0x863   :  { %v1782_v44 = vrot.slane %v1702_v17, 1  ;;  %v1704_v47 = vpop.f32.mrb[17].mxu0  ;;  %v1775_v43 = vpop.f32.mrb[17].mxu1  ;;  %v1784_v45 = vrot.slane %v1773_v18, 1  ;;  %v8219_v17 = vpack.c.bf16 %v1924_v48, %v1920_v41  ;;  %v1919_v18 = vld [vmem:[#allocation4 + $0x290] sm:$0xff]  ;;  %v8263_v41 = vpack.c.bf16 %v1947_v16, %v1943_v12  ;;  %v1949_v48 = vld [vmem:[#allocation4 + $0x380] sm:$0xff] }
 0x864   :  { %v1783_v38 = vrot.slane %v1704_v47, 1  ;;  %v1785_v26 = vrot.slane %v1775_v43, 1  ;;  %v1926_v47 = vld [vmem:[#allocation4 + $0x2c8] sm:$0xff] }
 0x865   :  { %v1790_v32 = vadd.f32 %v1782_v44, %v7882_v39  ;;  %v1792_v54 = vadd.f32 %v1784_v45, %v7895_v8  ;;  %v1901_v8 = vld [vmem:[#allocation4 + $0x200] sm:$0xff]  ;;  %v1923_v44 = vld [vmem:[#allocation4 + $0x2b0] sm:$0xff]  ;;  %v1930_v43 = vld [vmem:[#allocation4 + $0x2e8] sm:$0xff] }
 0x866   :  { %v1791_v42 = vadd.f32 %v1783_v38, %v7884_v40  ;;  %v1793_v9 = vadd.f32 %v1785_v26, %v7891_v1  ;;  %v8198_v10 = vpack.c.bf16 %v1905_v21, %v1901_v8  ;;  %v1928_v38 = vld [vmem:[#allocation4 + $0x2d8] sm:$0xff]  ;;  %v1929_v26 = vld [vmem:[#allocation4 + $0x2e0] sm:$0xff]  ;;  %v1942_v8 = vld [vmem:[#allocation4 + $0x348] sm:$0xff] }
 0x867   :  { %v5458_v33 = vmul.f32 -1.442695, %v1790_v32  ;;  %v1932_v32 = vld [vmem:[#allocation4 + $0x2f8] sm:$0xff]  ;;  %v1946_v21 = vld [vmem:[#allocation4 + $0x368] sm:$0xff] }
 0x868   :  { %v5459_v30 = vmul.f32 -1.442695, %v1791_v42  ;;  %v5460_v46 = vmul.f32 -1.442695, %v1793_v9  ;;  %v8225_v42 = vpack.c.bf16 %v1921_v6, %v1917_v58  ;;  %v8231_v9 = vpack.c.bf16 %v1930_v43, %v1926_v47  ;;  %v1953_v58 = vld [vmem:[#allocation4 + $0x3a0] sm:$0xff]  ;;  %v1955_v47 = vld [vmem:[#allocation4 + $0x3b0] sm:$0xff] }
 0x869   :  { %7356 = vpow2.f32 %v5458_v33  ;;  %v8227_v33 = vpack.c.bf16 %v1923_v44, %v1919_v18  ;;  %v8233_v45 = vpack.c.bf16 %v1932_v32, %v1928_v38  ;;  %v8255_v63 = vpack.c.bf16 %v1946_v21, %v1942_v8  ;;  %v1951_v44 = vld [vmem:[#allocation4 + $0x390] sm:$0xff]  ;;  %v1958_v43 = vld [vmem:[#allocation4 + $0x3c8] sm:$0xff]  ;;  %v1960_v32 = vld [vmem:[#allocation4 + $0x3d8] sm:$0xff] }
 0x86a   :  { %7358 = vpow2.f32 %v5459_v30  ;;  %v1925_v30 = vld [vmem:[#allocation4 + $0x2c0] sm:$0xff]  ;;  %v8267_v6 = vpack.c.bf16 %v1954_v28, %v1950_v24  ;;  %v1962_v38 = vld [vmem:[#allocation4 + $0x3e8] sm:$0xff] }
 0x86b   :  { %7360 = vpow2.f32 %v5460_v46  ;;  %v1927_v46 = vld [vmem:[#allocation4 + $0x2d0] sm:$0xff] }
 0x86c   :  { %7362 = vtanh.f32 %v1792_v54  ;;  %v1931_v54 = vld [vmem:[#allocation4 + $0x2f0] sm:$0xff] }
 0x873   :  { %v7357_v59 = vpop.eup %7356 }
 0x874   :  { %v7359_v14 = vpop.eup %7358  ;;  %v1803_v60 = vadd.f32 1.0, %v7357_v59  ;;  %v1934_v59 = vld [vmem:[#allocation4 + $0x308] sm:$0xff] }
 0x875   :  { %v1804_v2 = vadd.f32 1.0, %v7359_v14  ;;  %v7361_v39 = vpop.eup %7360  ;;  %v1938_v14 = vld [vmem:[#allocation4 + $0x328] sm:$0xff] }
 0x876   :  { %7364 = vrcp.f32 %v1803_v60  ;;  %v7363_v40 = vpop.eup %7362  ;;  %v1805_v1 = vadd.f32 1.0, %v7361_v39  ;;  %v1936_v60 = vld [vmem:[#allocation4 + $0x318] sm:$0xff]  ;;  %v8237_v39 = vpack.c.bf16 %v1929_v26, %v1925_v30  ;;  %v8273_v26 = vpack.c.bf16 %v1953_v58, %v1949_v48 }
 0x877   :  { %7366 = vrcp.f32 %v1804_v2  ;;  %v1940_v2 = vld [vmem:[#allocation4 + $0x338] sm:$0xff] }
 0x878   :  { %7368 = vrcp.f32 %v1805_v1  ;;  %v1935_v1 = vld [vmem:[#allocation4 + $0x310] sm:$0xff]  ;;  %v1964_v30 = vld [vmem:[#allocation4 + $0x3f8] sm:$0xff] }
 0x880   :  { %v7365_v27 = vpop.eup %7364 }
 0x881   :  { %v7367_v56 = vpop.eup %7366  ;;  %v1817_v19 = vmul.f32 %v7365_v27, %v7363_v40  ;;  %v8239_v40 = vpack.c.bf16 %v1931_v54, %v1927_v46  ;;  %v1933_v27 = vld [vmem:[#allocation4 + $0x300] sm:$0xff]  ;;  %v8275_v46 = vpack.c.bf16 %v1955_v47, %v1951_v44 }
 0x882   :  { %v1816_v15 = vmul.f32 %v7367_v56, %v1814_v3  ;;  %v7369_v55 = vpop.eup %7368  ;;  %v1937_v3 = vld [vmem:[#allocation4 + $0x320] sm:$0xff]  ;;  %v8243_v56 = vpack.c.bf16 %v1938_v14, %v1934_v59  ;;  %v8279_v59 = vpack.c.bf16 %v1962_v38, %v1958_v43  ;;  %v8281_v14 = vpack.c.bf16 %v1964_v30, %v1960_v32 }
 0x883   :  { %v8249_v51 = vpack.c.bf16 %v1937_v3, %v1933_v27  ;;  %v1957_v54 = vld [vmem:[#allocation4 + $0x3c0] sm:$0xff]  ;;  %v1963_v27 = vld [vmem:[#allocation4 + $0x3f0] sm:$0xff] }
 0x884   :  { %v8193_v20 = vadd.f32 %v1817_v19, %v1816_v15  ;;  %v8245_v19 = vpack.c.bf16 %v1940_v2, %v1936_v60  ;;  %v1939_v15 = vld [vmem:[#allocation4 + $0x330] sm:$0xff]  ;;  %v1961_v60 = vld [vmem:[#allocation4 + $0x3e0] sm:$0xff] }
 0x885   :  { %v1959_v2 = vld [vmem:[#allocation4 + $0x3d0] sm:$0xff]  ;;  %v8285_v3 = vpack.c.bf16 %v1961_v60, %v1957_v54 }
 0x886   :  { %7370 = vtanh.f32 %v8193_v20 }
 0x890   :  { %v7371_v4 = vpop.eup %7370 }
 0x891   :  { %v8196_v13 = vmul.f32 %v7371_v4, %v7369_v55  ;;  %v8251_v55 = vpack.c.bf16 %v1939_v15, %v1935_v1  ;;  %v8257_v4 = vpack.c.bf16 %v1948_v50, %v1944_v49  ;;  %v8287_v1 = vpack.c.bf16 %v1963_v27, %v1959_v2  ;;  %v5461_v50 = vld [vmem:[%s9102_s3 + $0x4] sm:$0xf] }
 0x892   :  { %v1983_v58 = vrot.slane %v5461_v50, %v7880_v37  ;;  %v1979_v32 = vrot.slane %v5461_v50, %v7889_v57 }
 0x893   :  { %v1834_v35 = vsel %vm1833_vm6, %v8178_v25, %v8196_v13  ;;  %v8217_v25 = vpack.c.bf16 %v1922_v36, %v1918_v34  ;;  %v1952_v34 = vld [vmem:[#allocation4 + $0x398] sm:$0xff]  ;;  %v8261_v36 = vpack.c.bf16 %v1945_v62, %v1941_v61  ;;  %v1971_v61 = vrot.slane %v5461_v50, %v7871_v29 }
 0x894   :  { %2053 = vmatmul.mubr.f32.vlgmr.msra.gmra.mrb[18].mxu0 %v1834_v35  ;;  %2124 = vmatmul.mubr.f32.vlgmr.msra.gmra.mrb[18].mxu1 %v1834_v35  ;;  %v1956_v35 = vld [vmem:[#allocation4 + $0x3b8] sm:$0xff]  ;;  %v1975_v62 = vrot.slane %v5461_v50, %v7876_v31 }
 0x895   :  { %6154 = vmatpush1.bf16.msra.mxu0 %v8198_v10  ;;  %6186 = vmatpush1.bf16.msra.mxu1 %v8200_v11  ;;  %v8269_v18 = vpack.c.bf16 %v1956_v35, %v1952_v34 }
 0x896   :  { %6156 = vmatprep.subr.bf16.mxu0 %v8202_v22  ;;  %6188 = vmatprep.subr.bf16.mxu1 %v8204_v23 }
 0x897   :  { %2194 = vmatprep.mubr.f32.mxu0 %v7680_v0  ;;  %2265 = vmatprep.mubr.f32.mxu1 %v7680_v0 }
 0x899   :  { %6158 = vmatpush1.bf16.msra.mxu0 %v8211_v52  ;;  %6190 = vmatpush1.bf16.msra.mxu1 %v8213_v53 }
 0x89a   :  { %6160 = vmatprep.subr.bf16.mxu0 %v8217_v25  ;;  %6192 = vmatprep.subr.bf16.mxu1 %v8219_v17 }
 0x89d   :  { %6162 = vmatpush1.bf16.msra.mxu0 %v8225_v42  ;;  %6194 = vmatpush1.bf16.msra.mxu1 %v8227_v33 }
 0x89e   :  { %6164 = vmatprep.subr.bf16.mxu0 %v8231_v9  ;;  %6196 = vmatprep.subr.bf16.mxu1 %v8233_v45 }
 0x8a1   :  { %6166 = vmatpush1.bf16.msra.mxu0 %v8237_v39  ;;  %6198 = vmatpush1.bf16.msra.mxu1 %v8239_v40 }
 0x8a2   :  { %6168 = vmatprep.subr.bf16.mxu0 %v8243_v56  ;;  %6200 = vmatprep.subr.bf16.mxu1 %v8245_v19 }
 0x8a5   :  { %6170 = vmatpush1.bf16.msra.mxu0 %v8249_v51  ;;  %6202 = vmatpush1.bf16.msra.mxu1 %v8251_v55 }
 0x8a6   :  { %6172 = vmatprep.subr.bf16.mxu0 %v8255_v63  ;;  %6204 = vmatprep.subr.bf16.mxu1 %v8257_v4 }
 0x8a9   :  { %6174 = vmatpush1.bf16.msra.mxu0 %v8261_v36  ;;  %6206 = vmatpush1.bf16.msra.mxu1 %v8263_v41 }
 0x8aa   :  { %6176 = vmatprep.subr.bf16.mxu0 %v8267_v6  ;;  %6208 = vmatprep.subr.bf16.mxu1 %v8269_v18 }
 0x8ad   :  { %6178 = vmatpush1.bf16.msra.mxu0 %v8273_v26  ;;  %6210 = vmatpush1.bf16.msra.mxu1 %v8275_v46 }
 0x8ae   :  { %6180 = vmatprep.subr.bf16.mxu0 %v8279_v59  ;;  %6212 = vmatprep.subr.bf16.mxu1 %v8281_v14 }
 0x8b1   :  { %6182 = vmatpush1.bf16.msra.mxu0 %v8285_v3  ;;  %6214 = vmatpush1.bf16.msra.mxu1 %v8287_v1 }
 0x8b2   :  { %6216 = vmatprep.subr.bf16.mxu0 %v8182_v5  ;;  %6248 = vmatprep.subr.bf16.mxu1 %v8184_v7 }
 0x8b4   :  { %2195 = vmatmul.mubr.f32.vlgmr.msra.gmra.mrb[20].mxu0 %v7680_v0  ;;  %2266 = vmatmul.mubr.f32.vlgmr.msra.gmra.mrb[20].mxu1 %v7680_v0 }
 0x8b5   :  { %6218 = vmatpush1.bf16.msra.mxu0 %v8198_v10  ;;  %6250 = vmatpush1.bf16.msra.mxu1 %v8200_v11 }
 0x8b6   :  { %6220 = vmatprep.subr.bf16.mxu0 %v8202_v22  ;;  %6252 = vmatprep.subr.bf16.mxu1 %v8204_v23 }
 0x8b7   :  { %2364 = vmatprep.mubr.f32.mxu0 %v7680_v0  ;;  %2435 = vmatprep.mubr.f32.mxu1 %v7680_v0 }
 0x8b9   :  { %6222 = vmatpush1.bf16.msra.mxu0 %v8211_v52  ;;  %6254 = vmatpush1.bf16.msra.mxu1 %v8213_v53 }
 0x8ba   :  { %6224 = vmatprep.subr.bf16.mxu0 %v8217_v25  ;;  %6256 = vmatprep.subr.bf16.mxu1 %v8219_v17 }
 0x8bd   :  { %6226 = vmatpush1.bf16.msra.mxu0 %v8225_v42  ;;  %6258 = vmatpush1.bf16.msra.mxu1 %v8227_v33 }
 0x8be   :  { %6228 = vmatprep.subr.bf16.mxu0 %v8231_v9  ;;  %6260 = vmatprep.subr.bf16.mxu1 %v8233_v45 }
 0x8c1   :  { %6230 = vmatpush1.bf16.msra.mxu0 %v8237_v39  ;;  %6262 = vmatpush1.bf16.msra.mxu1 %v8239_v40 }
 0x8c2   :  { %6232 = vmatprep.subr.bf16.mxu0 %v8243_v56  ;;  %6264 = vmatprep.subr.bf16.mxu1 %v8245_v19 }
 0x8c5   :  { %6234 = vmatpush1.bf16.msra.mxu0 %v8249_v51  ;;  %6266 = vmatpush1.bf16.msra.mxu1 %v8251_v55 }
 0x8c6   :  { %6236 = vmatprep.subr.bf16.mxu0 %v8255_v63  ;;  %6268 = vmatprep.subr.bf16.mxu1 %v8257_v4 }
 0x8c9   :  { %6238 = vmatpush1.bf16.msra.mxu0 %v8261_v36  ;;  %6270 = vmatpush1.bf16.msra.mxu1 %v8263_v41 }
 0x8ca   :  { %6240 = vmatprep.subr.bf16.mxu0 %v8267_v6  ;;  %6272 = vmatprep.subr.bf16.mxu1 %v8269_v18 }
 0x8cd   :  { %6242 = vmatpush1.bf16.msra.mxu0 %v8273_v26  ;;  %6274 = vmatpush1.bf16.msra.mxu1 %v8275_v46 }
 0x8ce   :  { %6244 = vmatprep.subr.bf16.mxu0 %v8279_v59  ;;  %6276 = vmatprep.subr.bf16.mxu1 %v8281_v14 }
 0x8d1   :  { %6246 = vmatpush1.bf16.msra.mxu0 %v8285_v3  ;;  %6278 = vmatpush1.bf16.msra.mxu1 %v8287_v1 }
 0x8d2   :  { %6280 = vmatprep.subr.bf16.mxu0 %v8182_v5  ;;  %6312 = vmatprep.subr.bf16.mxu1 %v8184_v7 }
 0x967   :  { %v2054_v15 = vpop.f32.mrb[18].mxu0  ;;  %v2125_v8 = vpop.f32.mrb[18].mxu1 }
 0x968   :  { %v2056_v21 = vpop.f32.mrb[19].mxu0  ;;  %v2127_v49 = vpop.f32.mrb[19].mxu1  ;;  %v8336_v12 = vadd.f32 %v2054_v15, %v1971_v61  ;;  %v8347_v54 = vadd.f32 %v2125_v8, %v1979_v32 }
 0x969   :  { %v8338_v16 = vadd.f32 %v2056_v21, %v1975_v62  ;;  %v8343_v38 = vadd.f32 %v2127_v49, %v1983_v58 }
 0x987   :  { %v2196_v24 = vpop.f32.mrb[20].mxu0  ;;  %v2267_v28 = vpop.f32.mrb[20].mxu1 }
 0x988   :  { %v2272_v34 = vadd.f32 %v2196_v24, %v8336_v12  ;;  %v2198_v35 = vpop.f32.mrb[21].mxu0  ;;  %v2269_v48 = vpop.f32.mrb[21].mxu1  ;;  %v2274_v2 = vadd.f32 %v2267_v28, %v8347_v54 }
 0x989   :  { %v2273_v44 = vadd.f32 %v2198_v35, %v8338_v16  ;;  %v2275_v30 = vadd.f32 %v2269_v48, %v8343_v38 }
 0x98a   :  { %v5462_v47 = vmul.f32 -1.442695, %v2272_v34 }
 0x98b   :  { %v5463_v43 = vmul.f32 -1.442695, %v2273_v44  ;;  %v5464_v60 = vmul.f32 -1.442695, %v2275_v30 }
 0x98c   :  { %7372 = vpow2.f32 %v5462_v47 }
 0x98d   :  { %7374 = vpow2.f32 %v5463_v43 }
 0x98e   :  { %7376 = vpow2.f32 %v5464_v60 }
 0x98f   :  { %7378 = vtanh.f32 %v2274_v2 }
 0x996   :  { %v7373_v27 = vpop.eup %7372 }
 0x997   :  { %v7375_v15 = vpop.eup %7374  ;;  %v2285_v21 = vadd.f32 1.0, %v7373_v27 }
 0x998   :  { %v2286_v61 = vadd.f32 1.0, %v7375_v15  ;;  %v7377_v49 = vpop.eup %7376 }
 0x999   :  { %7380 = vrcp.f32 %v2285_v21  ;;  %v7379_v62 = vpop.eup %7378  ;;  %v2287_v35 = vadd.f32 1.0, %v7377_v49 }
 0x99a   :  { %7382 = vrcp.f32 %v2286_v61 }
 0x99b   :  { %7384 = vrcp.f32 %v2287_v35 }
 0x9a3   :  { %v7381_v24 = vpop.eup %7380 }
 0x9a4   :  { %v7383_v34 = vpop.eup %7382  ;;  %v2296_v50 = vmul.f32 %v7381_v24, %v7379_v62 }
 0x9a5   :  { %v2295_v48 = vmul.f32 0.0, %v7383_v34  ;;  %v7385_v28 = vpop.eup %7384 }
 0x9a7   :  { %v8350_v8 = vadd.f32 %v2296_v50, %v2295_v48 }
 0x9a9   :  { %7386 = vtanh.f32 %v8350_v8 }
 0x9b3   :  { %v7387_v58 = vpop.eup %7386 }
 0x9b4   :  { %v8353_v44 = vmul.f32 %v7387_v58, %v7385_v28 }
 0x9b6   :  { %2365 = vmatmul.mubr.f32.vlgmr.msra.gmra.mrb[22].mxu0 %v8353_v44  ;;  %2436 = vmatmul.mubr.f32.vlgmr.msra.gmra.mrb[22].mxu1 %v8353_v44 }
 0x9b7   :  { %6282 = vmatpush1.bf16.msra.mxu0 %v8198_v10  ;;  %6314 = vmatpush1.bf16.msra.mxu1 %v8200_v11 }
 0x9b8   :  { %6284 = vmatprep.subr.bf16.mxu0 %v8202_v22  ;;  %6316 = vmatprep.subr.bf16.mxu1 %v8204_v23 }
 0x9b9   :  { %2552 = vmatprep.mubr.f32.mxu0 %v7680_v0  ;;  %2623 = vmatprep.mubr.f32.mxu1 %v7680_v0 }
 0x9bb   :  { %6286 = vmatpush1.bf16.msra.mxu0 %v8211_v52  ;;  %6318 = vmatpush1.bf16.msra.mxu1 %v8213_v53 }
 0x9bc   :  { %6288 = vmatprep.subr.bf16.mxu0 %v8217_v25  ;;  %6320 = vmatprep.subr.bf16.mxu1 %v8219_v17 }
 0x9bf   :  { %6290 = vmatpush1.bf16.msra.mxu0 %v8225_v42  ;;  %6322 = vmatpush1.bf16.msra.mxu1 %v8227_v33 }
 0x9c0   :  { %6292 = vmatprep.subr.bf16.mxu0 %v8231_v9  ;;  %6324 = vmatprep.subr.bf16.mxu1 %v8233_v45 }
 0x9c3   :  { %6294 = vmatpush1.bf16.msra.mxu0 %v8237_v39  ;;  %6326 = vmatpush1.bf16.msra.mxu1 %v8239_v40 }
 0x9c4   :  { %6296 = vmatprep.subr.bf16.mxu0 %v8243_v56  ;;  %6328 = vmatprep.subr.bf16.mxu1 %v8245_v19 }
 0x9c7   :  { %6298 = vmatpush1.bf16.msra.mxu0 %v8249_v51  ;;  %6330 = vmatpush1.bf16.msra.mxu1 %v8251_v55 }
 0x9c8   :  { %6300 = vmatprep.subr.bf16.mxu0 %v8255_v63  ;;  %6332 = vmatprep.subr.bf16.mxu1 %v8257_v4 }
 0x9cb   :  { %6302 = vmatpush1.bf16.msra.mxu0 %v8261_v36  ;;  %6334 = vmatpush1.bf16.msra.mxu1 %v8263_v41 }
 0x9cc   :  { %6304 = vmatprep.subr.bf16.mxu0 %v8267_v6  ;;  %6336 = vmatprep.subr.bf16.mxu1 %v8269_v18 }
 0x9cf   :  { %6306 = vmatpush1.bf16.msra.mxu0 %v8273_v26  ;;  %6338 = vmatpush1.bf16.msra.mxu1 %v8275_v46 }
 0x9d0   :  { %6308 = vmatprep.subr.bf16.mxu0 %v8279_v59  ;;  %6340 = vmatprep.subr.bf16.mxu1 %v8281_v14 }
 0x9d3   :  { %6310 = vmatpush1.bf16.msra.mxu0 %v8285_v3  ;;  %6342 = vmatpush1.bf16.msra.mxu1 %v8287_v1 }
 0x9d4   :  { %6344 = vmatprep.subr.bf16.mxu0 %v8182_v5  ;;  %6376 = vmatprep.subr.bf16.mxu1 %v8184_v7 }
 0xa89   :  { %v2366_v47 = vpop.f32.mrb[22].mxu0  ;;  %v2437_v43 = vpop.f32.mrb[22].mxu1 }
 0xa8a   :  { %v2446_v32 = vrot.slane %v2366_v47, 7  ;;  %v2368_v30 = vpop.f32.mrb[23].mxu0  ;;  %v2439_v60 = vpop.f32.mrb[23].mxu1  ;;  %v2448_v24 = vrot.slane %v2437_v43, 7 }
 0xa8b   :  { %v2447_v2 = vrot.slane %v2368_v30, 7  ;;  %v2449_v49 = vrot.slane %v2439_v60, 7  ;;  %v2478_v60 = vrot.slane %v8350_v8, 7 }
 0xa8c   :  { %v2454_v27 = vadd.f32 %v2446_v32, %v8336_v12  ;;  %v2456_v50 = vadd.f32 %v2448_v24, %v8347_v54 }
 0xa8d   :  { %v2455_v15 = vadd.f32 %v2447_v2, %v8338_v16  ;;  %v2457_v62 = vadd.f32 %v2449_v49, %v8343_v38 }
 0xa8e   :  { %v5465_v21 = vmul.f32 -1.442695, %v2454_v27 }
 0xa8f   :  { %v5466_v61 = vmul.f32 -1.442695, %v2455_v15  ;;  %v5467_v34 = vmul.f32 -1.442695, %v2457_v62 }
 0xa90   :  { %7388 = vpow2.f32 %v5465_v21 }
 0xa91   :  { %7390 = vpow2.f32 %v5466_v61 }
 0xa92   :  { %7392 = vpow2.f32 %v5467_v34 }
 0xa93   :  { %7394 = vtanh.f32 %v2456_v50 }
 0xa9a   :  { %v7389_v35 = vpop.eup %7388 }
 0xa9b   :  { %v7391_v48 = vpop.eup %7390  ;;  %v2467_v28 = vadd.f32 1.0, %v7389_v35 }
 0xa9c   :  { %v2468_v58 = vadd.f32 1.0, %v7391_v48  ;;  %v7393_v47 = vpop.eup %7392 }
 0xa9d   :  { %7396 = vrcp.f32 %v2467_v28  ;;  %v7395_v32 = vpop.eup %7394  ;;  %v2469_v15 = vadd.f32 1.0, %v7393_v47 }
 0xa9e   :  { %7398 = vrcp.f32 %v2468_v58 }
 0xa9f   :  { %7400 = vrcp.f32 %v2469_v15 }
 0xaa7   :  { %v7397_v30 = vpop.eup %7396 }
 0xaa8   :  { %v7399_v2 = vpop.eup %7398  ;;  %v2481_v27 = vmul.f32 %v7397_v30, %v7395_v32 }
 0xaa9   :  { %v2480_v43 = vmul.f32 %v7399_v2, %v2478_v60  ;;  %v7401_v61 = vpop.eup %7400 }
 0xaab   :  { %v8396_v21 = vadd.f32 %v2481_v27, %v2480_v43 }
 0xaad   :  { %7402 = vtanh.f32 %v8396_v21 }
 0xab7   :  { %v7403_v49 = vpop.eup %7402 }
 0xab8   :  { %v8399_v62 = vmul.f32 %v7403_v49, %v7401_v61 }
 0xaba   :  { %v2486_v24 = vrot.slane %v8399_v62, 1 }
 0xabc   :  { %2553 = vmatmul.mubr.f32.vlgmr.msra.gmra.mrb[24].mxu0 %v2486_v24  ;;  %2624 = vmatmul.mubr.f32.vlgmr.msra.gmra.mrb[24].mxu1 %v2486_v24 }
 0xabd   :  { %6346 = vmatpush1.bf16.msra.mxu0 %v8198_v10  ;;  %6378 = vmatpush1.bf16.msra.mxu1 %v8200_v11 }
 0xabe   :  { %6348 = vmatprep.subr.bf16.mxu0 %v8202_v22  ;;  %6380 = vmatprep.subr.bf16.mxu1 %v8204_v23 }
 0xabf   :  { %2740 = vmatprep.mubr.f32.mxu0 %v7680_v0  ;;  %2811 = vmatprep.mubr.f32.mxu1 %v7680_v0 }
 0xac1   :  { %6350 = vmatpush1.bf16.msra.mxu0 %v8211_v52  ;;  %6382 = vmatpush1.bf16.msra.mxu1 %v8213_v53 }
 0xac2   :  { %6352 = vmatprep.subr.bf16.mxu0 %v8217_v25  ;;  %6384 = vmatprep.subr.bf16.mxu1 %v8219_v17 }
 0xac5   :  { %6354 = vmatpush1.bf16.msra.mxu0 %v8225_v42  ;;  %6386 = vmatpush1.bf16.msra.mxu1 %v8227_v33 }
 0xac6   :  { %6356 = vmatprep.subr.bf16.mxu0 %v8231_v9  ;;  %6388 = vmatprep.subr.bf16.mxu1 %v8233_v45 }
 0xac9   :  { %6358 = vmatpush1.bf16.msra.mxu0 %v8237_v39  ;;  %6390 = vmatpush1.bf16.msra.mxu1 %v8239_v40 }
 0xaca   :  { %6360 = vmatprep.subr.bf16.mxu0 %v8243_v56  ;;  %6392 = vmatprep.subr.bf16.mxu1 %v8245_v19 }
 0xacd   :  { %6362 = vmatpush1.bf16.msra.mxu0 %v8249_v51  ;;  %6394 = vmatpush1.bf16.msra.mxu1 %v8251_v55 }
 0xace   :  { %6364 = vmatprep.subr.bf16.mxu0 %v8255_v63  ;;  %6396 = vmatprep.subr.bf16.mxu1 %v8257_v4 }
 0xad1   :  { %6366 = vmatpush1.bf16.msra.mxu0 %v8261_v36  ;;  %6398 = vmatpush1.bf16.msra.mxu1 %v8263_v41 }
 0xad2   :  { %6368 = vmatprep.subr.bf16.mxu0 %v8267_v6  ;;  %6400 = vmatprep.subr.bf16.mxu1 %v8269_v18 }
 0xad5   :  { %6370 = vmatpush1.bf16.msra.mxu0 %v8273_v26  ;;  %6402 = vmatpush1.bf16.msra.mxu1 %v8275_v46 }
 0xad6   :  { %6372 = vmatprep.subr.bf16.mxu0 %v8279_v59  ;;  %6404 = vmatprep.subr.bf16.mxu1 %v8281_v14 }
 0xad9   :  { %6374 = vmatpush1.bf16.msra.mxu0 %v8285_v3  ;;  %6406 = vmatpush1.bf16.msra.mxu1 %v8287_v1 }
 0xada   :  { %6408 = vmatprep.subr.bf16.mxu0 %v8182_v5  ;;  %6440 = vmatprep.subr.bf16.mxu1 %v8184_v7 }
 0xb8f   :  { %v2554_v8 = vpop.f32.mrb[24].mxu0  ;;  %v2625_v34 = vpop.f32.mrb[24].mxu1 }
 0xb90   :  { %v2634_v50 = vrot.slane %v2554_v8, 6  ;;  %v2556_v35 = vpop.f32.mrb[25].mxu0  ;;  %v2627_v48 = vpop.f32.mrb[25].mxu1  ;;  %v2636_v27 = vrot.slane %v2625_v34, 6 }
 0xb91   :  { %v2635_v28 = vrot.slane %v2556_v35, 6  ;;  %v2637_v60 = vrot.slane %v2627_v48, 6  ;;  %v2666_v48 = vrot.slane %v8396_v21, 7 }
 0xb92   :  { %v2642_v58 = vadd.f32 %v2634_v50, %v8336_v12  ;;  %v2644_v43 = vadd.f32 %v2636_v27, %v8347_v54 }
 0xb93   :  { %v2643_v47 = vadd.f32 %v2635_v28, %v8338_v16  ;;  %v2645_v2 = vadd.f32 %v2637_v60, %v8343_v38 }
 0xb94   :  { %v5468_v32 = vmul.f32 -1.442695, %v2642_v58 }
 0xb95   :  { %v5469_v30 = vmul.f32 -1.442695, %v2643_v47  ;;  %v5470_v15 = vmul.f32 -1.442695, %v2645_v2 }
 0xb96   :  { %7404 = vpow2.f32 %v5468_v32 }
 0xb97   :  { %7406 = vpow2.f32 %v5469_v30 }
 0xb98   :  { %7408 = vpow2.f32 %v5470_v15  ;;  %v3613_v15 = vsel %vm1821_vm0, %v8353_v44, %v8399_v62 }
 0xb99   :  { %7410 = vtanh.f32 %v2644_v43 }
 0xba0   :  { %v7405_v61 = vpop.eup %7404 }
 0xba1   :  { %v7407_v49 = vpop.eup %7406  ;;  %v2655_v24 = vadd.f32 1.0, %v7405_v61 }
 0xba2   :  { %v2656_v8 = vadd.f32 1.0, %v7407_v49  ;;  %v7409_v50 = vpop.eup %7408 }
 0xba3   :  { %7412 = vrcp.f32 %v2655_v24  ;;  %v7411_v35 = vpop.eup %7410  ;;  %v2657_v32 = vadd.f32 1.0, %v7409_v50 }
 0xba4   :  { %7414 = vrcp.f32 %v2656_v8 }
 0xba5   :  { %7416 = vrcp.f32 %v2657_v32 }
 0xbad   :  { %v7413_v28 = vpop.eup %7412 }
 0xbae   :  { %v7415_v58 = vpop.eup %7414  ;;  %v2669_v47 = vmul.f32 %v7413_v28, %v7411_v35 }
 0xbaf   :  { %v2668_v34 = vmul.f32 %v7415_v58, %v2666_v48  ;;  %v7417_v60 = vpop.eup %7416 }
 0xbb1   :  { %v8441_v30 = vadd.f32 %v2669_v47, %v2668_v34 }
 0xbb3   :  { %7418 = vtanh.f32 %v8441_v30 }
 0xbbd   :  { %v7419_v2 = vpop.eup %7418 }
 0xbbe   :  { %v2672_v27 = vmul.f32 %v7419_v2, %v7417_v60 }
 0xbc0   :  { %v2674_v43 = vrot.slane %v2672_v27, 2  ;;  %v8448_v61 = vsel %vm1823_vm1, %v3613_v15, %v2672_v27 }
 0xbc2   :  { %2741 = vmatmul.mubr.f32.vlgmr.msra.gmra.mrb[26].mxu0 %v2674_v43  ;;  %2812 = vmatmul.mubr.f32.vlgmr.msra.gmra.mrb[26].mxu1 %v2674_v43 }
 0xbc3   :  { %6410 = vmatpush1.bf16.msra.mxu0 %v8198_v10  ;;  %6442 = vmatpush1.bf16.msra.mxu1 %v8200_v11 }
 0xbc4   :  { %6412 = vmatprep.subr.bf16.mxu0 %v8202_v22  ;;  %6444 = vmatprep.subr.bf16.mxu1 %v8204_v23 }
 0xbc5   :  { %2928 = vmatprep.mubr.f32.mxu0 %v7680_v0  ;;  %2999 = vmatprep.mubr.f32.mxu1 %v7680_v0 }
 0xbc7   :  { %6414 = vmatpush1.bf16.msra.mxu0 %v8211_v52  ;;  %6446 = vmatpush1.bf16.msra.mxu1 %v8213_v53 }
 0xbc8   :  { %6416 = vmatprep.subr.bf16.mxu0 %v8217_v25  ;;  %6448 = vmatprep.subr.bf16.mxu1 %v8219_v17 }
 0xbcb   :  { %6418 = vmatpush1.bf16.msra.mxu0 %v8225_v42  ;;  %6450 = vmatpush1.bf16.msra.mxu1 %v8227_v33 }
 0xbcc   :  { %6420 = vmatprep.subr.bf16.mxu0 %v8231_v9  ;;  %6452 = vmatprep.subr.bf16.mxu1 %v8233_v45 }
 0xbcf   :  { %6422 = vmatpush1.bf16.msra.mxu0 %v8237_v39  ;;  %6454 = vmatpush1.bf16.msra.mxu1 %v8239_v40 }
 0xbd0   :  { %6424 = vmatprep.subr.bf16.mxu0 %v8243_v56  ;;  %6456 = vmatprep.subr.bf16.mxu1 %v8245_v19 }
 0xbd3   :  { %6426 = vmatpush1.bf16.msra.mxu0 %v8249_v51  ;;  %6458 = vmatpush1.bf16.msra.mxu1 %v8251_v55 }
 0xbd4   :  { %6428 = vmatprep.subr.bf16.mxu0 %v8255_v63  ;;  %6460 = vmatprep.subr.bf16.mxu1 %v8257_v4 }
 0xbd7   :  { %6430 = vmatpush1.bf16.msra.mxu0 %v8261_v36  ;;  %6462 = vmatpush1.bf16.msra.mxu1 %v8263_v41 }
 0xbd8   :  { %6432 = vmatprep.subr.bf16.mxu0 %v8267_v6  ;;  %6464 = vmatprep.subr.bf16.mxu1 %v8269_v18 }
 0xbdb   :  { %6434 = vmatpush1.bf16.msra.mxu0 %v8273_v26  ;;  %6466 = vmatpush1.bf16.msra.mxu1 %v8275_v46 }
 0xbdc   :  { %6436 = vmatprep.subr.bf16.mxu0 %v8279_v59  ;;  %6468 = vmatprep.subr.bf16.mxu1 %v8281_v14 }
 0xbdf   :  { %6438 = vmatpush1.bf16.msra.mxu0 %v8285_v3  ;;  %6470 = vmatpush1.bf16.msra.mxu1 %v8287_v1 }
 0xbe0   :  { %6472 = vmatprep.subr.bf16.mxu0 %v8182_v5  ;;  %6504 = vmatprep.subr.bf16.mxu1 %v8184_v7 }
 0xc95   :  { %v2742_v44 = vpop.f32.mrb[26].mxu0  ;;  %v2813_v21 = vpop.f32.mrb[26].mxu1 }
 0xc96   :  { %v2822_v62 = vrot.slane %v2742_v44, 5  ;;  %v2744_v49 = vpop.f32.mrb[27].mxu0  ;;  %v2815_v24 = vpop.f32.mrb[27].mxu1  ;;  %v2824_v32 = vrot.slane %v2813_v21, 5 }
 0xc97   :  { %v2823_v8 = vrot.slane %v2744_v49, 5  ;;  %v2825_v58 = vrot.slane %v2815_v24, 5  ;;  %v2854_v24 = vrot.slane %v8441_v30, 7 }
 0xc98   :  { %v2830_v50 = vadd.f32 %v2822_v62, %v8336_v12  ;;  %v2832_v60 = vadd.f32 %v2824_v32, %v8347_v54 }
 0xc99   :  { %v2831_v35 = vadd.f32 %v2823_v8, %v8338_v16  ;;  %v2833_v47 = vadd.f32 %v2825_v58, %v8343_v38 }
 0xc9a   :  { %v5471_v28 = vmul.f32 -1.442695, %v2830_v50 }
 0xc9b   :  { %v5472_v48 = vmul.f32 -1.442695, %v2831_v35  ;;  %v5473_v34 = vmul.f32 -1.442695, %v2833_v47 }
 0xc9c   :  { %7420 = vpow2.f32 %v5471_v28 }
 0xc9d   :  { %7422 = vpow2.f32 %v5472_v48 }
 0xc9e   :  { %7424 = vpow2.f32 %v5473_v34 }
 0xc9f   :  { %7426 = vtanh.f32 %v2832_v60 }
 0xca6   :  { %v7421_v2 = vpop.eup %7420 }
 0xca7   :  { %v7423_v27 = vpop.eup %7422  ;;  %v2843_v15 = vadd.f32 1.0, %v7421_v2 }
 0xca8   :  { %v2844_v43 = vadd.f32 1.0, %v7423_v27  ;;  %v7425_v44 = vpop.eup %7424 }
 0xca9   :  { %7428 = vrcp.f32 %v2843_v15  ;;  %v7427_v62 = vpop.eup %7426  ;;  %v2845_v35 = vadd.f32 1.0, %v7425_v44 }
 0xcaa   :  { %7430 = vrcp.f32 %v2844_v43 }
 0xcab   :  { %7432 = vrcp.f32 %v2845_v35 }
 0xcb3   :  { %v7429_v49 = vpop.eup %7428 }
 0xcb4   :  { %v7431_v8 = vpop.eup %7430  ;;  %v2857_v50 = vmul.f32 %v7429_v49, %v7427_v62 }
 0xcb5   :  { %v2856_v21 = vmul.f32 %v7431_v8, %v2854_v24  ;;  %v7433_v48 = vpop.eup %7432 }
 0xcb7   :  { %v8489_v28 = vadd.f32 %v2857_v50, %v2856_v21 }
 0xcb9   :  { %7434 = vtanh.f32 %v8489_v28 }
 0xcc3   :  { %v7435_v58 = vpop.eup %7434 }
 0xcc4   :  { %v2860_v47 = vmul.f32 %v7435_v58, %v7433_v48 }
 0xcc6   :  { %v2862_v32 = vrot.slane %v2860_v47, 3  ;;  %v8494_v34 = vsel %vm1825_vm2, %v8448_v61, %v2860_v47 }
 0xcc8   :  { %2929 = vmatmul.mubr.f32.vlgmr.msra.gmra.mrb[28].mxu0 %v2862_v32  ;;  %3000 = vmatmul.mubr.f32.vlgmr.msra.gmra.mrb[28].mxu1 %v2862_v32 }
 0xcc9   :  { %6474 = vmatpush1.bf16.msra.mxu0 %v8198_v10  ;;  %6506 = vmatpush1.bf16.msra.mxu1 %v8200_v11 }
 0xcca   :  { %6476 = vmatprep.subr.bf16.mxu0 %v8202_v22  ;;  %6508 = vmatprep.subr.bf16.mxu1 %v8204_v23 }
 0xccb   :  { %3116 = vmatprep.mubr.f32.mxu0 %v7680_v0  ;;  %3187 = vmatprep.mubr.f32.mxu1 %v7680_v0 }
 0xccd   :  { %6478 = vmatpush1.bf16.msra.mxu0 %v8211_v52  ;;  %6510 = vmatpush1.bf16.msra.mxu1 %v8213_v53 }
 0xcce   :  { %6480 = vmatprep.subr.bf16.mxu0 %v8217_v25  ;;  %6512 = vmatprep.subr.bf16.mxu1 %v8219_v17 }
 0xcd1   :  { %6482 = vmatpush1.bf16.msra.mxu0 %v8225_v42  ;;  %6514 = vmatpush1.bf16.msra.mxu1 %v8227_v33 }
 0xcd2   :  { %6484 = vmatprep.subr.bf16.mxu0 %v8231_v9  ;;  %6516 = vmatprep.subr.bf16.mxu1 %v8233_v45 }
 0xcd5   :  { %6486 = vmatpush1.bf16.msra.mxu0 %v8237_v39  ;;  %6518 = vmatpush1.bf16.msra.mxu1 %v8239_v40 }
 0xcd6   :  { %6488 = vmatprep.subr.bf16.mxu0 %v8243_v56  ;;  %6520 = vmatprep.subr.bf16.mxu1 %v8245_v19 }
 0xcd9   :  { %6490 = vmatpush1.bf16.msra.mxu0 %v8249_v51  ;;  %6522 = vmatpush1.bf16.msra.mxu1 %v8251_v55 }
 0xcda   :  { %6492 = vmatprep.subr.bf16.mxu0 %v8255_v63  ;;  %6524 = vmatprep.subr.bf16.mxu1 %v8257_v4 }
 0xcdd   :  { %6494 = vmatpush1.bf16.msra.mxu0 %v8261_v36  ;;  %6526 = vmatpush1.bf16.msra.mxu1 %v8263_v41 }
 0xcde   :  { %6496 = vmatprep.subr.bf16.mxu0 %v8267_v6  ;;  %6528 = vmatprep.subr.bf16.mxu1 %v8269_v18 }
 0xce1   :  { %6498 = vmatpush1.bf16.msra.mxu0 %v8273_v26  ;;  %6530 = vmatpush1.bf16.msra.mxu1 %v8275_v46 }
 0xce2   :  { %6500 = vmatprep.subr.bf16.mxu0 %v8279_v59  ;;  %6532 = vmatprep.subr.bf16.mxu1 %v8281_v14 }
 0xce5   :  { %6502 = vmatpush1.bf16.msra.mxu0 %v8285_v3  ;;  %6534 = vmatpush1.bf16.msra.mxu1 %v8287_v1 }
 0xce6   :  { %6536 = vmatprep.subr.bf16.mxu0 %v8182_v5  ;;  %6568 = vmatprep.subr.bf16.mxu1 %v8184_v7 }
 0xd9b   :  { %v2930_v30 = vpop.f32.mrb[28].mxu0  ;;  %v3001_v61 = vpop.f32.mrb[28].mxu1 }
 0xd9c   :  { %v3010_v60 = vrot.slane %v2930_v30, 4  ;;  %v2932_v2 = vpop.f32.mrb[29].mxu0  ;;  %v3003_v27 = vpop.f32.mrb[29].mxu1  ;;  %v3012_v50 = vrot.slane %v3001_v61, 4 }
 0xd9d   :  { %v3011_v15 = vrot.slane %v2932_v2, 4  ;;  %v3013_v24 = vrot.slane %v3003_v27, 4  ;;  %v3042_v27 = vrot.slane %v8489_v28, 7 }
 0xd9e   :  { %v3018_v43 = vadd.f32 %v3010_v60, %v8336_v12  ;;  %v3020_v21 = vadd.f32 %v3012_v50, %v8347_v54 }
 0xd9f   :  { %v3019_v44 = vadd.f32 %v3011_v15, %v8338_v16  ;;  %v3021_v8 = vadd.f32 %v3013_v24, %v8343_v38 }
 0xda0   :  { %v5474_v62 = vmul.f32 -1.442695, %v3018_v43 }
 0xda1   :  { %v5475_v49 = vmul.f32 -1.442695, %v3019_v44  ;;  %v5476_v35 = vmul.f32 -1.442695, %v3021_v8 }
 0xda2   :  { %7436 = vpow2.f32 %v5474_v62 }
 0xda3   :  { %7438 = vpow2.f32 %v5475_v49 }
 0xda4   :  { %7440 = vpow2.f32 %v5476_v35 }
 0xda5   :  { %7442 = vtanh.f32 %v3020_v21 }
 0xdac   :  { %v7437_v48 = vpop.eup %7436 }
 0xdad   :  { %v7439_v58 = vpop.eup %7438  ;;  %v3031_v47 = vadd.f32 1.0, %v7437_v48 }
 0xdae   :  { %v3032_v32 = vadd.f32 1.0, %v7439_v58  ;;  %v7441_v30 = vpop.eup %7440 }
 0xdaf   :  { %7444 = vrcp.f32 %v3031_v47  ;;  %v7443_v60 = vpop.eup %7442  ;;  %v3033_v44 = vadd.f32 1.0, %v7441_v30 }
 0xdb0   :  { %7446 = vrcp.f32 %v3032_v32 }
 0xdb1   :  { %7448 = vrcp.f32 %v3033_v44 }
 0xdb9   :  { %v7445_v2 = vpop.eup %7444 }
 0xdba   :  { %v7447_v15 = vpop.eup %7446  ;;  %v3045_v43 = vmul.f32 %v7445_v2, %v7443_v60 }
 0xdbb   :  { %v3044_v61 = vmul.f32 %v7447_v15, %v3042_v27  ;;  %v7449_v49 = vpop.eup %7448 }
 0xdbd   :  { %v8535_v62 = vadd.f32 %v3045_v43, %v3044_v61 }
 0xdbf   :  { %7450 = vtanh.f32 %v8535_v62 }
 0xdc9   :  { %v7451_v24 = vpop.eup %7450 }
 0xdca   :  { %v3048_v8 = vmul.f32 %v7451_v24, %v7449_v49 }
 0xdcc   :  { %v3050_v50 = vrot.slane %v3048_v8, 4  ;;  %v8540_v35 = vsel %vm1827_vm3, %v8494_v34, %v3048_v8 }
 0xdce   :  { %3117 = vmatmul.mubr.f32.vlgmr.msra.gmra.mrb[30].mxu0 %v3050_v50  ;;  %3188 = vmatmul.mubr.f32.vlgmr.msra.gmra.mrb[30].mxu1 %v3050_v50 }
 0xdcf   :  { %6538 = vmatpush1.bf16.msra.mxu0 %v8198_v10  ;;  %6570 = vmatpush1.bf16.msra.mxu1 %v8200_v11 }
 0xdd0   :  { %6540 = vmatprep.subr.bf16.mxu0 %v8202_v22  ;;  %6572 = vmatprep.subr.bf16.mxu1 %v8204_v23 }
 0xdd1   :  { %3304 = vmatprep.mubr.f32.mxu0 %v7680_v0  ;;  %3375 = vmatprep.mubr.f32.mxu1 %v7680_v0 }
 0xdd3   :  { %6542 = vmatpush1.bf16.msra.mxu0 %v8211_v52  ;;  %6574 = vmatpush1.bf16.msra.mxu1 %v8213_v53 }
 0xdd4   :  { %6544 = vmatprep.subr.bf16.mxu0 %v8217_v25  ;;  %6576 = vmatprep.subr.bf16.mxu1 %v8219_v17 }
 0xdd7   :  { %6546 = vmatpush1.bf16.msra.mxu0 %v8225_v42  ;;  %6578 = vmatpush1.bf16.msra.mxu1 %v8227_v33 }
 0xdd8   :  { %6548 = vmatprep.subr.bf16.mxu0 %v8231_v9  ;;  %6580 = vmatprep.subr.bf16.mxu1 %v8233_v45 }
 0xddb   :  { %6550 = vmatpush1.bf16.msra.mxu0 %v8237_v39  ;;  %6582 = vmatpush1.bf16.msra.mxu1 %v8239_v40 }
 0xddc   :  { %6552 = vmatprep.subr.bf16.mxu0 %v8243_v56  ;;  %6584 = vmatprep.subr.bf16.mxu1 %v8245_v19 }
 0xddf   :  { %6554 = vmatpush1.bf16.msra.mxu0 %v8249_v51  ;;  %6586 = vmatpush1.bf16.msra.mxu1 %v8251_v55 }
 0xde0   :  { %6556 = vmatprep.subr.bf16.mxu0 %v8255_v63  ;;  %6588 = vmatprep.subr.bf16.mxu1 %v8257_v4 }
 0xde3   :  { %6558 = vmatpush1.bf16.msra.mxu0 %v8261_v36  ;;  %6590 = vmatpush1.bf16.msra.mxu1 %v8263_v41 }
 0xde4   :  { %6560 = vmatprep.subr.bf16.mxu0 %v8267_v6  ;;  %6592 = vmatprep.subr.bf16.mxu1 %v8269_v18 }
 0xde7   :  { %6562 = vmatpush1.bf16.msra.mxu0 %v8273_v26  ;;  %6594 = vmatpush1.bf16.msra.mxu1 %v8275_v46 }
 0xde8   :  { %6564 = vmatprep.subr.bf16.mxu0 %v8279_v59  ;;  %6596 = vmatprep.subr.bf16.mxu1 %v8281_v14 }
 0xdeb   :  { %6566 = vmatpush1.bf16.msra.mxu0 %v8285_v3  ;;  %6598 = vmatpush1.bf16.msra.mxu1 %v8287_v1 }
 0xdec   :  { %6600 = vmatprep.subr.bf16.mxu0 %v8182_v5  ;;  %6632 = vmatprep.subr.bf16.mxu1 %v8184_v7 }
 0xea1   :  { %v3118_v28 = vpop.f32.mrb[30].mxu0  ;;  %v3189_v34 = vpop.f32.mrb[30].mxu1 }
 0xea2   :  { %v3198_v21 = vrot.slane %v3118_v28, 3  ;;  %v3120_v48 = vpop.f32.mrb[31].mxu0  ;;  %v3191_v58 = vpop.f32.mrb[31].mxu1  ;;  %v3200_v5 = vrot.slane %v3189_v34, 3 }
 0xea3   :  { %v3199_v47 = vrot.slane %v3120_v48, 3  ;;  %v3201_v27 = vrot.slane %v3191_v58, 3 }
 0xea4   :  { %v3206_v32 = vadd.f32 %v3198_v21, %v8336_v12  ;;  %v3208_v7 = vadd.f32 %v3200_v5, %v8347_v54  ;;  %v3230_v21 = vrot.slane %v8535_v62, 7 }
 0xea5   :  { %v3207_v30 = vadd.f32 %v3199_v47, %v8338_v16  ;;  %v3209_v15 = vadd.f32 %v3201_v27, %v8343_v38 }
 0xea6   :  { %v5477_v60 = vmul.f32 -1.442695, %v3206_v32 }
 0xea7   :  { %v5478_v2 = vmul.f32 -1.442695, %v3207_v30  ;;  %v5479_v43 = vmul.f32 -1.442695, %v3209_v15 }
 0xea8   :  { %7452 = vpow2.f32 %v5477_v60 }
 0xea9   :  { %7454 = vpow2.f32 %v5478_v2 }
 0xeaa   :  { %7456 = vpow2.f32 %v5479_v43  ;;  %v3622_v43 = vld [vmem:[#allocation2 + $0x408] sm:$0xff] }
 0xeab   :  { %7458 = vtanh.f32 %v3208_v7  ;;  %v3626_v7 = vld [vmem:[#allocation2 + $0x428] sm:$0xff] }
 0xeb2   :  { %v7453_v44 = vpop.eup %7452 }
 0xeb3   :  { %v7455_v61 = vpop.eup %7454  ;;  %v3219_v49 = vadd.f32 1.0, %v7453_v44  ;;  %v3624_v44 = vld [vmem:[#allocation2 + $0x418] sm:$0xff] }
 0xeb4   :  { %v3220_v24 = vadd.f32 1.0, %v7455_v61  ;;  %v7457_v8 = vpop.eup %7456  ;;  %v6663_v61 = vpack.c.bf16 %v3626_v7, %v3622_v43  ;;  %v3660_v7 = vld [vmem:[#allocation2 + $0x538] sm:$0xff] }
 0xeb5   :  { %7460 = vrcp.f32 %v3219_v49  ;;  %v7459_v50 = vpop.eup %7458  ;;  %v3221_v47 = vadd.f32 1.0, %v7457_v8  ;;  %v3628_v49 = vld [vmem:[#allocation2 + $0x438] sm:$0xff]  ;;  %v3625_v8 = vld [vmem:[#allocation2 + $0x420] sm:$0xff] }
 0xeb6   :  { %7462 = vrcp.f32 %v3220_v24  ;;  %v3621_v24 = vld [vmem:[#allocation2 + $0x400] sm:$0xff] }
 0xeb7   :  { %7464 = vrcp.f32 %v3221_v47  ;;  %v3630_v47 = vld [vmem:[#allocation2 + $0x448] sm:$0xff] }
 0xebf   :  { %v7461_v28 = vpop.eup %7460 }
 0xec0   :  { %v7463_v48 = vpop.eup %7462  ;;  %v3233_v58 = vmul.f32 %v7461_v28, %v7459_v50  ;;  %v6695_v50 = vpack.c.bf16 %v3628_v49, %v3624_v44  ;;  %v6665_v28 = vpack.c.bf16 %v3625_v8, %v3621_v24  ;;  %v3653_v44 = vld [vmem:[#allocation2 + $0x500] sm:$0xff]  ;;  %v3655_v8 = vld [vmem:[#allocation2 + $0x510] sm:$0xff] }
 0xec1   :  { %v3232_v34 = vmul.f32 %v7463_v48, %v3230_v21  ;;  %v7465_v30 = vpop.eup %7464  ;;  %v3623_v21 = vld [vmem:[#allocation2 + $0x410] sm:$0xff] }
 0xec2   :  { %v3627_v48 = vld [vmem:[#allocation2 + $0x430] sm:$0xff] }
 0xec3   :  { %v8581_v32 = vadd.f32 %v3233_v58, %v3232_v34  ;;  %v6697_v58 = vpack.c.bf16 %v3627_v48, %v3623_v21  ;;  %v3634_v34 = vld [vmem:[#allocation2 + $0x468] sm:$0xff] }
 0xec4   :  { %v3662_v21 = vld [vmem:[#allocation2 + $0x548] sm:$0xff] }
 0xec5   :  { %7466 = vtanh.f32 %v8581_v32  ;;  %v3666_v48 = vld [vmem:[#allocation2 + $0x568] sm:$0xff] }
 0xecf   :  { %v7467_v60 = vpop.eup %7466 }
 0xed0   :  { %v3236_v2 = vmul.f32 %v7467_v60, %v7465_v30  ;;  %v6667_v30 = vpack.c.bf16 %v3634_v34, %v3630_v47  ;;  %v3636_v60 = vld [vmem:[#allocation2 + $0x478] sm:$0xff]  ;;  %v6683_v47 = vpack.c.bf16 %v3666_v48, %v3662_v21 }
 0xed1   :  { %v3668_v34 = vld [vmem:[#allocation2 + $0x578] sm:$0xff] }
 0xed2   :  { %v3238_v27 = vrot.slane %v3236_v2, 5  ;;  %v8586_v15 = vsel %vm1829_vm4, %v8540_v35, %v3236_v2  ;;  %v3629_v2 = vld [vmem:[#allocation2 + $0x440] sm:$0xff] }
 0xed4   :  { %3305 = vmatmul.mubr.f32.vlgmr.msra.gmra.mrb[32].mxu0 %v3238_v27  ;;  %3376 = vmatmul.mubr.f32.vlgmr.msra.gmra.mrb[32].mxu1 %v3238_v27  ;;  %v3633_v27 = vld [vmem:[#allocation2 + $0x460] sm:$0xff] }
 0xed5   :  { %6602 = vmatpush1.bf16.msra.mxu0 %v8198_v10  ;;  %6634 = vmatpush1.bf16.msra.mxu1 %v8200_v11 }
 0xed6   :  { %6604 = vmatprep.subr.bf16.mxu0 %v8202_v22  ;;  %6636 = vmatprep.subr.bf16.mxu1 %v8204_v23 }
 0xed7   :  { %3492 = vmatprep.mubr.f32.mxu0 %v7680_v0  ;;  %3563 = vmatprep.mubr.f32.mxu1 %v7680_v0 }
 0xed9   :  { %6606 = vmatpush1.bf16.msra.mxu0 %v8211_v52  ;;  %6638 = vmatpush1.bf16.msra.mxu1 %v8213_v53 }
 0xeda   :  { %6608 = vmatprep.subr.bf16.mxu0 %v8217_v25  ;;  %6640 = vmatprep.subr.bf16.mxu1 %v8219_v17 }
 0xedd   :  { %6610 = vmatpush1.bf16.msra.mxu0 %v8225_v42  ;;  %6642 = vmatpush1.bf16.msra.mxu1 %v8227_v33 }
 0xede   :  { %6612 = vmatprep.subr.bf16.mxu0 %v8231_v9  ;;  %6644 = vmatprep.subr.bf16.mxu1 %v8233_v45 }
 0xee1   :  { %6614 = vmatpush1.bf16.msra.mxu0 %v8237_v39  ;;  %6646 = vmatpush1.bf16.msra.mxu1 %v8239_v40 }
 0xee2   :  { %6616 = vmatprep.subr.bf16.mxu0 %v8243_v56  ;;  %6648 = vmatprep.subr.bf16.mxu1 %v8245_v19 }
 0xee5   :  { %6618 = vmatpush1.bf16.msra.mxu0 %v8249_v51  ;;  %6650 = vmatpush1.bf16.msra.mxu1 %v8251_v55 }
 0xee6   :  { %6620 = vmatprep.subr.bf16.mxu0 %v8255_v63  ;;  %6652 = vmatprep.subr.bf16.mxu1 %v8257_v4 }
 0xee9   :  { %6622 = vmatpush1.bf16.msra.mxu0 %v8261_v36  ;;  %6654 = vmatpush1.bf16.msra.mxu1 %v8263_v41 }
 0xeea   :  { %6624 = vmatprep.subr.bf16.mxu0 %v8267_v6  ;;  %6656 = vmatprep.subr.bf16.mxu1 %v8269_v18  ;;  %v3418_v6 = vrot.slane %v8581_v32, 7  ;;  %v3632_v32 = vld [vmem:[#allocation2 + $0x458] sm:$0xff] }
 0xeed   :  { %6626 = vmatpush1.bf16.msra.mxu0 %v8273_v26  ;;  %6658 = vmatpush1.bf16.msra.mxu1 %v8275_v46 }
 0xeee   :  { %6628 = vmatprep.subr.bf16.mxu0 %v8279_v59  ;;  %6660 = vmatprep.subr.bf16.mxu1 %v8281_v14 }
 0xef1   :  { %6630 = vmatpush1.bf16.msra.mxu0 %v8285_v3  ;;  %6662 = vmatpush1.bf16.msra.mxu1 %v8287_v1 }
 0xef2   :  { %6664 = vmatprep.subr.bf16.mxu0 %v6663_v61  ;;  %6696 = vmatprep.subr.bf16.mxu1 %v6695_v50  ;;  %v3657_v61 = vld [vmem:[#allocation2 + $0x520] sm:$0xff]  ;;  %v3659_v50 = vld [vmem:[#allocation2 + $0x530] sm:$0xff] }
 0xef3   :  { %v6681_v24 = vpack.c.bf16 %v3657_v61, %v3653_v44 }
 0xfa7   :  { %v3306_v10 = vpop.f32.mrb[32].mxu0  ;;  %v3377_v11 = vpop.f32.mrb[32].mxu1 }
 0xfa8   :  { %v3386_v22 = vrot.slane %v3306_v10, 2  ;;  %v3308_v23 = vpop.f32.mrb[33].mxu0  ;;  %v3379_v52 = vpop.f32.mrb[33].mxu1  ;;  %v3388_v39 = vrot.slane %v3377_v11, 2  ;;  %v6669_v10 = vpack.c.bf16 %v3633_v27, %v3629_v2  ;;  %v3631_v11 = vld [vmem:[#allocation2 + $0x450] sm:$0xff] }
 0xfa9   :  { %v3387_v53 = vrot.slane %v3308_v23, 2  ;;  %v3389_v9 = vrot.slane %v3379_v52, 2  ;;  %v3638_v52 = vld [vmem:[#allocation2 + $0x488] sm:$0xff]  ;;  %v3663_v27 = vld [vmem:[#allocation2 + $0x550] sm:$0xff] }
 0xfaa   :  { %v3394_v25 = vadd.f32 %v3386_v22, %v8336_v12  ;;  %v3396_v56 = vadd.f32 %v3388_v39, %v8347_v54  ;;  %v3635_v22 = vld [vmem:[#allocation2 + $0x470] sm:$0xff] }
 0xfab   :  { %v3395_v17 = vadd.f32 %v3387_v53, %v8338_v16  ;;  %v3397_v45 = vadd.f32 %v3389_v9, %v8343_v38  ;;  %v6701_v23 = vpack.c.bf16 %v3635_v22, %v3631_v11  ;;  %v3642_v53 = vld [vmem:[#allocation2 + $0x4a8] sm:$0xff]  ;;  %v3641_v9 = vld [vmem:[#allocation2 + $0x4a0] sm:$0xff] }
 0xfac   :  { %v5480_v42 = vmul.f32 -1.442695, %v3394_v25  ;;  %v3640_v25 = vld [vmem:[#allocation2 + $0x498] sm:$0xff]  ;;  %v3674_v22 = vld [vmem:[#allocation2 + $0x5a8] sm:$0xff] }
 0xfad   :  { %v5481_v33 = vmul.f32 -1.442695, %v3395_v17  ;;  %v5482_v40 = vmul.f32 -1.442695, %v3397_v45  ;;  %v6671_v17 = vpack.c.bf16 %v3642_v53, %v3638_v52  ;;  %v3676_v52 = vld [vmem:[#allocation2 + $0x5b8] sm:$0xff] }
 0xfae   :  { %7468 = vpow2.f32 %v5480_v42  ;;  %v3644_v42 = vld [vmem:[#allocation2 + $0x4b8] sm:$0xff] }
 0xfaf   :  { %7470 = vpow2.f32 %v5481_v33  ;;  %v3637_v33 = vld [vmem:[#allocation2 + $0x480] sm:$0xff]  ;;  %v6703_v45 = vpack.c.bf16 %v3644_v42, %v3640_v25 }
 0xfb0   :  { %7472 = vpow2.f32 %v5482_v40  ;;  %v6673_v39 = vpack.c.bf16 %v3641_v9, %v3637_v33  ;;  %v3639_v40 = vld [vmem:[#allocation2 + $0x490] sm:$0xff]  ;;  %v3673_v42 = vld [vmem:[#allocation2 + $0x5a0] sm:$0xff] }
 0xfb1   :  { %7474 = vtanh.f32 %v3396_v56  ;;  %v3643_v56 = vld [vmem:[#allocation2 + $0x4b0] sm:$0xff] }
 0xfb2   :  { %v3671_v33 = vld [vmem:[#allocation2 + $0x590] sm:$0xff] }
 0xfb8   :  { %v7469_v19 = vpop.eup %7468 }
 0xfb9   :  { %v7471_v51 = vpop.eup %7470  ;;  %v3407_v55 = vadd.f32 1.0, %v7469_v19  ;;  %v6705_v19 = vpack.c.bf16 %v3643_v56, %v3639_v40  ;;  %v3682_v40 = vld [vmem:[#allocation2 + $0x5e8] sm:$0xff] }
 0xfba   :  { %v3408_v63 = vadd.f32 1.0, %v7471_v51  ;;  %v7473_v4 = vpop.eup %7472  ;;  %v3646_v51 = vld [vmem:[#allocation2 + $0x4c8] sm:$0xff] }
 0xfbb   :  { %7476 = vrcp.f32 %v3407_v55  ;;  %v7475_v36 = vpop.eup %7474  ;;  %v3409_v46 = vadd.f32 1.0, %v7473_v4  ;;  %v3650_v55 = vld [vmem:[#allocation2 + $0x4e8] sm:$0xff] }
 0xfbc   :  { %7478 = vrcp.f32 %v3408_v63  ;;  %v3648_v63 = vld [vmem:[#allocation2 + $0x4d8] sm:$0xff]  ;;  %v6675_v4 = vpack.c.bf16 %v3650_v55, %v3646_v51 }
 0xfbd   :  { %7480 = vrcp.f32 %v3409_v46  ;;  %v3647_v46 = vld [vmem:[#allocation2 + $0x4d0] sm:$0xff]  ;;  %v3680_v51 = vld [vmem:[#allocation2 + $0x5d8] sm:$0xff] }
 0xfbe   :  { %v3684_v55 = vld [vmem:[#allocation2 + $0x5f8] sm:$0xff] }
 0xfc5   :  { %v7477_v41 = vpop.eup %7476 }
 0xfc6   :  { %v7479_v18 = vpop.eup %7478  ;;  %v3421_v26 = vmul.f32 %v7477_v41, %v7475_v36  ;;  %v3652_v36 = vld [vmem:[#allocation2 + $0x4f8] sm:$0xff]  ;;  %v3645_v41 = vld [vmem:[#allocation2 + $0x4c0] sm:$0xff] }
 0xfc7   :  { %v3420_v59 = vmul.f32 %v7479_v18, %v3418_v6  ;;  %v7481_v3 = vpop.eup %7480  ;;  %v3649_v6 = vld [vmem:[#allocation2 + $0x4e0] sm:$0xff]  ;;  %v6707_v18 = vpack.c.bf16 %v3652_v36, %v3648_v63 }
 0xfc8   :  { %v3677_v63 = vld [vmem:[#allocation2 + $0x5c0] sm:$0xff] }
 0xfc9   :  { %v8625_v14 = vadd.f32 %v3421_v26, %v3420_v59  ;;  %v6677_v26 = vpack.c.bf16 %v3649_v6, %v3645_v41  ;;  %v3651_v59 = vld [vmem:[#allocation2 + $0x4f0] sm:$0xff]  ;;  %v3681_v36 = vld [vmem:[#allocation2 + $0x5e0] sm:$0xff] }
 0xfca   :  { %v3679_v41 = vld [vmem:[#allocation2 + $0x5d0] sm:$0xff] }
 0xfcb   :  { %7482 = vtanh.f32 %v8625_v14  ;;  %v3683_v6 = vld [vmem:[#allocation2 + $0x5f0] sm:$0xff] }
 0xfd5   :  { %v7483_v1 = vpop.eup %7482 }
 0xfd6   :  { %v3424_v62 = vmul.f32 %v7483_v1, %v7481_v3  ;;  %v6709_v3 = vpack.c.bf16 %v3651_v59, %v3647_v46  ;;  %v3654_v1 = vld [vmem:[#allocation2 + $0x508] sm:$0xff]  ;;  %v3689_v59 = vld [vmem:[#allocation4 + $0x418] sm:$0xff] }
 0xfd7   :  { %v3691_v46 = vld [vmem:[#allocation4 + $0x428] sm:$0xff] }
 0xfd8   :  { %v3426_v35 = vrot.slane %v3424_v62, 6  ;;  %v8630_v5 = vsel %vm1831_vm5, %v8586_v15, %v3424_v62  ;;  %v6699_v15 = vpack.c.bf16 %v3636_v60, %v3632_v32  ;;  %v3658_v62 = vld [vmem:[#allocation2 + $0x528] sm:$0xff]  ;;  %v3661_v32 = vld [vmem:[#allocation2 + $0x540] sm:$0xff] }
 0xfd9   :  { %v6679_v43 = vpack.c.bf16 %v3658_v62, %v3654_v1  ;;  %v3693_v62 = vld [vmem:[#allocation4 + $0x438] sm:$0xff] }
 0xfda   :  { %3493 = vmatmul.mubr.f32.vlgmr.msra.gmra.mrb[34].mxu0 %v3426_v35  ;;  %3564 = vmatmul.mubr.f32.vlgmr.msra.gmra.mrb[34].mxu1 %v3426_v35  ;;  %v3656_v35 = vld [vmem:[#allocation2 + $0x518] sm:$0xff] }
 0xfdb   :  { %3837 = vmatprep.mubr.f32.mxu0 %v7680_v0  ;;  %3908 = vmatprep.mubr.f32.mxu1 %v7680_v0  ;;  %v6711_v49 = vpack.c.bf16 %v3660_v7, %v3656_v35  ;;  %v8636_v35 = vpack.c.bf16 %v3693_v62, %v3689_v59  ;;  %v3707_v59 = vld [vmem:[#allocation4 + $0x4a8] sm:$0xff]  ;;  %v3709_v62 = vld [vmem:[#allocation4 + $0x4b8] sm:$0xff] }
 0xfdc   :  { %6666 = vmatpush1.bf16.msra.mxu0 %v6665_v28  ;;  %6698 = vmatpush1.bf16.msra.mxu1 %v6697_v58  ;;  %v6713_v28 = vpack.c.bf16 %v3659_v50, %v3655_v8  ;;  %v3664_v58 = vld [vmem:[#allocation2 + $0x558] sm:$0xff] }
 0xfdd   :  { %6668 = vmatprep.subr.bf16.mxu0 %v6667_v30  ;;  %6700 = vmatprep.subr.bf16.mxu1 %v6699_v15  ;;  %v3665_v30 = vld [vmem:[#allocation2 + $0x560] sm:$0xff]  ;;  %v6715_v60 = vpack.c.bf16 %v3668_v34, %v3664_v58  ;;  %v3667_v15 = vld [vmem:[#allocation2 + $0x570] sm:$0xff] }
 0xfde   :  { %v6685_v2 = vpack.c.bf16 %v3665_v30, %v3661_v32  ;;  %v6717_v11 = vpack.c.bf16 %v3667_v15, %v3663_v27 }
 0xfe0   :  { %6670 = vmatpush1.bf16.msra.mxu0 %v6669_v10  ;;  %6702 = vmatpush1.bf16.msra.mxu1 %v6701_v23  ;;  %v3670_v10 = vld [vmem:[#allocation2 + $0x588] sm:$0xff]  ;;  %v3672_v23 = vld [vmem:[#allocation2 + $0x598] sm:$0xff] }
 0xfe1   :  { %6672 = vmatprep.subr.bf16.mxu0 %v6671_v17  ;;  %6704 = vmatprep.subr.bf16.mxu1 %v6703_v45  ;;  %v6687_v53 = vpack.c.bf16 %v3674_v22, %v3670_v10  ;;  %v6719_v25 = vpack.c.bf16 %v3676_v52, %v3672_v23  ;;  %v3669_v17 = vld [vmem:[#allocation2 + $0x580] sm:$0xff]  ;;  %v3675_v45 = vld [vmem:[#allocation2 + $0x5b0] sm:$0xff]  ;;  %v3606_v10 = vrot.slane %v8625_v14, 7 }
 0xfe2   :  { %v6689_v9 = vpack.c.bf16 %v3673_v42, %v3669_v17  ;;  %v6721_v56 = vpack.c.bf16 %v3675_v45, %v3671_v33  ;;  %v3692_v17 = vld [vmem:[#allocation4 + $0x430] sm:$0xff]  ;;  %v3695_v42 = vld [vmem:[#allocation4 + $0x448] sm:$0xff]  ;;  %v3697_v45 = vld [vmem:[#allocation4 + $0x458] sm:$0xff] }
 0xfe4   :  { %6674 = vmatpush1.bf16.msra.mxu0 %v6673_v39  ;;  %6706 = vmatpush1.bf16.msra.mxu1 %v6705_v19  ;;  %v3678_v39 = vld [vmem:[#allocation2 + $0x5c8] sm:$0xff] }
 0xfe5   :  { %6676 = vmatprep.subr.bf16.mxu0 %v6675_v4  ;;  %6708 = vmatprep.subr.bf16.mxu1 %v6707_v18  ;;  %v6691_v19 = vpack.c.bf16 %v3682_v40, %v3678_v39  ;;  %v6723_v4 = vpack.c.bf16 %v3684_v55, %v3680_v51  ;;  %v6693_v18 = vpack.c.bf16 %v3681_v36, %v3677_v63  ;;  %v3701_v39 = vld [vmem:[#allocation4 + $0x478] sm:$0xff]  ;;  %v3694_v51 = vld [vmem:[#allocation4 + $0x440] sm:$0xff]  ;;  %v3696_v36 = vld [vmem:[#allocation4 + $0x450] sm:$0xff] }
 0xfe6   :  { %v3698_v55 = vld [vmem:[#allocation4 + $0x460] sm:$0xff] }
 0xfe8   :  { %6678 = vmatpush1.bf16.msra.mxu0 %v6677_v26  ;;  %6710 = vmatpush1.bf16.msra.mxu1 %v6709_v3  ;;  %v3687_v26 = vld [vmem:[#allocation4 + $0x408] sm:$0xff]  ;;  %v6725_v3 = vpack.c.bf16 %v3683_v6, %v3679_v41  ;;  %v3700_v41 = vld [vmem:[#allocation4 + $0x470] sm:$0xff] }
 0xfe9   :  { %6680 = vmatprep.subr.bf16.mxu0 %v6679_v43  ;;  %6712 = vmatprep.subr.bf16.mxu1 %v6711_v49  ;;  %v8634_v1 = vpack.c.bf16 %v3691_v46, %v3687_v26  ;;  %v3703_v6 = vld [vmem:[#allocation4 + $0x488] sm:$0xff] }
 0xfec   :  { %6682 = vmatpush1.bf16.msra.mxu0 %v6681_v24  ;;  %6714 = vmatpush1.bf16.msra.mxu1 %v6713_v28 }
 0xfed   :  { %6684 = vmatprep.subr.bf16.mxu0 %v6683_v47  ;;  %6716 = vmatprep.subr.bf16.mxu1 %v6715_v60 }
 0xff0   :  { %6686 = vmatpush1.bf16.msra.mxu0 %v6685_v2  ;;  %6718 = vmatpush1.bf16.msra.mxu1 %v6717_v11 }
 0xff1   :  { %6688 = vmatprep.subr.bf16.mxu0 %v6687_v53  ;;  %6720 = vmatprep.subr.bf16.mxu1 %v6719_v25  ;;  %v3690_v53 = vld [vmem:[#allocation4 + $0x420] sm:$0xff]  ;;  %v3688_v25 = vld [vmem:[#allocation4 + $0x410] sm:$0xff] }
 0xff4   :  { %6690 = vmatpush1.bf16.msra.mxu0 %v6689_v9  ;;  %6722 = vmatpush1.bf16.msra.mxu1 %v6721_v56  ;;  %v3699_v9 = vld [vmem:[#allocation4 + $0x468] sm:$0xff] }
 0xff5   :  { %6692 = vmatprep.subr.bf16.mxu0 %v6691_v19  ;;  %6724 = vmatprep.subr.bf16.mxu1 %v6723_v4  ;;  %v8650_v19 = vpack.c.bf16 %v3692_v17, %v3688_v25  ;;  %v8652_v63 = vpack.c.bf16 %v3699_v9, %v3695_v42  ;;  %v8654_v4 = vpack.c.bf16 %v3701_v39, %v3697_v45  ;;  %v3720_v25 = vld [vmem:[#allocation4 + $0x510] sm:$0xff]  ;;  %v3727_v42 = vld [vmem:[#allocation4 + $0x548] sm:$0xff]  ;;  %v3729_v9 = vld [vmem:[#allocation4 + $0x558] sm:$0xff] }
 0xff6   :  { %v3724_v17 = vld [vmem:[#allocation4 + $0x530] sm:$0xff]  ;;  %v3733_v45 = vld [vmem:[#allocation4 + $0x578] sm:$0xff] }
 0xff8   :  { %6694 = vmatpush1.bf16.msra.mxu0 %v6693_v18  ;;  %6726 = vmatpush1.bf16.msra.mxu1 %v6725_v3  ;;  %v5406_v18 = vrot.slane %v8196_v13, 7  ;;  %v3705_v3 = vld [vmem:[#allocation4 + $0x498] sm:$0xff]  ;;  %v3702_v13 = vld [vmem:[#allocation4 + $0x480] sm:$0xff] }
 0xff9   :  { %6728 = vmatprep.subr.bf16.mxu0 %v8634_v1  ;;  %6760 = vmatprep.subr.bf16.mxu1 %v8636_v35 }
0x10ad   :  { %v3494_v43 = vpop.f32.mrb[34].mxu0  ;;  %v3565_v7 = vpop.f32.mrb[34].mxu1 }
0x10ae   :  { %v3574_v44 = vrot.slane %v3494_v43, 1  ;;  %v3496_v61 = vpop.f32.mrb[35].mxu0  ;;  %v3567_v49 = vpop.f32.mrb[35].mxu1  ;;  %v3576_v47 = vrot.slane %v3565_v7, 1  ;;  %v8664_v7 = vpack.c.bf16 %v3698_v55, %v3694_v51  ;;  %v3730_v51 = vld [vmem:[#allocation4 + $0x560] sm:$0xff] }
0x10af   :  { %v3575_v24 = vrot.slane %v3496_v61, 1  ;;  %v3577_v48 = vrot.slane %v3567_v49, 1  ;;  %v3706_v61 = vld [vmem:[#allocation4 + $0x4a0] sm:$0xff]  ;;  %v8672_v49 = vpack.c.bf16 %v3709_v62, %v3705_v3 }
0x10b0   :  { %v3582_v8 = vadd.f32 %v3574_v44, %v8336_v12  ;;  %v3584_v32 = vadd.f32 %v3576_v47, %v8347_v54  ;;  %v3686_v54 = vld [vmem:[#allocation4 + $0x400] sm:$0xff]  ;;  %v8666_v44 = vpack.c.bf16 %v3700_v41, %v3696_v36  ;;  %v8710_v36 = vpack.c.bf16 %v3733_v45, %v3729_v9  ;;  %v3728_v41 = vld [vmem:[#allocation4 + $0x550] sm:$0xff] }
0x10b1   :  { %v3583_v50 = vadd.f32 %v3575_v24, %v8338_v16  ;;  %v3585_v58 = vadd.f32 %v3577_v48, %v8343_v38  ;;  %v8648_v56 = vpack.c.bf16 %v3690_v53, %v3686_v54  ;;  %v3704_v24 = vld [vmem:[#allocation4 + $0x490] sm:$0xff]  ;;  %v3717_v48 = vld [vmem:[#allocation4 + $0x4f8] sm:$0xff] }
0x10b2   :  { %v5483_v28 = vmul.f32 -1.442695, %v3582_v8  ;;  %v3708_v8 = vld [vmem:[#allocation4 + $0x4b0] sm:$0xff] }
0x10b3   :  { %v5484_v21 = vmul.f32 -1.442695, %v3583_v50  ;;  %v5485_v34 = vmul.f32 -1.442695, %v3585_v58  ;;  %v3711_v50 = vld [vmem:[#allocation4 + $0x4c8] sm:$0xff]  ;;  %v8678_v58 = vpack.c.bf16 %v3706_v61, %v3702_v13  ;;  %v8680_v47 = vpack.c.bf16 %v3708_v8, %v3704_v24  ;;  %v3734_v13 = vld [vmem:[#allocation4 + $0x580] sm:$0xff] }
0x10b4   :  { %7484 = vpow2.f32 %v5483_v28  ;;  %v3715_v28 = vld [vmem:[#allocation4 + $0x4e8] sm:$0xff]  ;;  %v3738_v61 = vld [vmem:[#allocation4 + $0x5a0] sm:$0xff] }
0x10b5   :  { %7486 = vpow2.f32 %v5484_v21  ;;  %v3713_v21 = vld [vmem:[#allocation4 + $0x4d8] sm:$0xff] }
0x10b6   :  { %7488 = vpow2.f32 %v5485_v34  ;;  %v3710_v34 = vld [vmem:[#allocation4 + $0x4c0] sm:$0xff] }
0x10b7   :  { %7490 = vtanh.f32 %v3584_v32  ;;  %v3714_v32 = vld [vmem:[#allocation4 + $0x4e0] sm:$0xff] }
0x10be   :  { %v7485_v30 = vpop.eup %7484 }
0x10bf   :  { %v7487_v60 = vpop.eup %7486  ;;  %v3595_v2 = vadd.f32 1.0, %v7485_v30  ;;  %v8684_v30 = vpack.c.bf16 %v3715_v28, %v3711_v50  ;;  %v3736_v50 = vld [vmem:[#allocation4 + $0x590] sm:$0xff] }
0x10c0   :  { %v3596_v27 = vadd.f32 1.0, %v7487_v60  ;;  %v7489_v12 = vpop.eup %7488  ;;  %v8686_v60 = vpack.c.bf16 %v3717_v48, %v3713_v21  ;;  %v3740_v28 = vld [vmem:[#allocation4 + $0x5b0] sm:$0xff]  ;;  %v3743_v21 = vld [vmem:[#allocation4 + $0x5c8] sm:$0xff] }
0x10c1   :  { %7492 = vrcp.f32 %v3595_v2  ;;  %v7491_v16 = vpop.eup %7490  ;;  %v3597_v38 = vadd.f32 1.0, %v7489_v12  ;;  %v3712_v2 = vld [vmem:[#allocation4 + $0x4d0] sm:$0xff]  ;;  %v3719_v12 = vld [vmem:[#allocation4 + $0x508] sm:$0xff] }
0x10c2   :  { %7494 = vrcp.f32 %v3596_v27  ;;  %v3716_v27 = vld [vmem:[#allocation4 + $0x4f0] sm:$0xff]  ;;  %v3747_v48 = vld [vmem:[#allocation4 + $0x5e8] sm:$0xff] }
0x10c3   :  { %7496 = vrcp.f32 %v3597_v38  ;;  %v3718_v38 = vld [vmem:[#allocation4 + $0x500] sm:$0xff] }
0x10cb   :  { %v7493_v15 = vpop.eup %7492 }
0x10cc   :  { %v7495_v11 = vpop.eup %7494  ;;  %v3609_v22 = vmul.f32 %v7493_v15, %v7491_v16  ;;  %v3723_v16 = vld [vmem:[#allocation4 + $0x528] sm:$0xff]  ;;  %v3721_v15 = vld [vmem:[#allocation4 + $0x518] sm:$0xff] }
0x10cd   :  { %v3608_v23 = vmul.f32 %v7495_v11, %v3606_v10  ;;  %v7497_v33 = vpop.eup %7496  ;;  %v3725_v10 = vld [vmem:[#allocation4 + $0x538] sm:$0xff]  ;;  %v8690_v11 = vpack.c.bf16 %v3714_v32, %v3710_v34  ;;  %v8696_v54 = vpack.c.bf16 %v3723_v16, %v3719_v12  ;;  %v3742_v12 = vld [vmem:[#allocation4 + $0x5c0] sm:$0xff]  ;;  %v8732_v16 = vpack.c.bf16 %v3747_v48, %v3743_v21 }
0x10ce   :  { %v8698_v53 = vpack.c.bf16 %v3725_v10, %v3721_v15  ;;  %v3745_v34 = vld [vmem:[#allocation4 + $0x5d8] sm:$0xff]  ;;  %v3746_v10 = vld [vmem:[#allocation4 + $0x5e0] sm:$0xff] }
0x10cf   :  { %v8645_v52 = vadd.f32 %v3609_v22, %v3608_v23  ;;  %v8692_v22 = vpack.c.bf16 %v3716_v27, %v3712_v2  ;;  %v3722_v23 = vld [vmem:[#allocation4 + $0x520] sm:$0xff]  ;;  %v3749_v32 = vld [vmem:[#allocation4 + $0x5f8] sm:$0xff]  ;;  %v8726_v2 = vpack.c.bf16 %v3738_v61, %v3734_v13  ;;  %v8728_v27 = vpack.c.bf16 %v3740_v28, %v3736_v50 }
0x10d0   :  { %v8702_v39 = vpack.c.bf16 %v3722_v23, %v3718_v38  ;;  %v8734_v15 = vpack.c.bf16 %v3749_v32, %v3745_v34  ;;  %v3744_v38 = vld [vmem:[#allocation4 + $0x5d0] sm:$0xff] }
0x10d1   :  { %7498 = vtanh.f32 %v8645_v52  ;;  %v3748_v23 = vld [vmem:[#allocation4 + $0x5f0] sm:$0xff] }
0x10db   :  { %v7499_v40 = vpop.eup %7498 }
0x10dc   :  { %v3612_v14 = vmul.f32 %v7499_v40, %v7497_v33  ;;  %v3731_v33 = vld [vmem:[#allocation4 + $0x568] sm:$0xff]  ;;  %v8704_v40 = vpack.c.bf16 %v3724_v17, %v3720_v25  ;;  %v8738_v25 = vpack.c.bf16 %v3746_v10, %v3742_v12  ;;  %v8740_v17 = vpack.c.bf16 %v3748_v23, %v3744_v38 }
0x10dd   :  { %v8708_v55 = vpack.c.bf16 %v3731_v33, %v3727_v42 }
0x10de   :  { %v3619_v26 = vsel %vm1833_vm6, %v8630_v5, %v3612_v14  ;;  %v5409_v46 = vrot.slane %v3612_v14, 6  ;;  %v8670_v5 = vpack.c.bf16 %v3707_v59, %v3703_v6  ;;  %v3726_v14 = vld [vmem:[#allocation4 + $0x540] sm:$0xff]  ;;  %v3732_v6 = vld [vmem:[#allocation4 + $0x570] sm:$0xff]  ;;  %v3741_v59 = vld [vmem:[#allocation4 + $0x5b8] sm:$0xff] }
0x10df   :  { %3838 = vmatmul.mubr.f32.vlgmr.msra.gmra.mrb[36].mxu0 %v3619_v26  ;;  %3909 = vmatmul.mubr.f32.vlgmr.msra.gmra.mrb[36].mxu1 %v3619_v26  ;;  %v3739_v26 = vld [vmem:[#allocation4 + $0x5a8] sm:$0xff]  ;;  %v8714_v3 = vpack.c.bf16 %v3730_v51, %v3726_v14  ;;  %v8716_v62 = vpack.c.bf16 %v3732_v6, %v3728_v41 }
0x10e0   :  { %v8660_v43 = vsel %vm1821_vm0, %v5406_v18, %v5409_v46  ;;  %6730 = vmatpush1.bf16.msra.mxu0 %v8648_v56  ;;  %6762 = vmatpush1.bf16.msra.mxu1 %v8650_v19  ;;  %v3735_v18 = vld [vmem:[#allocation4 + $0x588] sm:$0xff]  ;;  %v3737_v46 = vld [vmem:[#allocation4 + $0x598] sm:$0xff] }
0x10e1   :  { %6732 = vmatprep.subr.bf16.mxu0 %v8652_v63  ;;  %6764 = vmatprep.subr.bf16.mxu1 %v8654_v4  ;;  %v8720_v24 = vpack.c.bf16 %v3739_v26, %v3735_v18  ;;  %v8722_v8 = vpack.c.bf16 %v3741_v59, %v3737_v46  ;;  %v5486_v14 = vld [vmem:[%s9102_s3 + $0x8] sm:$0xf] }
0x10e2   :  { %3979 = vmatprep.mubr.f32.mxu0 %v7680_v0  ;;  %4050 = vmatprep.mubr.f32.mxu1 %v7680_v0  ;;  %v3756_v51 = vrot.slane %v5486_v14, %v7871_v29  ;;  %v3760_v41 = vrot.slane %v5486_v14, %v7876_v31  ;;  %v3768_v50 = vrot.slane %v5486_v14, %v7880_v37 }
0x10e3   :  { %v3764_v31 = vrot.slane %v5486_v14, %v7889_v57 }
0x10e4   :  { %6734 = vmatpush1.bf16.msra.mxu0 %v8664_v7  ;;  %6766 = vmatpush1.bf16.msra.mxu1 %v8666_v44 }
0x10e5   :  { %6736 = vmatprep.subr.bf16.mxu0 %v8670_v5  ;;  %6768 = vmatprep.subr.bf16.mxu1 %v8672_v49 }
0x10e8   :  { %6738 = vmatpush1.bf16.msra.mxu0 %v8678_v58  ;;  %6770 = vmatpush1.bf16.msra.mxu1 %v8680_v47 }
0x10e9   :  { %6740 = vmatprep.subr.bf16.mxu0 %v8684_v30  ;;  %6772 = vmatprep.subr.bf16.mxu1 %v8686_v60 }
0x10ec   :  { %6742 = vmatpush1.bf16.msra.mxu0 %v8690_v11  ;;  %6774 = vmatpush1.bf16.msra.mxu1 %v8692_v22 }
0x10ed   :  { %6744 = vmatprep.subr.bf16.mxu0 %v8696_v54  ;;  %6776 = vmatprep.subr.bf16.mxu1 %v8698_v53 }
0x10f0   :  { %6746 = vmatpush1.bf16.msra.mxu0 %v8702_v39  ;;  %6778 = vmatpush1.bf16.msra.mxu1 %v8704_v40 }
0x10f1   :  { %6748 = vmatprep.subr.bf16.mxu0 %v8708_v55  ;;  %6780 = vmatprep.subr.bf16.mxu1 %v8710_v36 }
0x10f4   :  { %6750 = vmatpush1.bf16.msra.mxu0 %v8714_v3  ;;  %6782 = vmatpush1.bf16.msra.mxu1 %v8716_v62 }
0x10f5   :  { %6752 = vmatprep.subr.bf16.mxu0 %v8720_v24  ;;  %6784 = vmatprep.subr.bf16.mxu1 %v8722_v8 }
0x10f8   :  { %6754 = vmatpush1.bf16.msra.mxu0 %v8726_v2  ;;  %6786 = vmatpush1.bf16.msra.mxu1 %v8728_v27 }
0x10f9   :  { %6756 = vmatprep.subr.bf16.mxu0 %v8732_v16  ;;  %6788 = vmatprep.subr.bf16.mxu1 %v8734_v15 }
0x10fc   :  { %6758 = vmatpush1.bf16.msra.mxu0 %v8738_v25  ;;  %6790 = vmatpush1.bf16.msra.mxu1 %v8740_v17 }
0x10fd   :  { %6792 = vmatprep.subr.bf16.mxu0 %v8634_v1  ;;  %6824 = vmatprep.subr.bf16.mxu1 %v8636_v35 }
0x10ff   :  { %3980 = vmatmul.mubr.f32.vlgmr.msra.gmra.mrb[38].mxu0 %v7680_v0  ;;  %4051 = vmatmul.mubr.f32.vlgmr.msra.gmra.mrb[38].mxu1 %v7680_v0 }
0x1100   :  { %6794 = vmatpush1.bf16.msra.mxu0 %v8648_v56  ;;  %6826 = vmatpush1.bf16.msra.mxu1 %v8650_v19 }
0x1101   :  { %6796 = vmatprep.subr.bf16.mxu0 %v8652_v63  ;;  %6828 = vmatprep.subr.bf16.mxu1 %v8654_v4 }
0x1102   :  { %4149 = vmatprep.mubr.f32.mxu0 %v7680_v0  ;;  %4220 = vmatprep.mubr.f32.mxu1 %v7680_v0 }
0x1104   :  { %6798 = vmatpush1.bf16.msra.mxu0 %v8664_v7  ;;  %6830 = vmatpush1.bf16.msra.mxu1 %v8666_v44 }
0x1105   :  { %6800 = vmatprep.subr.bf16.mxu0 %v8670_v5  ;;  %6832 = vmatprep.subr.bf16.mxu1 %v8672_v49 }
0x1108   :  { %6802 = vmatpush1.bf16.msra.mxu0 %v8678_v58  ;;  %6834 = vmatpush1.bf16.msra.mxu1 %v8680_v47 }
0x1109   :  { %6804 = vmatprep.subr.bf16.mxu0 %v8684_v30  ;;  %6836 = vmatprep.subr.bf16.mxu1 %v8686_v60 }
0x110c   :  { %6806 = vmatpush1.bf16.msra.mxu0 %v8690_v11  ;;  %6838 = vmatpush1.bf16.msra.mxu1 %v8692_v22 }
0x110d   :  { %6808 = vmatprep.subr.bf16.mxu0 %v8696_v54  ;;  %6840 = vmatprep.subr.bf16.mxu1 %v8698_v53 }
0x1110   :  { %6810 = vmatpush1.bf16.msra.mxu0 %v8702_v39  ;;  %6842 = vmatpush1.bf16.msra.mxu1 %v8704_v40 }
0x1111   :  { %6812 = vmatprep.subr.bf16.mxu0 %v8708_v55  ;;  %6844 = vmatprep.subr.bf16.mxu1 %v8710_v36 }
0x1114   :  { %6814 = vmatpush1.bf16.msra.mxu0 %v8714_v3  ;;  %6846 = vmatpush1.bf16.msra.mxu1 %v8716_v62 }
0x1115   :  { %6816 = vmatprep.subr.bf16.mxu0 %v8720_v24  ;;  %6848 = vmatprep.subr.bf16.mxu1 %v8722_v8 }
0x1118   :  { %6818 = vmatpush1.bf16.msra.mxu0 %v8726_v2  ;;  %6850 = vmatpush1.bf16.msra.mxu1 %v8728_v27 }
0x1119   :  { %6820 = vmatprep.subr.bf16.mxu0 %v8732_v16  ;;  %6852 = vmatprep.subr.bf16.mxu1 %v8734_v15 }
0x111c   :  { %6822 = vmatpush1.bf16.msra.mxu0 %v8738_v25  ;;  %6854 = vmatpush1.bf16.msra.mxu1 %v8740_v17 }
0x111d   :  { %6856 = vmatprep.subr.bf16.mxu0 %v8634_v1  ;;  %6888 = vmatprep.subr.bf16.mxu1 %v8636_v35 }
0x11b2   :  { %v3839_v42 = vpop.f32.mrb[36].mxu0  ;;  %v3910_v33 = vpop.f32.mrb[36].mxu1 }
0x11b3   :  { %v3841_v9 = vpop.f32.mrb[37].mxu0  ;;  %v3912_v45 = vpop.f32.mrb[37].mxu1  ;;  %v8789_v6 = vadd.f32 %v3839_v42, %v3756_v51  ;;  %v8800_v32 = vadd.f32 %v3910_v33, %v3764_v31 }
0x11b4   :  { %v8791_v18 = vadd.f32 %v3841_v9, %v3760_v41  ;;  %v8796_v29 = vadd.f32 %v3912_v45, %v3768_v50 }
0x11d2   :  { %v3981_v26 = vpop.f32.mrb[38].mxu0  ;;  %v4052_v46 = vpop.f32.mrb[38].mxu1 }
0x11d3   :  { %v4057_v59 = vadd.f32 %v3981_v26, %v8789_v6  ;;  %v3983_v13 = vpop.f32.mrb[39].mxu0  ;;  %v4054_v61 = vpop.f32.mrb[39].mxu1  ;;  %v4059_v10 = vadd.f32 %v4052_v46, %v8800_v32 }
0x11d4   :  { %v4058_v28 = vadd.f32 %v3983_v13, %v8791_v18  ;;  %v4060_v34 = vadd.f32 %v4054_v61, %v8796_v29 }
0x11d5   :  { %v5487_v21 = vmul.f32 -1.442695, %v4057_v59 }
0x11d6   :  { %v5488_v48 = vmul.f32 -1.442695, %v4058_v28  ;;  %v5489_v12 = vmul.f32 -1.442695, %v4060_v34 }
0x11d7   :  { %7500 = vpow2.f32 %v5487_v21 }
0x11d8   :  { %7502 = vpow2.f32 %v5488_v48 }
0x11d9   :  { %7504 = vpow2.f32 %v5489_v12 }
0x11da   :  { %7506 = vtanh.f32 %v4059_v10 }
0x11e1   :  { %v7501_v38 = vpop.eup %7500 }
0x11e2   :  { %v7503_v23 = vpop.eup %7502  ;;  %v4070_v37 = vadd.f32 1.0, %v7501_v38 }
0x11e3   :  { %v4071_v42 = vadd.f32 1.0, %v7503_v23  ;;  %v7505_v9 = vpop.eup %7504 }
0x11e4   :  { %7508 = vrcp.f32 %v4070_v37  ;;  %v7507_v45 = vpop.eup %7506  ;;  %v4072_v14 = vadd.f32 1.0, %v7505_v9 }
0x11e5   :  { %7510 = vrcp.f32 %v4071_v42 }
0x11e6   :  { %7512 = vrcp.f32 %v4072_v14 }
0x11ee   :  { %v7509_v51 = vpop.eup %7508 }
0x11ef   :  { %v7511_v41 = vpop.eup %7510  ;;  %v4081_v57 = vmul.f32 %v7509_v51, %v7507_v45 }
0x11f0   :  { %v4080_v26 = vmul.f32 0.0, %v7511_v41  ;;  %v7513_v46 = vpop.eup %7512 }
0x11f2   :  { %v8803_v33 = vadd.f32 %v4081_v57, %v4080_v26 }
0x11f4   :  { %7514 = vtanh.f32 %v8803_v33 }
0x11fe   :  { %v7515_v59 = vpop.eup %7514 }
0x11ff   :  { %v8806_v13 = vmul.f32 %v7515_v59, %v7513_v46 }
0x1201   :  { %4150 = vmatmul.mubr.f32.vlgmr.msra.gmra.mrb[40].mxu0 %v8806_v13  ;;  %4221 = vmatmul.mubr.f32.vlgmr.msra.gmra.mrb[40].mxu1 %v8806_v13 }
0x1202   :  { %6858 = vmatpush1.bf16.msra.mxu0 %v8648_v56  ;;  %6890 = vmatpush1.bf16.msra.mxu1 %v8650_v19 }
0x1203   :  { %6860 = vmatprep.subr.bf16.mxu0 %v8652_v63  ;;  %6892 = vmatprep.subr.bf16.mxu1 %v8654_v4 }
0x1204   :  { %4337 = vmatprep.mubr.f32.mxu0 %v7680_v0  ;;  %4408 = vmatprep.mubr.f32.mxu1 %v7680_v0 }
0x1206   :  { %6862 = vmatpush1.bf16.msra.mxu0 %v8664_v7  ;;  %6894 = vmatpush1.bf16.msra.mxu1 %v8666_v44 }
0x1207   :  { %6864 = vmatprep.subr.bf16.mxu0 %v8670_v5  ;;  %6896 = vmatprep.subr.bf16.mxu1 %v8672_v49 }
0x120a   :  { %6866 = vmatpush1.bf16.msra.mxu0 %v8678_v58  ;;  %6898 = vmatpush1.bf16.msra.mxu1 %v8680_v47 }
0x120b   :  { %6868 = vmatprep.subr.bf16.mxu0 %v8684_v30  ;;  %6900 = vmatprep.subr.bf16.mxu1 %v8686_v60 }
0x120e   :  { %6870 = vmatpush1.bf16.msra.mxu0 %v8690_v11  ;;  %6902 = vmatpush1.bf16.msra.mxu1 %v8692_v22 }
0x120f   :  { %6872 = vmatprep.subr.bf16.mxu0 %v8696_v54  ;;  %6904 = vmatprep.subr.bf16.mxu1 %v8698_v53 }
0x1212   :  { %6874 = vmatpush1.bf16.msra.mxu0 %v8702_v39  ;;  %6906 = vmatpush1.bf16.msra.mxu1 %v8704_v40 }
0x1213   :  { %6876 = vmatprep.subr.bf16.mxu0 %v8708_v55  ;;  %6908 = vmatprep.subr.bf16.mxu1 %v8710_v36 }
0x1216   :  { %6878 = vmatpush1.bf16.msra.mxu0 %v8714_v3  ;;  %6910 = vmatpush1.bf16.msra.mxu1 %v8716_v62 }
0x1217   :  { %6880 = vmatprep.subr.bf16.mxu0 %v8720_v24  ;;  %6912 = vmatprep.subr.bf16.mxu1 %v8722_v8 }
0x121a   :  { %6882 = vmatpush1.bf16.msra.mxu0 %v8726_v2  ;;  %6914 = vmatpush1.bf16.msra.mxu1 %v8728_v27 }
0x121b   :  { %6884 = vmatprep.subr.bf16.mxu0 %v8732_v16  ;;  %6916 = vmatprep.subr.bf16.mxu1 %v8734_v15 }
0x121e   :  { %6886 = vmatpush1.bf16.msra.mxu0 %v8738_v25  ;;  %6918 = vmatpush1.bf16.msra.mxu1 %v8740_v17 }
0x121f   :  { %6920 = vmatprep.subr.bf16.mxu0 %v8634_v1  ;;  %6952 = vmatprep.subr.bf16.mxu1 %v8636_v35 }
0x12d4   :  { %v4151_v61 = vpop.f32.mrb[40].mxu0  ;;  %v4222_v50 = vpop.f32.mrb[40].mxu1 }
0x12d5   :  { %v4231_v28 = vrot.slane %v4151_v61, 7  ;;  %v4153_v21 = vpop.f32.mrb[41].mxu0  ;;  %v4224_v48 = vpop.f32.mrb[41].mxu1  ;;  %v4233_v42 = vrot.slane %v4222_v50, 7  ;;  %v4263_v61 = vrot.slane %v8803_v33, 7 }
0x12d6   :  { %v4232_v31 = vrot.slane %v4153_v21, 7  ;;  %v4234_v23 = vrot.slane %v4224_v48, 7 }
0x12d7   :  { %v4239_v34 = vadd.f32 %v4231_v28, %v8789_v6  ;;  %v4241_v45 = vadd.f32 %v4233_v42, %v8800_v32 }
0x12d8   :  { %v4240_v12 = vadd.f32 %v4232_v31, %v8791_v18  ;;  %v4242_v37 = vadd.f32 %v4234_v23, %v8796_v29 }
0x12d9   :  { %v5490_v10 = vmul.f32 -1.442695, %v4239_v34 }
0x12da   :  { %v5491_v38 = vmul.f32 -1.442695, %v4240_v12  ;;  %v5492_v9 = vmul.f32 -1.442695, %v4242_v37 }
0x12db   :  { %7516 = vpow2.f32 %v5490_v10 }
0x12dc   :  { %7518 = vpow2.f32 %v5491_v38 }
0x12dd   :  { %7520 = vpow2.f32 %v5492_v9 }
0x12de   :  { %7522 = vtanh.f32 %v4241_v45 }
0x12e5   :  { %v7517_v51 = vpop.eup %7516 }
0x12e6   :  { %v7519_v41 = vpop.eup %7518  ;;  %v4252_v57 = vadd.f32 1.0, %v7517_v51 }
0x12e7   :  { %v4253_v14 = vadd.f32 1.0, %v7519_v41  ;;  %v7521_v26 = vpop.eup %7520 }
0x12e8   :  { %7524 = vrcp.f32 %v4252_v57  ;;  %v7523_v46 = vpop.eup %7522  ;;  %v4254_v48 = vadd.f32 1.0, %v7521_v26 }
0x12e9   :  { %7526 = vrcp.f32 %v4253_v14 }
0x12ea   :  { %7528 = vrcp.f32 %v4254_v48 }
0x12f2   :  { %v7525_v59 = vpop.eup %7524 }
0x12f3   :  { %v7527_v28 = vpop.eup %7526  ;;  %v4266_v21 = vmul.f32 %v7525_v59, %v7523_v46 }
0x12f4   :  { %v4265_v50 = vmul.f32 %v7527_v28, %v4263_v61  ;;  %v7529_v34 = vpop.eup %7528 }
0x12f6   :  { %v8849_v31 = vadd.f32 %v4266_v21, %v4265_v50 }
0x12f8   :  { %7530 = vtanh.f32 %v8849_v31 }
0x1302   :  { %v7531_v12 = vpop.eup %7530 }
0x1303   :  { %v8852_v10 = vmul.f32 %v7531_v12, %v7529_v34 }
0x1305   :  { %v4271_v38 = vrot.slane %v8852_v10, 1 }
0x1307   :  { %4338 = vmatmul.mubr.f32.vlgmr.msra.gmra.mrb[42].mxu0 %v4271_v38  ;;  %4409 = vmatmul.mubr.f32.vlgmr.msra.gmra.mrb[42].mxu1 %v4271_v38 }
0x1308   :  { %6922 = vmatpush1.bf16.msra.mxu0 %v8648_v56  ;;  %6954 = vmatpush1.bf16.msra.mxu1 %v8650_v19 }
0x1309   :  { %6924 = vmatprep.subr.bf16.mxu0 %v8652_v63  ;;  %6956 = vmatprep.subr.bf16.mxu1 %v8654_v4 }
0x130a   :  { %4525 = vmatprep.mubr.f32.mxu0 %v7680_v0  ;;  %4596 = vmatprep.mubr.f32.mxu1 %v7680_v0 }
0x130c   :  { %6926 = vmatpush1.bf16.msra.mxu0 %v8664_v7  ;;  %6958 = vmatpush1.bf16.msra.mxu1 %v8666_v44 }
0x130d   :  { %6928 = vmatprep.subr.bf16.mxu0 %v8670_v5  ;;  %6960 = vmatprep.subr.bf16.mxu1 %v8672_v49 }
0x1310   :  { %6930 = vmatpush1.bf16.msra.mxu0 %v8678_v58  ;;  %6962 = vmatpush1.bf16.msra.mxu1 %v8680_v47 }
0x1311   :  { %6932 = vmatprep.subr.bf16.mxu0 %v8684_v30  ;;  %6964 = vmatprep.subr.bf16.mxu1 %v8686_v60 }
0x1314   :  { %6934 = vmatpush1.bf16.msra.mxu0 %v8690_v11  ;;  %6966 = vmatpush1.bf16.msra.mxu1 %v8692_v22 }
0x1315   :  { %6936 = vmatprep.subr.bf16.mxu0 %v8696_v54  ;;  %6968 = vmatprep.subr.bf16.mxu1 %v8698_v53 }
0x1318   :  { %6938 = vmatpush1.bf16.msra.mxu0 %v8702_v39  ;;  %6970 = vmatpush1.bf16.msra.mxu1 %v8704_v40 }
0x1319   :  { %6940 = vmatprep.subr.bf16.mxu0 %v8708_v55  ;;  %6972 = vmatprep.subr.bf16.mxu1 %v8710_v36 }
0x131c   :  { %6942 = vmatpush1.bf16.msra.mxu0 %v8714_v3  ;;  %6974 = vmatpush1.bf16.msra.mxu1 %v8716_v62 }
0x131d   :  { %6944 = vmatprep.subr.bf16.mxu0 %v8720_v24  ;;  %6976 = vmatprep.subr.bf16.mxu1 %v8722_v8 }
0x1320   :  { %6946 = vmatpush1.bf16.msra.mxu0 %v8726_v2  ;;  %6978 = vmatpush1.bf16.msra.mxu1 %v8728_v27 }
0x1321   :  { %6948 = vmatprep.subr.bf16.mxu0 %v8732_v16  ;;  %6980 = vmatprep.subr.bf16.mxu1 %v8734_v15 }
0x1324   :  { %6950 = vmatpush1.bf16.msra.mxu0 %v8738_v25  ;;  %6982 = vmatpush1.bf16.msra.mxu1 %v8740_v17 }
0x1325   :  { %6984 = vmatprep.subr.bf16.mxu0 %v8634_v1  ;;  %7016 = vmatprep.subr.bf16.mxu1 %v8636_v35 }
0x13da   :  { %v4339_v33 = vpop.f32.mrb[42].mxu0  ;;  %v4410_v23 = vpop.f32.mrb[42].mxu1 }
0x13db   :  { %v4419_v37 = vrot.slane %v4339_v33, 6  ;;  %v4341_v42 = vpop.f32.mrb[43].mxu0  ;;  %v4412_v9 = vpop.f32.mrb[43].mxu1  ;;  %v4421_v59 = vrot.slane %v4410_v23, 6 }
0x13dc   :  { %v4420_v45 = vrot.slane %v4341_v42, 6  ;;  %v4422_v26 = vrot.slane %v4412_v9, 6 }
0x13dd   :  { %v4427_v51 = vadd.f32 %v4419_v37, %v8789_v6  ;;  %v4429_v28 = vadd.f32 %v4421_v59, %v8800_v32  ;;  %v4451_v37 = vrot.slane %v8849_v31, 7 }
0x13de   :  { %v4428_v41 = vadd.f32 %v4420_v45, %v8791_v18  ;;  %v4430_v46 = vadd.f32 %v4422_v26, %v8796_v29  ;;  %v5398_v26 = vsel %vm1821_vm0, %v8806_v13, %v8852_v10 }
0x13df   :  { %v5493_v57 = vmul.f32 -1.442695, %v4427_v51 }
0x13e0   :  { %v5494_v14 = vmul.f32 -1.442695, %v4428_v41  ;;  %v5495_v61 = vmul.f32 -1.442695, %v4430_v46 }
0x13e1   :  { %7532 = vpow2.f32 %v5493_v57 }
0x13e2   :  { %7534 = vpow2.f32 %v5494_v14 }
0x13e3   :  { %7536 = vpow2.f32 %v5495_v61 }
0x13e4   :  { %7538 = vtanh.f32 %v4429_v28 }
0x13eb   :  { %v7533_v21 = vpop.eup %7532 }
0x13ec   :  { %v7535_v48 = vpop.eup %7534  ;;  %v4440_v50 = vadd.f32 1.0, %v7533_v21 }
0x13ed   :  { %v4441_v34 = vadd.f32 1.0, %v7535_v48  ;;  %v7537_v12 = vpop.eup %7536 }
0x13ee   :  { %7540 = vrcp.f32 %v4440_v50  ;;  %v7539_v38 = vpop.eup %7538  ;;  %v4442_v45 = vadd.f32 1.0, %v7537_v12 }
0x13ef   :  { %7542 = vrcp.f32 %v4441_v34 }
0x13f0   :  { %7544 = vrcp.f32 %v4442_v45 }
0x13f8   :  { %v7541_v33 = vpop.eup %7540 }
0x13f9   :  { %v7543_v42 = vpop.eup %7542  ;;  %v4454_v9 = vmul.f32 %v7541_v33, %v7539_v38 }
0x13fa   :  { %v4453_v23 = vmul.f32 %v7543_v42, %v4451_v37  ;;  %v7545_v41 = vpop.eup %7544 }
0x13fc   :  { %v8894_v51 = vadd.f32 %v4454_v9, %v4453_v23 }
0x13fe   :  { %7546 = vtanh.f32 %v8894_v51 }
0x1408   :  { %v7547_v57 = vpop.eup %7546 }
0x1409   :  { %v4457_v14 = vmul.f32 %v7547_v57, %v7545_v41 }
0x140b   :  { %v4459_v46 = vrot.slane %v4457_v14, 2  ;;  %v8901_v59 = vsel %vm1823_vm1, %v5398_v26, %v4457_v14 }
0x140d   :  { %4526 = vmatmul.mubr.f32.vlgmr.msra.gmra.mrb[44].mxu0 %v4459_v46  ;;  %4597 = vmatmul.mubr.f32.vlgmr.msra.gmra.mrb[44].mxu1 %v4459_v46 }
0x140e   :  { %6986 = vmatpush1.bf16.msra.mxu0 %v8648_v56  ;;  %7018 = vmatpush1.bf16.msra.mxu1 %v8650_v19 }
0x140f   :  { %6988 = vmatprep.subr.bf16.mxu0 %v8652_v63  ;;  %7020 = vmatprep.subr.bf16.mxu1 %v8654_v4 }
0x1410   :  { %4713 = vmatprep.mubr.f32.mxu0 %v7680_v0  ;;  %4784 = vmatprep.mubr.f32.mxu1 %v7680_v0 }
0x1412   :  { %6990 = vmatpush1.bf16.msra.mxu0 %v8664_v7  ;;  %7022 = vmatpush1.bf16.msra.mxu1 %v8666_v44 }
0x1413   :  { %6992 = vmatprep.subr.bf16.mxu0 %v8670_v5  ;;  %7024 = vmatprep.subr.bf16.mxu1 %v8672_v49 }
0x1416   :  { %6994 = vmatpush1.bf16.msra.mxu0 %v8678_v58  ;;  %7026 = vmatpush1.bf16.msra.mxu1 %v8680_v47 }
0x1417   :  { %6996 = vmatprep.subr.bf16.mxu0 %v8684_v30  ;;  %7028 = vmatprep.subr.bf16.mxu1 %v8686_v60 }
0x141a   :  { %6998 = vmatpush1.bf16.msra.mxu0 %v8690_v11  ;;  %7030 = vmatpush1.bf16.msra.mxu1 %v8692_v22 }
0x141b   :  { %7000 = vmatprep.subr.bf16.mxu0 %v8696_v54  ;;  %7032 = vmatprep.subr.bf16.mxu1 %v8698_v53 }
0x141e   :  { %7002 = vmatpush1.bf16.msra.mxu0 %v8702_v39  ;;  %7034 = vmatpush1.bf16.msra.mxu1 %v8704_v40 }
0x141f   :  { %7004 = vmatprep.subr.bf16.mxu0 %v8708_v55  ;;  %7036 = vmatprep.subr.bf16.mxu1 %v8710_v36 }
0x1422   :  { %7006 = vmatpush1.bf16.msra.mxu0 %v8714_v3  ;;  %7038 = vmatpush1.bf16.msra.mxu1 %v8716_v62 }
0x1423   :  { %7008 = vmatprep.subr.bf16.mxu0 %v8720_v24  ;;  %7040 = vmatprep.subr.bf16.mxu1 %v8722_v8 }
0x1426   :  { %7010 = vmatpush1.bf16.msra.mxu0 %v8726_v2  ;;  %7042 = vmatpush1.bf16.msra.mxu1 %v8728_v27 }
0x1427   :  { %7012 = vmatprep.subr.bf16.mxu0 %v8732_v16  ;;  %7044 = vmatprep.subr.bf16.mxu1 %v8734_v15 }
0x142a   :  { %7014 = vmatpush1.bf16.msra.mxu0 %v8738_v25  ;;  %7046 = vmatpush1.bf16.msra.mxu1 %v8740_v17 }
0x142b   :  { %7048 = vmatprep.subr.bf16.mxu0 %v8634_v1  ;;  %7080 = vmatprep.subr.bf16.mxu1 %v8636_v35 }
0x14e0   :  { %v4527_v13 = vpop.f32.mrb[44].mxu0  ;;  %v4598_v31 = vpop.f32.mrb[44].mxu1 }
0x14e1   :  { %v4607_v10 = vrot.slane %v4527_v13, 5  ;;  %v4529_v61 = vpop.f32.mrb[45].mxu0  ;;  %v4600_v28 = vpop.f32.mrb[45].mxu1  ;;  %v4609_v37 = vrot.slane %v4598_v31, 5  ;;  %v4639_v13 = vrot.slane %v8894_v51, 7 }
0x14e2   :  { %v4608_v21 = vrot.slane %v4529_v61, 5  ;;  %v4610_v38 = vrot.slane %v4600_v28, 5 }
0x14e3   :  { %v4615_v48 = vadd.f32 %v4607_v10, %v8789_v6  ;;  %v4617_v9 = vadd.f32 %v4609_v37, %v8800_v32 }
0x14e4   :  { %v4616_v50 = vadd.f32 %v4608_v21, %v8791_v18  ;;  %v4618_v33 = vadd.f32 %v4610_v38, %v8796_v29 }
0x14e5   :  { %v5496_v34 = vmul.f32 -1.442695, %v4615_v48 }
0x14e6   :  { %v5497_v12 = vmul.f32 -1.442695, %v4616_v50  ;;  %v5498_v42 = vmul.f32 -1.442695, %v4618_v33 }
0x14e7   :  { %7548 = vpow2.f32 %v5496_v34 }
0x14e8   :  { %7550 = vpow2.f32 %v5497_v12 }
0x14e9   :  { %7552 = vpow2.f32 %v5498_v42 }
0x14ea   :  { %7554 = vtanh.f32 %v4617_v9 }
0x14f1   :  { %v7549_v45 = vpop.eup %7548 }
0x14f2   :  { %v7551_v23 = vpop.eup %7550  ;;  %v4628_v41 = vadd.f32 1.0, %v7549_v45 }
0x14f3   :  { %v4629_v57 = vadd.f32 1.0, %v7551_v23  ;;  %v7553_v14 = vpop.eup %7552 }
0x14f4   :  { %7556 = vrcp.f32 %v4628_v41  ;;  %v7555_v26 = vpop.eup %7554  ;;  %v4630_v28 = vadd.f32 1.0, %v7553_v14 }
0x14f5   :  { %7558 = vrcp.f32 %v4629_v57 }
0x14f6   :  { %7560 = vrcp.f32 %v4630_v28 }
0x14fe   :  { %v7557_v46 = vpop.eup %7556 }
0x14ff   :  { %v7559_v10 = vpop.eup %7558  ;;  %v4642_v61 = vmul.f32 %v7557_v46, %v7555_v26 }
0x1500   :  { %v4641_v31 = vmul.f32 %v7559_v10, %v4639_v13  ;;  %v7561_v48 = vpop.eup %7560 }
0x1502   :  { %v8942_v21 = vadd.f32 %v4642_v61, %v4641_v31 }
0x1504   :  { %7562 = vtanh.f32 %v8942_v21 }
0x150e   :  { %v7563_v50 = vpop.eup %7562 }
0x150f   :  { %v4645_v34 = vmul.f32 %v7563_v50, %v7561_v48 }
0x1511   :  { %v4647_v12 = vrot.slane %v4645_v34, 3  ;;  %v8947_v38 = vsel %vm1825_vm2, %v8901_v59, %v4645_v34 }
0x1513   :  { %4714 = vmatmul.mubr.f32.vlgmr.msra.gmra.mrb[46].mxu0 %v4647_v12  ;;  %4785 = vmatmul.mubr.f32.vlgmr.msra.gmra.mrb[46].mxu1 %v4647_v12 }
0x1514   :  { %7050 = vmatpush1.bf16.msra.mxu0 %v8648_v56  ;;  %7082 = vmatpush1.bf16.msra.mxu1 %v8650_v19 }
0x1515   :  { %7052 = vmatprep.subr.bf16.mxu0 %v8652_v63  ;;  %7084 = vmatprep.subr.bf16.mxu1 %v8654_v4 }
0x1516   :  { %4901 = vmatprep.mubr.f32.mxu0 %v7680_v0  ;;  %4972 = vmatprep.mubr.f32.mxu1 %v7680_v0 }
0x1518   :  { %7054 = vmatpush1.bf16.msra.mxu0 %v8664_v7  ;;  %7086 = vmatpush1.bf16.msra.mxu1 %v8666_v44 }
0x1519   :  { %7056 = vmatprep.subr.bf16.mxu0 %v8670_v5  ;;  %7088 = vmatprep.subr.bf16.mxu1 %v8672_v49 }
0x151c   :  { %7058 = vmatpush1.bf16.msra.mxu0 %v8678_v58  ;;  %7090 = vmatpush1.bf16.msra.mxu1 %v8680_v47 }
0x151d   :  { %7060 = vmatprep.subr.bf16.mxu0 %v8684_v30  ;;  %7092 = vmatprep.subr.bf16.mxu1 %v8686_v60 }
0x1520   :  { %7062 = vmatpush1.bf16.msra.mxu0 %v8690_v11  ;;  %7094 = vmatpush1.bf16.msra.mxu1 %v8692_v22 }
0x1521   :  { %7064 = vmatprep.subr.bf16.mxu0 %v8696_v54  ;;  %7096 = vmatprep.subr.bf16.mxu1 %v8698_v53 }
0x1524   :  { %7066 = vmatpush1.bf16.msra.mxu0 %v8702_v39  ;;  %7098 = vmatpush1.bf16.msra.mxu1 %v8704_v40 }
0x1525   :  { %7068 = vmatprep.subr.bf16.mxu0 %v8708_v55  ;;  %7100 = vmatprep.subr.bf16.mxu1 %v8710_v36 }
0x1528   :  { %7070 = vmatpush1.bf16.msra.mxu0 %v8714_v3  ;;  %7102 = vmatpush1.bf16.msra.mxu1 %v8716_v62 }
0x1529   :  { %7072 = vmatprep.subr.bf16.mxu0 %v8720_v24  ;;  %7104 = vmatprep.subr.bf16.mxu1 %v8722_v8 }
0x152c   :  { %7074 = vmatpush1.bf16.msra.mxu0 %v8726_v2  ;;  %7106 = vmatpush1.bf16.msra.mxu1 %v8728_v27 }
0x152d   :  { %7076 = vmatprep.subr.bf16.mxu0 %v8732_v16  ;;  %7108 = vmatprep.subr.bf16.mxu1 %v8734_v15 }
0x1530   :  { %7078 = vmatpush1.bf16.msra.mxu0 %v8738_v25  ;;  %7110 = vmatpush1.bf16.msra.mxu1 %v8740_v17 }
0x1531   :  { %7112 = vmatprep.subr.bf16.mxu0 %v8634_v1  ;;  %7144 = vmatprep.subr.bf16.mxu1 %v8636_v35 }
0x15e6   :  { %v4715_v51 = vpop.f32.mrb[46].mxu0  ;;  %v4786_v59 = vpop.f32.mrb[46].mxu1 }
0x15e7   :  { %v4795_v33 = vrot.slane %v4715_v51, 4  ;;  %v4717_v37 = vpop.f32.mrb[47].mxu0  ;;  %v4788_v42 = vpop.f32.mrb[47].mxu1  ;;  %v4797_v46 = vrot.slane %v4786_v59, 4  ;;  %v4827_v51 = vrot.slane %v8942_v21, 7 }
0x15e8   :  { %v4796_v9 = vrot.slane %v4717_v37, 4  ;;  %v4798_v14 = vrot.slane %v4788_v42, 4 }
0x15e9   :  { %v4803_v45 = vadd.f32 %v4795_v33, %v8789_v6  ;;  %v4805_v10 = vadd.f32 %v4797_v46, %v8800_v32 }
0x15ea   :  { %v4804_v23 = vadd.f32 %v4796_v9, %v8791_v18  ;;  %v4806_v26 = vadd.f32 %v4798_v14, %v8796_v29 }
0x15eb   :  { %v5499_v41 = vmul.f32 -1.442695, %v4803_v45 }
0x15ec   :  { %v5500_v57 = vmul.f32 -1.442695, %v4804_v23  ;;  %v5501_v13 = vmul.f32 -1.442695, %v4806_v26 }
0x15ed   :  { %7564 = vpow2.f32 %v5499_v41 }
0x15ee   :  { %7566 = vpow2.f32 %v5500_v57 }
0x15ef   :  { %7568 = vpow2.f32 %v5501_v13 }
0x15f0   :  { %7570 = vtanh.f32 %v4805_v10 }
0x15f7   :  { %v7565_v61 = vpop.eup %7564 }
0x15f8   :  { %v7567_v28 = vpop.eup %7566  ;;  %v4816_v31 = vadd.f32 1.0, %v7565_v61 }
0x15f9   :  { %v4817_v48 = vadd.f32 1.0, %v7567_v28  ;;  %v7569_v50 = vpop.eup %7568 }
0x15fa   :  { %7572 = vrcp.f32 %v4816_v31  ;;  %v7571_v34 = vpop.eup %7570  ;;  %v4818_v42 = vadd.f32 1.0, %v7569_v50 }
0x15fb   :  { %7574 = vrcp.f32 %v4817_v48 }
0x15fc   :  { %7576 = vrcp.f32 %v4818_v42 }
0x1604   :  { %v7573_v12 = vpop.eup %7572 }
0x1605   :  { %v7575_v33 = vpop.eup %7574  ;;  %v4830_v37 = vmul.f32 %v7573_v12, %v7571_v34 }
0x1606   :  { %v4829_v59 = vmul.f32 %v7575_v33, %v4827_v51  ;;  %v7577_v45 = vpop.eup %7576 }
0x1608   :  { %v8988_v9 = vadd.f32 %v4830_v37, %v4829_v59 }
0x160a   :  { %7578 = vtanh.f32 %v8988_v9 }
0x1614   :  { %v7579_v23 = vpop.eup %7578 }
0x1615   :  { %v4833_v41 = vmul.f32 %v7579_v23, %v7577_v45 }
0x1617   :  { %v4835_v57 = vrot.slane %v4833_v41, 4  ;;  %v8993_v14 = vsel %vm1827_vm3, %v8947_v38, %v4833_v41  ;;  %v5015_v41 = vrot.slane %v8988_v9, 7 }
0x1619   :  { %4902 = vmatmul.mubr.f32.vlgmr.msra.gmra.mrb[48].mxu0 %v4835_v57  ;;  %4973 = vmatmul.mubr.f32.vlgmr.msra.gmra.mrb[48].mxu1 %v4835_v57 }
0x161a   :  { %7114 = vmatpush1.bf16.msra.mxu0 %v8648_v56  ;;  %7146 = vmatpush1.bf16.msra.mxu1 %v8650_v19 }
0x161b   :  { %7116 = vmatprep.subr.bf16.mxu0 %v8652_v63  ;;  %7148 = vmatprep.subr.bf16.mxu1 %v8654_v4 }
0x161c   :  { %5089 = vmatprep.mubr.f32.mxu0 %v7680_v0  ;;  %5160 = vmatprep.mubr.f32.mxu1 %v7680_v0 }
0x161e   :  { %7118 = vmatpush1.bf16.msra.mxu0 %v8664_v7  ;;  %7150 = vmatpush1.bf16.msra.mxu1 %v8666_v44 }
0x161f   :  { %7120 = vmatprep.subr.bf16.mxu0 %v8670_v5  ;;  %7152 = vmatprep.subr.bf16.mxu1 %v8672_v49 }
0x1622   :  { %7122 = vmatpush1.bf16.msra.mxu0 %v8678_v58  ;;  %7154 = vmatpush1.bf16.msra.mxu1 %v8680_v47 }
0x1623   :  { %7124 = vmatprep.subr.bf16.mxu0 %v8684_v30  ;;  %7156 = vmatprep.subr.bf16.mxu1 %v8686_v60 }
0x1626   :  { %7126 = vmatpush1.bf16.msra.mxu0 %v8690_v11  ;;  %7158 = vmatpush1.bf16.msra.mxu1 %v8692_v22 }
0x1627   :  { %7128 = vmatprep.subr.bf16.mxu0 %v8696_v54  ;;  %7160 = vmatprep.subr.bf16.mxu1 %v8698_v53 }
0x162a   :  { %7130 = vmatpush1.bf16.msra.mxu0 %v8702_v39  ;;  %7162 = vmatpush1.bf16.msra.mxu1 %v8704_v40 }
0x162b   :  { %7132 = vmatprep.subr.bf16.mxu0 %v8708_v55  ;;  %7164 = vmatprep.subr.bf16.mxu1 %v8710_v36 }
0x162e   :  { %7134 = vmatpush1.bf16.msra.mxu0 %v8714_v3  ;;  %7166 = vmatpush1.bf16.msra.mxu1 %v8716_v62 }
0x162f   :  { %7136 = vmatprep.subr.bf16.mxu0 %v8720_v24  ;;  %7168 = vmatprep.subr.bf16.mxu1 %v8722_v8 }
0x1632   :  { %7138 = vmatpush1.bf16.msra.mxu0 %v8726_v2  ;;  %7170 = vmatpush1.bf16.msra.mxu1 %v8728_v27 }
0x1633   :  { %7140 = vmatprep.subr.bf16.mxu0 %v8732_v16  ;;  %7172 = vmatprep.subr.bf16.mxu1 %v8734_v15 }
0x1636   :  { %7142 = vmatpush1.bf16.msra.mxu0 %v8738_v25  ;;  %7174 = vmatpush1.bf16.msra.mxu1 %v8740_v17 }
0x1637   :  { %7176 = vmatprep.subr.bf16.mxu0 %v8634_v1  ;;  %7208 = vmatprep.subr.bf16.mxu1 %v8636_v35 }
0x16ec   :  { %v4903_v21 = vpop.f32.mrb[48].mxu0  ;;  %v4974_v38 = vpop.f32.mrb[48].mxu1 }
0x16ed   :  { %v4983_v26 = vrot.slane %v4903_v21, 3  ;;  %v4905_v46 = vpop.f32.mrb[49].mxu0  ;;  %v4976_v13 = vpop.f32.mrb[49].mxu1  ;;  %v4985_v1 = vrot.slane %v4974_v38, 3 }
0x16ee   :  { %v4984_v10 = vrot.slane %v4905_v46, 3  ;;  %v4986_v50 = vrot.slane %v4976_v13, 3 }
0x16ef   :  { %v4991_v61 = vadd.f32 %v4983_v26, %v8789_v6  ;;  %v4993_v35 = vadd.f32 %v4985_v1, %v8800_v32 }
0x16f0   :  { %v4992_v28 = vadd.f32 %v4984_v10, %v8791_v18  ;;  %v4994_v34 = vadd.f32 %v4986_v50, %v8796_v29 }
0x16f1   :  { %v5502_v31 = vmul.f32 -1.442695, %v4991_v61 }
0x16f2   :  { %v5503_v48 = vmul.f32 -1.442695, %v4992_v28  ;;  %v5504_v12 = vmul.f32 -1.442695, %v4994_v34 }
0x16f3   :  { %7580 = vpow2.f32 %v5502_v31 }
0x16f4   :  { %7582 = vpow2.f32 %v5503_v48 }
0x16f5   :  { %7584 = vpow2.f32 %v5504_v12 }
0x16f6   :  { %7586 = vtanh.f32 %v4993_v35 }
0x16fd   :  { %v7581_v51 = vpop.eup %7580 }
0x16fe   :  { %v7583_v33 = vpop.eup %7582  ;;  %v5004_v37 = vadd.f32 1.0, %v7581_v51 }
0x16ff   :  { %v5005_v42 = vadd.f32 1.0, %v7583_v33  ;;  %v7585_v59 = vpop.eup %7584 }
0x1700   :  { %7588 = vrcp.f32 %v5004_v37  ;;  %v7587_v45 = vpop.eup %7586  ;;  %v5006_v26 = vadd.f32 1.0, %v7585_v59 }
0x1701   :  { %7590 = vrcp.f32 %v5005_v42 }
0x1702   :  { %7592 = vrcp.f32 %v5006_v26 }
0x170a   :  { %v7589_v23 = vpop.eup %7588 }
0x170b   :  { %v7591_v57 = vpop.eup %7590  ;;  %v5018_v21 = vmul.f32 %v7589_v23, %v7587_v45 }
0x170c   :  { %v5017_v38 = vmul.f32 %v7591_v57, %v5015_v41  ;;  %v7593_v13 = vpop.eup %7592 }
0x170e   :  { %v9034_v46 = vadd.f32 %v5018_v21, %v5017_v38 }
0x1710   :  { %7594 = vtanh.f32 %v9034_v46 }
0x171a   :  { %v7595_v10 = vpop.eup %7594 }
0x171b   :  { %v5021_v61 = vmul.f32 %v7595_v10, %v7593_v13 }
0x171d   :  { %v5023_v28 = vrot.slane %v5021_v61, 5  ;;  %v9039_v31 = vsel %vm1829_vm4, %v8993_v14, %v5021_v61 }
0x171f   :  { %5090 = vmatmul.mubr.f32.vlgmr.msra.gmra.mrb[50].mxu0 %v5023_v28  ;;  %5161 = vmatmul.mubr.f32.vlgmr.msra.gmra.mrb[50].mxu1 %v5023_v28 }
0x1720   :  { %7178 = vmatpush1.bf16.msra.mxu0 %v8648_v56  ;;  %7210 = vmatpush1.bf16.msra.mxu1 %v8650_v19 }
0x1721   :  { %7180 = vmatprep.subr.bf16.mxu0 %v8652_v63  ;;  %7212 = vmatprep.subr.bf16.mxu1 %v8654_v4 }
0x1722   :  { %5277 = vmatprep.mubr.f32.mxu0 %v7680_v0  ;;  %5348 = vmatprep.mubr.f32.mxu1 %v7680_v0 }
0x1724   :  { %7182 = vmatpush1.bf16.msra.mxu0 %v8664_v7  ;;  %7214 = vmatpush1.bf16.msra.mxu1 %v8666_v44 }
0x1725   :  { %7184 = vmatprep.subr.bf16.mxu0 %v8670_v5  ;;  %7216 = vmatprep.subr.bf16.mxu1 %v8672_v49 }
0x1728   :  { %7186 = vmatpush1.bf16.msra.mxu0 %v8678_v58  ;;  %7218 = vmatpush1.bf16.msra.mxu1 %v8680_v47 }
0x1729   :  { %7188 = vmatprep.subr.bf16.mxu0 %v8684_v30  ;;  %7220 = vmatprep.subr.bf16.mxu1 %v8686_v60 }
0x172c   :  { %7190 = vmatpush1.bf16.msra.mxu0 %v8690_v11  ;;  %7222 = vmatpush1.bf16.msra.mxu1 %v8692_v22 }
0x172d   :  { %7192 = vmatprep.subr.bf16.mxu0 %v8696_v54  ;;  %7224 = vmatprep.subr.bf16.mxu1 %v8698_v53 }
0x1730   :  { %7194 = vmatpush1.bf16.msra.mxu0 %v8702_v39  ;;  %7226 = vmatpush1.bf16.msra.mxu1 %v8704_v40 }
0x1731   :  { %7196 = vmatprep.subr.bf16.mxu0 %v8708_v55  ;;  %7228 = vmatprep.subr.bf16.mxu1 %v8710_v36 }
0x1734   :  { %7198 = vmatpush1.bf16.msra.mxu0 %v8714_v3  ;;  %7230 = vmatpush1.bf16.msra.mxu1 %v8716_v62  ;;  %v5203_v62 = vrot.slane %v9034_v46, 7 }
0x1735   :  { %7200 = vmatprep.subr.bf16.mxu0 %v8720_v24  ;;  %7232 = vmatprep.subr.bf16.mxu1 %v8722_v8 }
0x1738   :  { %7202 = vmatpush1.bf16.msra.mxu0 %v8726_v2  ;;  %7234 = vmatpush1.bf16.msra.mxu1 %v8728_v27 }
0x1739   :  { %7204 = vmatprep.subr.bf16.mxu0 %v8732_v16  ;;  %7236 = vmatprep.subr.bf16.mxu1 %v8734_v15 }
0x173c   :  { %7206 = vmatpush1.bf16.msra.mxu0 %v8738_v25  ;;  %7238 = vmatpush1.bf16.msra.mxu1 %v8740_v17 }
0x17f2   :  { %v5091_v0 = vpop.f32.mrb[50].mxu0  ;;  %v5162_v56 = vpop.f32.mrb[50].mxu1 }
0x17f3   :  { %v5171_v19 = vrot.slane %v5091_v0, 2  ;;  %v5093_v63 = vpop.f32.mrb[51].mxu0  ;;  %v5164_v4 = vpop.f32.mrb[51].mxu1  ;;  %v5173_v60 = vrot.slane %v5162_v56, 2 }
0x17f4   :  { %v5172_v7 = vrot.slane %v5093_v63, 2  ;;  %v5174_v47 = vrot.slane %v5164_v4, 2 }
0x17f5   :  { %v5179_v44 = vadd.f32 %v5171_v19, %v8789_v6  ;;  %v5181_v22 = vadd.f32 %v5173_v60, %v8800_v32 }
0x17f6   :  { %v5180_v5 = vadd.f32 %v5172_v7, %v8791_v18  ;;  %v5182_v30 = vadd.f32 %v5174_v47, %v8796_v29  ;;  %v5415_v7 = vrot.slane %v8193_v20, 4 }
0x17f7   :  { %v5505_v49 = vmul.f32 -1.442695, %v5179_v44  ;;  %v5418_v44 = vrot.slane %v8645_v52, 3 }
0x17f8   :  { %v5506_v58 = vmul.f32 -1.442695, %v5180_v5  ;;  %v5507_v11 = vmul.f32 -1.442695, %v5182_v30 }
0x17f9   :  { %7596 = vpow2.f32 %v5505_v49 }
0x17fa   :  { %7598 = vpow2.f32 %v5506_v58 }
0x17fb   :  { %7600 = vpow2.f32 %v5507_v11 }
0x17fc   :  { %7602 = vtanh.f32 %v5181_v22 }
0x1803   :  { %v7597_v54 = vpop.eup %7596 }
0x1804   :  { %v7599_v53 = vpop.eup %7598  ;;  %v5192_v39 = vadd.f32 1.0, %v7597_v54 }
0x1805   :  { %v5193_v40 = vadd.f32 1.0, %v7599_v53  ;;  %v7601_v55 = vpop.eup %7600 }
0x1806   :  { %7604 = vrcp.f32 %v5192_v39  ;;  %v7603_v36 = vpop.eup %7602  ;;  %v5194_v2 = vadd.f32 1.0, %v7601_v55 }
0x1807   :  { %7606 = vrcp.f32 %v5193_v40 }
0x1808   :  { %7608 = vrcp.f32 %v5194_v2 }
0x1810   :  { %v7605_v3 = vpop.eup %7604 }
0x1811   :  { %v7607_v24 = vpop.eup %7606  ;;  %v5206_v8 = vmul.f32 %v7605_v3, %v7603_v36 }
0x1812   :  { %v5205_v27 = vmul.f32 %v7607_v24, %v5203_v62  ;;  %v7609_v15 = vpop.eup %7608 }
0x1814   :  { %v5207_v16 = vadd.f32 %v5206_v8, %v5205_v27 }
0x1816   :  { %7610 = vtanh.f32 %v5207_v16  ;;  %v5391_v10 = vrot.slane %v5207_v16, 7 }
0x1820   :  { %v7611_v25 = vpop.eup %7610 }
0x1821   :  { %v5209_v17 = vmul.f32 %v7611_v25, %v7609_v15 }
0x1823   :  { %v5211_v9 = vrot.slane %v5209_v17, 6  ;;  %v5403_v14 = vsel %vm1831_vm5, %v9039_v31, %v5209_v17 }
0x1825   :  { %5278 = vmatmul.mubr.f32.vlgmr.msra.gmra.mrb[52].mxu0 %v5211_v9  ;;  %5349 = vmatmul.mubr.f32.vlgmr.msra.gmra.mrb[52].mxu1 %v5211_v9 }
0x18f8   :  { %v5279_v48 = vpop.f32.mrb[52].mxu0  ;;  %v5350_v50 = vpop.f32.mrb[52].mxu1 }
0x18f9   :  { %v5359_v34 = vrot.slane %v5279_v48, 1  ;;  %v5281_v1 = vpop.f32.mrb[53].mxu0  ;;  %v5352_v12 = vpop.f32.mrb[53].mxu1  ;;  %v5361_v23 = vrot.slane %v5350_v50, 1 }
0x18fa   :  { %v5360_v35 = vrot.slane %v5281_v1, 1  ;;  %v5362_v59 = vrot.slane %v5352_v12, 1 }
0x18fb   :  { %v5367_v51 = vadd.f32 %v5359_v34, %v8789_v6  ;;  %v5369_v57 = vadd.f32 %v5361_v23, %v8800_v32 }
0x18fc   :  { %v5368_v33 = vadd.f32 %v5360_v35, %v8791_v18  ;;  %v5370_v45 = vadd.f32 %v5362_v59, %v8796_v29 }
0x18fd   :  { %v5508_v37 = vmul.f32 -1.442695, %v5367_v51 }
0x18fe   :  { %v5509_v42 = vmul.f32 -1.442695, %v5368_v33  ;;  %v5510_v41 = vmul.f32 -1.442695, %v5370_v45 }
0x18ff   :  { %7612 = vpow2.f32 %v5508_v37 }
0x1900   :  { %7614 = vpow2.f32 %v5509_v42 }
0x1901   :  { %7616 = vpow2.f32 %v5510_v41 }
0x1902   :  { %7618 = vtanh.f32 %v5369_v57 }
0x1909   :  { %v7613_v21 = vpop.eup %7612 }
0x190a   :  { %v7615_v26 = vpop.eup %7614  ;;  %v5380_v38 = vadd.f32 1.0, %v7613_v21 }
0x190b   :  { %v5381_v46 = vadd.f32 1.0, %v7615_v26  ;;  %v7617_v6 = vpop.eup %7616 }
0x190c   :  { %7620 = vrcp.f32 %v5380_v38  ;;  %v7619_v18 = vpop.eup %7618  ;;  %v5382_v31 = vadd.f32 1.0, %v7617_v6 }
0x190d   :  { %7622 = vrcp.f32 %v5381_v46 }
0x190e   :  { %7624 = vrcp.f32 %v5382_v31 }
0x1916   :  { %v7621_v13 = vpop.eup %7620 }
0x1917   :  { %v7623_v61 = vpop.eup %7622  ;;  %v5394_v28 = vmul.f32 %v7621_v13, %v7619_v18 }
0x1918   :  { %v5393_v29 = vmul.f32 %v7623_v61, %v5391_v10  ;;  %v7625_v32 = vpop.eup %7624 }
0x191a   :  { %v5395_v0 = vadd.f32 %v5394_v28, %v5393_v29 }
0x191c   :  { %7626 = vtanh.f32 %v5395_v0  ;;  %v5421_v49 = vrot.slane %v5395_v0, 2 }
0x1926   :  { %v7627_v56 = vpop.eup %7626 }
0x1927   :  { %v5397_v19 = vmul.f32 %v7627_v56, %v7625_v32 }
0x1929   :  { %v5404_v63 = vsel %vm1833_vm6, %v5403_v14, %v5397_v19  ;;  %v5412_v4 = vrot.slane %v5397_v19, 5 }
0x192a   :  { %5429 = vst [vmem:[%s9103_s4] sm:$0xff] %v5404_v63 }
0x192b   :  { %v5424_v5 = vsel %vm1823_vm1, %v8660_v43, %v5412_v4 }
0x192c   :  { %v5425_v58 = vsel %vm1825_vm2, %v5424_v5, %v5415_v7 }
0x192d   :  { %v5426_v47 = vsel %vm1827_vm3, %v5425_v58, %v5418_v44 }
0x192e   :  { %v5427_v30 = vsel %vm1829_vm4, %v5426_v47, %v5421_v49 }
0x192f   :  { %v5428_v60 = vsel %vm1831_vm5, %v5427_v30, 0.0 }
0x1930   :  { %5430 = vst [vmem:[%s9103_s4 + $0x8] sm:$0xff] %v5428_v60 }
0x1931   :  { %5435 = vsyncpa [#allocation3], 1 }
0x1932   :  { %5436 = vsyncpa [#allocation5], 1 }

</bundles_post_ra>
